<compile_context>
chip_gen: v5e
topology: v5e:2x2
jax: 0.10.0
libtpu: 0.0.40
codegen_flags: <defaults>
</compile_context>

<pallas_src>
import jax
import jax.numpy as jnp
from jax.experimental import pallas as pl
from jax.experimental.pallas import tpu as pltpu


K_NEIGHBORS = 3


# ----------------------------------------------------------------------------
# Pallas kernel: fused in-VMEM 3-NN gather/interp + concat + (conv1x1+BN+ReLU)*L
# ----------------------------------------------------------------------------
def _make_fp_mlp_kernel(num_layers):
    """Kernel factory.

    Ref order per grid step (bi, ti) (batch dim squeezed):
      idx_ref : (TS, 3)    int32  3-NN indices into the sparse level
      wgt_ref : (TS, 3)    f32    normalized inverse-distance weights
      f1_ref  : (TS, C1)   bf16   dense-level skip features
      f2_ref  : (N2, C2)   bf16   full sparse-level features (VMEM resident)
      w1a_ref : (C2, H1) bf16, w1b_ref : (C1, H1) bf16, b1_ref : (1, H1) f32
      [wi_ref : (H_{i-1}, H_i) bf16, bi_ref : (1, H_i) f32]  for layers 2..L
      out_ref : (TS, H_L)  bf16
    """

    def kernel(idx_ref, wgt_ref, f1_ref, f2_ref, *rest):
        out_ref = rest[-1]
        params = rest[:-1]
        ts = idx_ref.shape[0]
        n2 = f2_ref.shape[0]

        # In-kernel 3-NN gather + inverse-distance interpolation, phrased as a
        # (TS, N2) select/weight matrix times the VMEM-resident (N2, C2)
        # sparse features on the MXU (no (B,3,N1,C2) HBM materialization).
        # TODO(synk): for very large N2 (features_2 no longer VMEM-resident)
        # fall back to manual per-page DMA + dynamic row loads.
        idx = idx_ref[...]                                       # (TS, 3) i32
        wgt = wgt_ref[...]                                       # (TS, 3) f32
        col = jax.lax.broadcasted_iota(jnp.int32, (ts, n2), 1)   # (TS, N2)
        sel = jnp.where(col == idx[:, 0:1], wgt[:, 0:1], 0.0)
        sel = sel + jnp.where(col == idx[:, 1:2], wgt[:, 1:2], 0.0)
        sel = sel + jnp.where(col == idx[:, 2:3], wgt[:, 2:3], 0.0)
        recv = jnp.dot(sel, f2_ref[...].astype(jnp.float32),
                       preferred_element_type=jnp.float32)       # (TS, C2) f32

        # Layer 1: split matmul == concat([recv, skip], -1) @ W1 (avoids an
        # in-kernel lane concat).  BN scale is pre-folded into the weights.
        w1a, w1b, b1 = params[0], params[1], params[2]
        y = jnp.dot(recv.astype(jnp.bfloat16), w1a[...],
                    preferred_element_type=jnp.float32)
        y = y + jnp.dot(f1_ref[...], w1b[...],
                        preferred_element_type=jnp.float32)
        y = jnp.maximum(y + b1[...], 0.0)

        # Remaining layers, fully fused; intermediates stay in vregs/VMEM.
        for i in range(1, num_layers):
            wi = params[1 + 2 * i]
            bi = params[2 + 2 * i]
            y = jnp.dot(y.astype(jnp.bfloat16), wi[...],
                        preferred_element_type=jnp.float32)
            y = jnp.maximum(y + bi[...], 0.0)

        out_ref[...] = y.astype(out_ref.dtype)

    return kernel


def _choose_tile(n, max_tile=1024):
    """Return (tile, padded_n).

    Tiles are multiples of 16 (bf16 sublane tile), preferring multiples of 128
    and exact divisors of n; otherwise n is padded up rather than shrinking
    the tile.
    """
    if n <= max_tile:
        npad = ((n + 15) // 16) * 16
        return npad, npad
    for t in range(max_tile - max_tile % 128, 127, -128):   # exact, mult of 128
        if n % t == 0:
            return t, n
    for t in range(max_tile - max_tile % 16, 15, -16):      # exact, mult of 16
        if n % t == 0:
            return t, n
    t = 512                                                  # pad + mask tail
    return t, ((n + t - 1) // t) * t


def _vmem_limit_bytes():
    """Scoped-VMEM budget chosen per generation (v7x only has 64 MiB phys)."""
    cap = 64 * 1024 * 1024
    try:
        cap = int(getattr(pltpu.get_tpu_info(), "vmem_capacity_bytes", cap))
    except Exception:
        pass
    return int(min(max(cap // 2, 16 * 1024 * 1024), 64 * 1024 * 1024))


def fp_mlp_pallas(idx, wgt, f1, f2, layer_params):
    """idx: (B,N1,3) int32; wgt: (B,N1,3) f32; f1: (B,N1,C1) bf16;
    f2: (B,N2,C2) bf16.

    layer_params: flat tuple (w1a, w1b, b1, w2, b2, ...), BN-folded, bf16
    weights / f32 biases.  Returns (B, N1, Cout) bf16.
    """
    b, n1, _ = idx.shape
    _, n2, c2 = f2.shape
    c1 = f1.shape[-1]
    num_layers = (len(layer_params) - 1) // 2
    out_channels = layer_params[-2].shape[-1]

    ts, n1p = _choose_tile(n1)
    if n1p != n1:
        pad = ((0, 0), (0, n1p - n1), (0, 0))
        idx = jnp.pad(idx, pad)
        wgt = jnp.pad(wgt, pad)
        f1 = jnp.pad(f1, pad)

    kernel = _make_fp_mlp_kernel(num_layers)

    in_specs = [
        pl.BlockSpec((None, ts, K_NEIGHBORS), lambda bi, ti: (bi, ti, 0)),
        pl.BlockSpec((None, ts, K_NEIGHBORS), lambda bi, ti: (bi, ti, 0)),
        pl.BlockSpec((None, ts, c1), lambda bi, ti: (bi, ti, 0)),
        # Full sparse-level features: resident in VMEM, re-fetched only when
        # the batch index changes.
        pl.BlockSpec((None, n2, c2), lambda bi, ti: (bi, 0, 0)),
    ] + [pl.BlockSpec(p.shape, lambda bi, ti: (0, 0)) for p in layer_params]

    # Advisory cost estimate so XLA schedules the kNN pre-pass around us.
    flops = 2 * b * n1p * n2 * c2                      # select-matrix matmul
    flops += 2 * b * n1p * (c2 + c1) * layer_params[0].shape[1]
    for i in range(1, num_layers):
        wi = layer_params[1 + 2 * i]
        flops += 2 * b * n1p * wi.shape[0] * wi.shape[1]
    bytes_accessed = (
        idx.size * idx.dtype.itemsize + wgt.size * wgt.dtype.itemsize
        + f1.size * f1.dtype.itemsize + f2.size * f2.dtype.itemsize
        + sum(p.size * p.dtype.itemsize for p in layer_params)
        + b * n1p * out_channels * 2)

    out = pl.pallas_call(
        kernel,
        out_shape=jax.ShapeDtypeStruct((b, n1p, out_channels), jnp.bfloat16),
        grid=(b, n1p // ts),
        in_specs=in_specs,
        out_specs=pl.BlockSpec((None, ts, out_channels),
                               lambda bi, ti: (bi, ti, 0)),
        compiler_params=pltpu.CompilerParams(
            dimension_semantics=("parallel", "parallel"),
            vmem_limit_bytes=_vmem_limit_bytes(),
        ),
        cost_estimate=pl.CostEstimate(
            flops=int(flops), transcendentals=0,
            bytes_accessed=int(bytes_accessed)),
    )(idx, wgt, f1, f2, *layer_params)

    if n1p != n1:
        out = out[:, :n1, :]
    return out


# ----------------------------------------------------------------------------
# Full forward pass (matches PointFeaturePropagationLayer.forward, eval mode)
# ----------------------------------------------------------------------------
@jax.jit
def point_feature_propagation_forward(points_1, features_1, points_2,
                                      features_2, layer_params):
    b, n1, _ = points_1.shape
    _, n2, _ = features_2.shape

    if n2 == 1:
        # TODO(synk): the original PyTorch n2==1 branch concatenates tensors
        # with inconsistent dims; implemented here as "broadcast the single
        # sparse feature to every dense point" (the evident intent), routed
        # through the same kernel with indices 0 and weights (1, 0, 0).
        idx = jnp.zeros((b, n1, K_NEIGHBORS), dtype=jnp.int32)
        weights = jnp.broadcast_to(
            jnp.array([1.0, 0.0, 0.0], dtype=jnp.float32),
            (b, n1, K_NEIGHBORS))
    else:
        # TODO(synk): knn_query_cuda2 is a data-dependent top-k; done in plain
        # JAX outside the kernel with the squared-distance convention (as in
        # PointNet++ three_nn).  For production N1/N2 this (B,N1,N2) matrix
        # should be chunked over N2 with a running top-3 or moved into a
        # second Pallas kernel.
        d2 = jnp.sum(
            (points_1[:, :, None, :] - points_2[:, None, :, :]) ** 2, axis=-1)
        neg_d2, idx = jax.lax.top_k(-d2, K_NEIGHBORS)          # (B, N1, 3)
        dist_recip = 1.0 / (-neg_d2 + 1e-8)
        weights = dist_recip / jnp.sum(dist_recip, axis=-1, keepdims=True)
        idx = idx.astype(jnp.int32)

    return fp_mlp_pallas(idx, weights.astype(jnp.float32),
                         features_1.astype(jnp.bfloat16),
                         features_2.astype(jnp.bfloat16), layer_params)


def fold_params(conv_weights, bn_gammas, bn_betas, bn_means, bn_vars, c2,
                eps=1e-5):
    """Fold eval-mode BN into the 1x1 conv weights; split layer-1 rows into
    (receive-feature rows, skip-feature rows) matching the torch cat order.

    conv_weights[i]: (cin_i, cout_i) f32  (torch (cout, cin, 1) transposed).
    Returns flat tuple (w1a, w1b, b1, w2, b2, ...); weights bf16, biases f32.
    """
    # TODO(synk): training-mode BatchNorm batch statistics are not computed;
    # eval-mode running stats are folded instead.
    params = []
    for i, (w, g, bt, mu, var) in enumerate(
            zip(conv_weights, bn_gammas, bn_betas, bn_means, bn_vars)):
        scale = g / jnp.sqrt(var + eps)
        w_f = (w * scale[None, :]).astype(jnp.bfloat16)
        bias = (bt - mu * scale).reshape(1, -1).astype(jnp.float32)
        if i == 0:
            params += [w_f[:c2, :], w_f[c2:, :], bias]
        else:
            params += [w_f, bias]
    return tuple(params)


# ----------------------------------------------------------------------------
# Pure-JAX reference of the same numerics (for the correctness check)
# ----------------------------------------------------------------------------
def reference_forward(points_1, features_1, points_2, features_2, layer_params):
    d2 = jnp.sum(
        (points_1[:, :, None, :] - points_2[:, None, :, :]) ** 2, axis=-1)
    neg_d2, idx = jax.lax.top_k(-d2, K_NEIGHBORS)
    dist_recip = 1.0 / (-neg_d2 + 1e-8)
    weights = dist_recip / jnp.sum(dist_recip, axis=-1, keepdims=True)
    nbr = jax.vmap(lambda f, i: f[i])(features_2.astype(jnp.bfloat16), idx)
    recv = jnp.sum(weights[..., None] * nbr.astype(jnp.float32), axis=2)

    w1a, w1b, b1 = layer_params[0], layer_params[1], layer_params[2]
    y = (jnp.einsum("bnc,ch->bnh", recv.astype(jnp.bfloat16), w1a,
                    preferred_element_type=jnp.float32)
         + jnp.einsum("bnc,ch->bnh", features_1.astype(jnp.bfloat16), w1b,
                      preferred_element_type=jnp.float32))
    y = jnp.maximum(y + b1, 0.0)
    num_layers = (len(layer_params) - 1) // 2
    for i in range(1, num_layers):
        wi = layer_params[1 + 2 * i]
        bi = layer_params[2 + 2 * i]
        y = jnp.einsum("bnh,hk->bnk", y.astype(jnp.bfloat16), wi,
                       preferred_element_type=jnp.float32)
        y = jnp.maximum(y + bi, 0.0)
    return y


# ----------------------------------------------------------------------------
# Main
# ----------------------------------------------------------------------------
if __name__ == "__main__":
    B, N1, N2 = 2, 512, 64          # dense / sparse point counts
    C1, C2 = 16, 32                 # dense-level / sparse-level feature widths
    MLP_UNITS = (64, 128)           # last width multiple of 128 -> lane-dense out
    IN_CHANNELS = C1 + C2

    keys = jax.random.split(jax.random.PRNGKey(0), 4 + 4 * len(MLP_UNITS))
    points_1 = jax.random.uniform(keys[0], (B, N1, 3), dtype=jnp.float32)
    features_1 = jax.random.normal(keys[1], (B, N1, C1), dtype=jnp.float32)
    points_2 = jax.random.uniform(keys[2], (B, N2, 3), dtype=jnp.float32)
    features_2 = jax.random.normal(keys[3], (B, N2, C2), dtype=jnp.float32)

    conv_ws, gammas, betas, means, vars_ = [], [], [], [], []
    cin = IN_CHANNELS
    for li, cout in enumerate(MLP_UNITS):
        kw, kg, kb, km = keys[4 + 4 * li: 8 + 4 * li]
        conv_ws.append(
            jax.random.normal(kw, (cin, cout), jnp.float32) / jnp.sqrt(cin))
        gammas.append(1.0 + 0.05 * jax.random.normal(kg, (cout,), jnp.float32))
        betas.append(0.02 * jax.random.normal(kb, (cout,), jnp.float32))
        means.append(0.01 * jax.random.normal(km, (cout,), jnp.float32))
        vars_.append(jnp.ones((cout,), jnp.float32))
        cin = cout

    layer_params = fold_params(conv_ws, gammas, betas, means, vars_, C2)

    out = point_feature_propagation_forward(
        points_1, features_1, points_2, features_2, layer_params)
    jax.block_until_ready(out)

    ref = reference_forward(points_1, features_1, points_2, features_2,
                            layer_params)
    assert out.shape == (B, N1, MLP_UNITS[-1])
    err = float(jnp.max(jnp.abs(out.astype(jnp.float32) - ref)))
    assert jnp.allclose(out.astype(jnp.float32), ref, rtol=2e-2, atol=2e-2), err

    print("KERNEL_OK")
</pallas_src>

<mosaic_0001>
module attributes {stable_mosaic.version = 11 : i64} {
  func.func @kernel(%arg0: i32, %arg1: i32, %arg2: memref<1x512x3xi32, #tpu.memory_space<vmem>>, %arg3: memref<1x512x3xf32, #tpu.memory_space<vmem>>, %arg4: memref<1x512x16xbf16, #tpu.memory_space<vmem>>, %arg5: memref<1x64x32xbf16, #tpu.memory_space<vmem>>, %arg6: memref<32x64xbf16, #tpu.memory_space<vmem>>, %arg7: memref<16x64xbf16, #tpu.memory_space<vmem>>, %arg8: memref<1x64xf32, #tpu.memory_space<vmem>>, %arg9: memref<64x128xbf16, #tpu.memory_space<vmem>>, %arg10: memref<1x128xf32, #tpu.memory_space<vmem>>, %arg11: memref<1x512x128xbf16, #tpu.memory_space<vmem>>) attributes {dimension_semantics = [#tpu.dimension_semantics<parallel>, #tpu.dimension_semantics<parallel>], iteration_bounds = array<i64: 2, 1>, scalar_prefetch = 0 : i64, scratch_operands = 0 : i64, tpu.core_type = #tpu.core_type<tc>, window_params = [{transform_indices = @transform_0, window_bounds = array<i64: 1, 512, 3>}, {transform_indices = @transform_1, window_bounds = array<i64: 1, 512, 3>}, {transform_indices = @transform_2, window_bounds = array<i64: 1, 512, 16>}, {transform_indices = @transform_3, window_bounds = array<i64: 1, 64, 32>}, {pipeline_mode = #tpu.pipeline_mode<synchronous>, transform_indices = @transform_4, window_bounds = array<i64: 32, 64>}, {pipeline_mode = #tpu.pipeline_mode<synchronous>, transform_indices = @transform_5, window_bounds = array<i64: 16, 64>}, {pipeline_mode = #tpu.pipeline_mode<synchronous>, transform_indices = @transform_6, window_bounds = array<i64: 1, 64>}, {pipeline_mode = #tpu.pipeline_mode<synchronous>, transform_indices = @transform_7, window_bounds = array<i64: 64, 128>}, {pipeline_mode = #tpu.pipeline_mode<synchronous>, transform_indices = @transform_8, window_bounds = array<i64: 1, 128>}, {transform_indices = @transform_9, window_bounds = array<i64: 1, 512, 128>}]} {
    %c0 = arith.constant 0 : index
    %c0_0 = arith.constant 0 : index
    %c0_1 = arith.constant 0 : index
    %0 = vector.load %arg2[%c0, %c0_0, %c0_1] : memref<1x512x3xi32, #tpu.memory_space<vmem>>, vector<1x512x3xi32>
    %1 = vector.shape_cast %0 : vector<1x512x3xi32> to vector<512x3xi32>
    %c0_2 = arith.constant 0 : index
    %c0_3 = arith.constant 0 : index
    %c0_4 = arith.constant 0 : index
    %2 = vector.load %arg3[%c0_2, %c0_3, %c0_4] : memref<1x512x3xf32, #tpu.memory_space<vmem>>, vector<1x512x3xf32>
    %3 = vector.shape_cast %2 : vector<1x512x3xf32> to vector<512x3xf32>
    %4 = tpu.iota {dimensions = array<i32: 1>} : vector<512x64xi32>
    %5 = vector.extract_strided_slice %1 {offsets = [0, 0], sizes = [512, 1], strides = [1, 1]} : vector<512x3xi32> to vector<512x1xi32>
    %6 = vector.broadcast %5 : vector<512x1xi32> to vector<512x64xi32>
    %7 = arith.cmpi eq, %4, %6 : vector<512x64xi32>
    %8 = vector.extract_strided_slice %3 {offsets = [0, 0], sizes = [512, 1], strides = [1, 1]} : vector<512x3xf32> to vector<512x1xf32>
    %cst = arith.constant 0.000000e+00 : f32
    %9 = vector.shape_cast %8 : vector<512x1xf32> to vector<512x1xf32>
    %10 = vector.broadcast %9 : vector<512x1xf32> to vector<512x64xf32>
    %11 = vector.broadcast %cst : f32 to vector<512x64xf32>
    %12 = arith.select %7, %10, %11 : vector<512x64xi1>, vector<512x64xf32>
    %13 = vector.extract_strided_slice %1 {offsets = [0, 1], sizes = [512, 1], strides = [1, 1]} : vector<512x3xi32> to vector<512x1xi32>
    %14 = vector.broadcast %13 : vector<512x1xi32> to vector<512x64xi32>
    %15 = arith.cmpi eq, %4, %14 : vector<512x64xi32>
    %16 = vector.extract_strided_slice %3 {offsets = [0, 1], sizes = [512, 1], strides = [1, 1]} : vector<512x3xf32> to vector<512x1xf32>
    %cst_5 = arith.constant 0.000000e+00 : f32
    %17 = vector.shape_cast %16 : vector<512x1xf32> to vector<512x1xf32>
    %18 = vector.broadcast %17 : vector<512x1xf32> to vector<512x64xf32>
    %19 = vector.broadcast %cst_5 : f32 to vector<512x64xf32>
    %20 = arith.select %15, %18, %19 : vector<512x64xi1>, vector<512x64xf32>
    %21 = arith.addf %12, %20 : vector<512x64xf32>
    %22 = vector.extract_strided_slice %1 {offsets = [0, 2], sizes = [512, 1], strides = [1, 1]} : vector<512x3xi32> to vector<512x1xi32>
    %23 = vector.broadcast %22 : vector<512x1xi32> to vector<512x64xi32>
    %24 = arith.cmpi eq, %4, %23 : vector<512x64xi32>
    %25 = vector.extract_strided_slice %3 {offsets = [0, 2], sizes = [512, 1], strides = [1, 1]} : vector<512x3xf32> to vector<512x1xf32>
    %cst_6 = arith.constant 0.000000e+00 : f32
    %26 = vector.shape_cast %25 : vector<512x1xf32> to vector<512x1xf32>
    %27 = vector.broadcast %26 : vector<512x1xf32> to vector<512x64xf32>
    %28 = vector.broadcast %cst_6 : f32 to vector<512x64xf32>
    %29 = arith.select %24, %27, %28 : vector<512x64xi1>, vector<512x64xf32>
    %30 = arith.addf %21, %29 : vector<512x64xf32>
    %c0_7 = arith.constant 0 : index
    %c0_8 = arith.constant 0 : index
    %c0_9 = arith.constant 0 : index
    %31 = vector.load %arg5[%c0_7, %c0_8, %c0_9] : memref<1x64x32xbf16, #tpu.memory_space<vmem>>, vector<1x64x32xbf16>
    %32 = vector.shape_cast %31 : vector<1x64x32xbf16> to vector<64x32xbf16>
    %33 = arith.extf %32 : vector<64x32xbf16> to vector<64x32xf32>
    %cst_10 = arith.constant dense<0.000000e+00> : vector<512x32xf32>
    %34 = tpu.matmul %30, %33, %cst_10 {dimension_numbers = #tpu.dot_dimension_numbers<[1], [0], [0], [1], [0, 0, 1, 1], [], []>} : vector<512x64xf32>, vector<64x32xf32>, vector<512x32xf32> -> vector<512x32xf32>
    %35 = arith.truncf %34 : vector<512x32xf32> to vector<512x32xbf16>
    %c0_11 = arith.constant 0 : index
    %c0_12 = arith.constant 0 : index
    %36 = vector.load %arg6[%c0_11, %c0_12] : memref<32x64xbf16, #tpu.memory_space<vmem>>, vector<32x64xbf16>
    %cst_13 = arith.constant dense<0.000000e+00> : vector<512x64xf32>
    %37 = tpu.matmul %35, %36, %cst_13 {dimension_numbers = #tpu.dot_dimension_numbers<[1], [0], [0], [1], [0, 0, 1, 1], [], []>} : vector<512x32xbf16>, vector<32x64xbf16>, vector<512x64xf32> -> vector<512x64xf32>
    %c0_14 = arith.constant 0 : index
    %c0_15 = arith.constant 0 : index
    %c0_16 = arith.constant 0 : index
    %38 = vector.load %arg4[%c0_14, %c0_15, %c0_16] : memref<1x512x16xbf16, #tpu.memory_space<vmem>>, vector<1x512x16xbf16>
    %39 = vector.shape_cast %38 : vector<1x512x16xbf16> to vector<512x16xbf16>
    %c0_17 = arith.constant 0 : index
    %c0_18 = arith.constant 0 : index
    %40 = vector.load %arg7[%c0_17, %c0_18] : memref<16x64xbf16, #tpu.memory_space<vmem>>, vector<16x64xbf16>
    %cst_19 = arith.constant dense<0.000000e+00> : vector<512x64xf32>
    %41 = tpu.matmul %39, %40, %cst_19 {dimension_numbers = #tpu.dot_dimension_numbers<[1], [0], [0], [1], [0, 0, 1, 1], [], []>} : vector<512x16xbf16>, vector<16x64xbf16>, vector<512x64xf32> -> vector<512x64xf32>
    %42 = arith.addf %37, %41 : vector<512x64xf32>
    %c0_20 = arith.constant 0 : index
    %c0_21 = arith.constant 0 : index
    %43 = vector.load %arg8[%c0_20, %c0_21] : memref<1x64xf32, #tpu.memory_space<vmem>>, vector<1x64xf32>
    %44 = vector.broadcast %43 : vector<1x64xf32> to vector<512x64xf32>
    %45 = arith.addf %42, %44 : vector<512x64xf32>
    %cst_22 = arith.constant 0.000000e+00 : f32
    %46 = vector.broadcast %cst_22 : f32 to vector<512x64xf32>
    %47 = arith.maximumf %45, %46 : vector<512x64xf32>
    %48 = arith.truncf %47 : vector<512x64xf32> to vector<512x64xbf16>
    %c0_23 = arith.constant 0 : index
    %c0_24 = arith.constant 0 : index
    %49 = vector.load %arg9[%c0_23, %c0_24] : memref<64x128xbf16, #tpu.memory_space<vmem>>, vector<64x128xbf16>
    %cst_25 = arith.constant dense<0.000000e+00> : vector<512x128xf32>
    %50 = tpu.matmul %48, %49, %cst_25 {dimension_numbers = #tpu.dot_dimension_numbers<[1], [0], [0], [1], [0, 0, 1, 1], [], []>} : vector<512x64xbf16>, vector<64x128xbf16>, vector<512x128xf32> -> vector<512x128xf32>
    %c0_26 = arith.constant 0 : index
    %c0_27 = arith.constant 0 : index
    %51 = vector.load %arg10[%c0_26, %c0_27] : memref<1x128xf32, #tpu.memory_space<vmem>>, vector<1x128xf32>
    %52 = vector.broadcast %51 : vector<1x128xf32> to vector<512x128xf32>
    %53 = arith.addf %50, %52 : vector<512x128xf32>
    %cst_28 = arith.constant 0.000000e+00 : f32
    %54 = vector.broadcast %cst_28 : f32 to vector<512x128xf32>
    %55 = arith.maximumf %53, %54 : vector<512x128xf32>
    %56 = arith.truncf %55 : vector<512x128xf32> to vector<512x128xbf16>
    %c0_29 = arith.constant 0 : index
    %c0_30 = arith.constant 0 : index
    %c0_31 = arith.constant 0 : index
    %57 = vector.load %arg11[%c0_29, %c0_30, %c0_31] : memref<1x512x128xbf16, #tpu.memory_space<vmem>>, vector<1x512x128xbf16>
    %58 = vector.shape_cast %57 : vector<1x512x128xbf16> to vector<512x128xbf16>
    %59 = vector.shape_cast %56 : vector<512x128xbf16> to vector<1x512x128xbf16>
    tpu.vector_store %arg11[%c0_29, %c0_30, %c0_31], %59 {strides = array<i32>} : memref<1x512x128xbf16, #tpu.memory_space<vmem>>, vector<1x512x128xbf16>,
    return
  }
  func.func @transform_0(%arg0: i32, %arg1: i32) -> (i32, i32, i32) {
    %c0_i32 = arith.constant 0 : i32
    %c0_i32_0 = arith.constant 0 : i32
    return %arg0, %arg1, %c0_i32 : i32, i32, i32
  }
  func.func @transform_1(%arg0: i32, %arg1: i32) -> (i32, i32, i32) {
    %c0_i32 = arith.constant 0 : i32
    %c0_i32_0 = arith.constant 0 : i32
    return %arg0, %arg1, %c0_i32 : i32, i32, i32
  }
  func.func @transform_2(%arg0: i32, %arg1: i32) -> (i32, i32, i32) {
    %c0_i32 = arith.constant 0 : i32
    %c0_i32_0 = arith.constant 0 : i32
    return %arg0, %arg1, %c0_i32 : i32, i32, i32
  }
  func.func @transform_3(%arg0: i32, %arg1: i32) -> (i32, i32, i32) {
    %c0_i32 = arith.constant 0 : i32
    %c0_i32_0 = arith.constant 0 : i32
    %c0_i32_1 = arith.constant 0 : i32
    return %arg0, %c0_i32, %c0_i32_0 : i32, i32, i32
  }
  func.func @transform_4(%arg0: i32, %arg1: i32) -> (i32, i32) {
    %c0_i32 = arith.constant 0 : i32
    %c0_i32_0 = arith.constant 0 : i32
    %c0_i32_1 = arith.constant 0 : i32
    return %c0_i32, %c0_i32_0 : i32, i32
  }
  func.func @transform_5(%arg0: i32, %arg1: i32) -> (i32, i32) {
    %c0_i32 = arith.constant 0 : i32
    %c0_i32_0 = arith.constant 0 : i32
    %c0_i32_1 = arith.constant 0 : i32
    return %c0_i32, %c0_i32_0 : i32, i32
  }
  func.func @transform_6(%arg0: i32, %arg1: i32) -> (i32, i32) {
    %c0_i32 = arith.constant 0 : i32
    %c0_i32_0 = arith.constant 0 : i32
    %c0_i32_1 = arith.constant 0 : i32
    return %c0_i32, %c0_i32_0 : i32, i32
  }
  func.func @transform_7(%arg0: i32, %arg1: i32) -> (i32, i32) {
    %c0_i32 = arith.constant 0 : i32
    %c0_i32_0 = arith.constant 0 : i32
    %c0_i32_1 = arith.constant 0 : i32
    return %c0_i32, %c0_i32_0 : i32, i32
  }
  func.func @transform_8(%arg0: i32, %arg1: i32) -> (i32, i32) {
    %c0_i32 = arith.constant 0 : i32
    %c0_i32_0 = arith.constant 0 : i32
    %c0_i32_1 = arith.constant 0 : i32
    return %c0_i32, %c0_i32_0 : i32, i32
  }
  func.func @transform_9(%arg0: i32, %arg1: i32) -> (i32, i32, i32) {
    %c0_i32 = arith.constant 0 : i32
    %c0_i32_0 = arith.constant 0 : i32
    return %arg0, %arg1, %c0_i32 : i32, i32, i32
  }
}

</mosaic_0001>

<bundles_post_ra>
// kernel: neg.2
= control target key start
LH: loop header
LB: loop body
LE: loop exit
PB: predicated region body
PF: predicated region fallthrough
CT: control target
= control target key end

     0   :  { %s1032_s0 = inlined_call_operand.vmem [shape: f32[2,512,64], index: 0, kind: input, shape index: {}]   ;;  %s1033_s1 = inlined_call_operand.vmem [shape: f32[2,512,64], index: 1, kind: output, shape index: {}]  }
   0x1   :  { %v2_v0 = vld [vmem:[%s1032_s0] sm:$0xff]  ;;  %v542_v30 = vld [vmem:[%s1032_s0 + $0x8] sm:$0xff]  ;;  %v574_v62 = vld [vmem:[%s1032_s0 + $0x10] sm:$0xff] }
   0x2   :  { %v512_v1 = vld [vmem:[%s1032_s0 + $0x100] sm:$0xff]  ;;  %v5_v3 = vxor.u32 2147483648, %v2_v0  ;;  %v544_v32 = vld [vmem:[%s1032_s0 + $0x108] sm:$0xff]  ;;  %v132_v35 = vxor.u32 2147483648, %v542_v30  ;;  %v576_v0 = vld [vmem:[%s1032_s0 + $0x110] sm:$0xff] }
   0x3   :  { %v514_v2 = vld [vmem:[%s1032_s0 + $0x20] sm:$0xff]  ;;  %v12_v4 = vxor.u32 2147483648, %v512_v1  ;;  %v546_v34 = vld [vmem:[%s1032_s0 + $0x28] sm:$0xff]  ;;  %v140_v37 = vxor.u32 2147483648, %v544_v32  ;;  %v606_v30 = vld [vmem:[%s1032_s0 + $0x18] sm:$0xff] }
   0x4   :  { %v20_v5 = vxor.u32 2147483648, %v514_v2  ;;  %v516_v6 = vld [vmem:[%s1032_s0 + $0x120] sm:$0xff]  ;;  %7 = vst [vmem:[%s1033_s1] sm:$0xff] %v5_v3  ;;  %v548_v36 = vld [vmem:[%s1032_s0 + $0x128] sm:$0xff]  ;;  %v148_v39 = vxor.u32 2147483648, %v546_v34  ;;  %v578_v2 = vld [vmem:[%s1032_s0 + $0x30] sm:$0xff]  ;;  %v260_v3 = vxor.u32 2147483648, %v574_v62 }
   0x5   :  { %v518_v7 = vld [vmem:[%s1032_s0 + $0x40] sm:$0xff]  ;;  %v28_v9 = vxor.u32 2147483648, %v516_v6  ;;  %513 = vst [vmem:[%s1033_s1 + $0x100] sm:$0xff] %v12_v4  ;;  %v550_v38 = vld [vmem:[%s1032_s0 + $0x48] sm:$0xff]  ;;  %v156_v41 = vxor.u32 2147483648, %v548_v36  ;;  %v580_v4 = vld [vmem:[%s1032_s0 + $0x130] sm:$0xff] }
   0x6   :  { %v520_v8 = vld [vmem:[%s1032_s0 + $0x140] sm:$0xff]  ;;  %v36_v11 = vxor.u32 2147483648, %v518_v7  ;;  %515 = vst [vmem:[%s1033_s1 + $0x20] sm:$0xff] %v20_v5  ;;  %v552_v40 = vld [vmem:[%s1032_s0 + $0x148] sm:$0xff]  ;;  %v164_v43 = vxor.u32 2147483648, %v550_v38  ;;  %v268_v5 = vxor.u32 2147483648, %v576_v0 }
   0x7   :  { %v522_v10 = vld [vmem:[%s1032_s0 + $0x60] sm:$0xff]  ;;  %v44_v13 = vxor.u32 2147483648, %v520_v8  ;;  %517 = vst [vmem:[%s1033_s1 + $0x120] sm:$0xff] %v28_v9  ;;  %v554_v42 = vld [vmem:[%s1032_s0 + $0x68] sm:$0xff]  ;;  %v172_v45 = vxor.u32 2147483648, %v552_v40  ;;  %v582_v6 = vld [vmem:[%s1032_s0 + $0x50] sm:$0xff] }
   0x8   :  { %v524_v12 = vld [vmem:[%s1032_s0 + $0x160] sm:$0xff]  ;;  %v52_v15 = vxor.u32 2147483648, %v522_v10  ;;  %519 = vst [vmem:[%s1033_s1 + $0x40] sm:$0xff] %v36_v11  ;;  %v556_v44 = vld [vmem:[%s1032_s0 + $0x168] sm:$0xff]  ;;  %v180_v47 = vxor.u32 2147483648, %v554_v42  ;;  %v276_v7 = vxor.u32 2147483648, %v578_v2 }
   0x9   :  { %v526_v14 = vld [vmem:[%s1032_s0 + $0x80] sm:$0xff]  ;;  %v60_v17 = vxor.u32 2147483648, %v524_v12  ;;  %521 = vst [vmem:[%s1033_s1 + $0x140] sm:$0xff] %v44_v13  ;;  %v558_v46 = vld [vmem:[%s1032_s0 + $0x88] sm:$0xff]  ;;  %v188_v49 = vxor.u32 2147483648, %v556_v44  ;;  %v584_v8 = vld [vmem:[%s1032_s0 + $0x150] sm:$0xff] }
   0xa   :  { %v528_v16 = vld [vmem:[%s1032_s0 + $0x180] sm:$0xff]  ;;  %v68_v19 = vxor.u32 2147483648, %v526_v14  ;;  %523 = vst [vmem:[%s1033_s1 + $0x60] sm:$0xff] %v52_v15  ;;  %v560_v48 = vld [vmem:[%s1032_s0 + $0x188] sm:$0xff]  ;;  %v196_v51 = vxor.u32 2147483648, %v558_v46  ;;  %v284_v9 = vxor.u32 2147483648, %v580_v4 }
   0xb   :  { %v530_v18 = vld [vmem:[%s1032_s0 + $0xa0] sm:$0xff]  ;;  %v76_v21 = vxor.u32 2147483648, %v528_v16  ;;  %525 = vst [vmem:[%s1033_s1 + $0x160] sm:$0xff] %v60_v17  ;;  %v562_v50 = vld [vmem:[%s1032_s0 + $0xa8] sm:$0xff]  ;;  %v204_v53 = vxor.u32 2147483648, %v560_v48  ;;  %v586_v10 = vld [vmem:[%s1032_s0 + $0x70] sm:$0xff] }
   0xc   :  { %v532_v20 = vld [vmem:[%s1032_s0 + $0x1a0] sm:$0xff]  ;;  %v84_v23 = vxor.u32 2147483648, %v530_v18  ;;  %527 = vst [vmem:[%s1033_s1 + $0x80] sm:$0xff] %v68_v19  ;;  %v564_v52 = vld [vmem:[%s1032_s0 + $0x1a8] sm:$0xff]  ;;  %v212_v55 = vxor.u32 2147483648, %v562_v50  ;;  %v292_v11 = vxor.u32 2147483648, %v582_v6 }
   0xd   :  { %v534_v22 = vld [vmem:[%s1032_s0 + $0xc0] sm:$0xff]  ;;  %v92_v25 = vxor.u32 2147483648, %v532_v20  ;;  %529 = vst [vmem:[%s1033_s1 + $0x180] sm:$0xff] %v76_v21  ;;  %v566_v54 = vld [vmem:[%s1032_s0 + $0xc8] sm:$0xff]  ;;  %v220_v57 = vxor.u32 2147483648, %v564_v52  ;;  %v588_v12 = vld [vmem:[%s1032_s0 + $0x170] sm:$0xff] }
   0xe   :  { %v536_v24 = vld [vmem:[%s1032_s0 + $0x1c0] sm:$0xff]  ;;  %v100_v27 = vxor.u32 2147483648, %v534_v22  ;;  %531 = vst [vmem:[%s1033_s1 + $0xa0] sm:$0xff] %v84_v23  ;;  %v568_v56 = vld [vmem:[%s1032_s0 + $0x1c8] sm:$0xff]  ;;  %v228_v59 = vxor.u32 2147483648, %v566_v54  ;;  %v300_v13 = vxor.u32 2147483648, %v584_v8 }
   0xf   :  { %v538_v26 = vld [vmem:[%s1032_s0 + $0xe0] sm:$0xff]  ;;  %v108_v29 = vxor.u32 2147483648, %v536_v24  ;;  %533 = vst [vmem:[%s1033_s1 + $0x1a0] sm:$0xff] %v92_v25  ;;  %v570_v58 = vld [vmem:[%s1032_s0 + $0xe8] sm:$0xff]  ;;  %v236_v61 = vxor.u32 2147483648, %v568_v56  ;;  %v590_v14 = vld [vmem:[%s1032_s0 + $0x90] sm:$0xff] }
  0x10   :  { %v540_v28 = vld [vmem:[%s1032_s0 + $0x1e0] sm:$0xff]  ;;  %v116_v31 = vxor.u32 2147483648, %v538_v26  ;;  %535 = vst [vmem:[%s1033_s1 + $0xc0] sm:$0xff] %v100_v27  ;;  %v572_v60 = vld [vmem:[%s1032_s0 + $0x1e8] sm:$0xff]  ;;  %v244_v63 = vxor.u32 2147483648, %v570_v58  ;;  %v308_v15 = vxor.u32 2147483648, %v586_v10 }
  0x11   :  { %v124_v33 = vxor.u32 2147483648, %v540_v28  ;;  %537 = vst [vmem:[%s1033_s1 + $0x1c0] sm:$0xff] %v108_v29  ;;  %v252_v1 = vxor.u32 2147483648, %v572_v60  ;;  %v592_v16 = vld [vmem:[%s1032_s0 + $0x190] sm:$0xff]  ;;  %v316_v17 = vxor.u32 2147483648, %v588_v12  ;;  %v324_v19 = vxor.u32 2147483648, %v590_v14 }
  0x12   :  { %539 = vst [vmem:[%s1033_s1 + $0xe0] sm:$0xff] %v116_v31  ;;  %v594_v18 = vld [vmem:[%s1032_s0 + $0xb0] sm:$0xff]  ;;  %v332_v21 = vxor.u32 2147483648, %v592_v16  ;;  %v608_v32 = vld [vmem:[%s1032_s0 + $0x118] sm:$0xff] }
  0x13   :  { %541 = vst [vmem:[%s1033_s1 + $0x1e0] sm:$0xff] %v124_v33  ;;  %v596_v20 = vld [vmem:[%s1032_s0 + $0x1b0] sm:$0xff]  ;;  %v340_v23 = vxor.u32 2147483648, %v594_v18  ;;  %v610_v34 = vld [vmem:[%s1032_s0 + $0x38] sm:$0xff] }
  0x14   :  { %543 = vst [vmem:[%s1033_s1 + $0x8] sm:$0xff] %v132_v35  ;;  %v598_v22 = vld [vmem:[%s1032_s0 + $0xd0] sm:$0xff]  ;;  %v348_v25 = vxor.u32 2147483648, %v596_v20  ;;  %v388_v35 = vxor.u32 2147483648, %v606_v30  ;;  %v612_v36 = vld [vmem:[%s1032_s0 + $0x138] sm:$0xff] }
  0x15   :  { %545 = vst [vmem:[%s1033_s1 + $0x108] sm:$0xff] %v140_v37  ;;  %v600_v24 = vld [vmem:[%s1032_s0 + $0x1d0] sm:$0xff]  ;;  %v356_v27 = vxor.u32 2147483648, %v598_v22  ;;  %v396_v37 = vxor.u32 2147483648, %v608_v32  ;;  %v614_v38 = vld [vmem:[%s1032_s0 + $0x58] sm:$0xff] }
  0x16   :  { %547 = vst [vmem:[%s1033_s1 + $0x28] sm:$0xff] %v148_v39  ;;  %v602_v26 = vld [vmem:[%s1032_s0 + $0xf0] sm:$0xff]  ;;  %v364_v29 = vxor.u32 2147483648, %v600_v24  ;;  %v404_v39 = vxor.u32 2147483648, %v610_v34  ;;  %v616_v40 = vld [vmem:[%s1032_s0 + $0x158] sm:$0xff] }
  0x17   :  { %549 = vst [vmem:[%s1033_s1 + $0x128] sm:$0xff] %v156_v41  ;;  %v604_v28 = vld [vmem:[%s1032_s0 + $0x1f0] sm:$0xff]  ;;  %v372_v31 = vxor.u32 2147483648, %v602_v26  ;;  %v412_v41 = vxor.u32 2147483648, %v612_v36  ;;  %v618_v42 = vld [vmem:[%s1032_s0 + $0x78] sm:$0xff] }
  0x18   :  { %551 = vst [vmem:[%s1033_s1 + $0x48] sm:$0xff] %v164_v43  ;;  %v380_v33 = vxor.u32 2147483648, %v604_v28  ;;  %v420_v43 = vxor.u32 2147483648, %v614_v38  ;;  %v620_v44 = vld [vmem:[%s1032_s0 + $0x178] sm:$0xff] }
  0x19   :  { %553 = vst [vmem:[%s1033_s1 + $0x148] sm:$0xff] %v172_v45  ;;  %v428_v45 = vxor.u32 2147483648, %v616_v40  ;;  %v622_v46 = vld [vmem:[%s1032_s0 + $0x98] sm:$0xff] }
  0x1a   :  { %555 = vst [vmem:[%s1033_s1 + $0x68] sm:$0xff] %v180_v47  ;;  %v436_v47 = vxor.u32 2147483648, %v618_v42  ;;  %v624_v48 = vld [vmem:[%s1032_s0 + $0x198] sm:$0xff] }
  0x1b   :  { %557 = vst [vmem:[%s1033_s1 + $0x168] sm:$0xff] %v188_v49  ;;  %v444_v49 = vxor.u32 2147483648, %v620_v44  ;;  %v626_v50 = vld [vmem:[%s1032_s0 + $0xb8] sm:$0xff] }
  0x1c   :  { %559 = vst [vmem:[%s1033_s1 + $0x88] sm:$0xff] %v196_v51  ;;  %v452_v51 = vxor.u32 2147483648, %v622_v46  ;;  %v628_v52 = vld [vmem:[%s1032_s0 + $0x1b8] sm:$0xff] }
  0x1d   :  { %561 = vst [vmem:[%s1033_s1 + $0x188] sm:$0xff] %v204_v53  ;;  %v460_v53 = vxor.u32 2147483648, %v624_v48  ;;  %v630_v54 = vld [vmem:[%s1032_s0 + $0xd8] sm:$0xff] }
  0x1e   :  { %563 = vst [vmem:[%s1033_s1 + $0xa8] sm:$0xff] %v212_v55  ;;  %v468_v55 = vxor.u32 2147483648, %v626_v50  ;;  %v632_v56 = vld [vmem:[%s1032_s0 + $0x1d8] sm:$0xff] }
  0x1f   :  { %565 = vst [vmem:[%s1033_s1 + $0x1a8] sm:$0xff] %v220_v57  ;;  %v476_v57 = vxor.u32 2147483648, %v628_v52  ;;  %v634_v58 = vld [vmem:[%s1032_s0 + $0xf8] sm:$0xff] }
  0x20   :  { %567 = vst [vmem:[%s1033_s1 + $0xc8] sm:$0xff] %v228_v59  ;;  %v484_v59 = vxor.u32 2147483648, %v630_v54  ;;  %v636_v60 = vld [vmem:[%s1032_s0 + $0x1f8] sm:$0xff]  ;;  %v500_v62 = vxor.u32 2147483648, %v634_v58 }
  0x21   :  { %569 = vst [vmem:[%s1033_s1 + $0x1c8] sm:$0xff] %v236_v61  ;;  %v492_v61 = vxor.u32 2147483648, %v632_v56 }
  0x22   :  { %571 = vst [vmem:[%s1033_s1 + $0xe8] sm:$0xff] %v244_v63  ;;  %v508_v63 = vxor.u32 2147483648, %v636_v60 }
  0x23   :  { %573 = vst [vmem:[%s1033_s1 + $0x1e8] sm:$0xff] %v252_v1 }
  0x24   :  { %575 = vst [vmem:[%s1033_s1 + $0x10] sm:$0xff] %v260_v3 }
  0x25   :  { %577 = vst [vmem:[%s1033_s1 + $0x110] sm:$0xff] %v268_v5 }
  0x26   :  { %579 = vst [vmem:[%s1033_s1 + $0x30] sm:$0xff] %v276_v7 }
  0x27   :  { %581 = vst [vmem:[%s1033_s1 + $0x130] sm:$0xff] %v284_v9 }
  0x28   :  { %583 = vst [vmem:[%s1033_s1 + $0x50] sm:$0xff] %v292_v11 }
  0x29   :  { %585 = vst [vmem:[%s1033_s1 + $0x150] sm:$0xff] %v300_v13 }
  0x2a   :  { %587 = vst [vmem:[%s1033_s1 + $0x70] sm:$0xff] %v308_v15 }
  0x2b   :  { %589 = vst [vmem:[%s1033_s1 + $0x170] sm:$0xff] %v316_v17 }
  0x2c   :  { %591 = vst [vmem:[%s1033_s1 + $0x90] sm:$0xff] %v324_v19 }
  0x2d   :  { %593 = vst [vmem:[%s1033_s1 + $0x190] sm:$0xff] %v332_v21 }
  0x2e   :  { %595 = vst [vmem:[%s1033_s1 + $0xb0] sm:$0xff] %v340_v23 }
  0x2f   :  { %597 = vst [vmem:[%s1033_s1 + $0x1b0] sm:$0xff] %v348_v25 }
  0x30   :  { %599 = vst [vmem:[%s1033_s1 + $0xd0] sm:$0xff] %v356_v27 }
  0x31   :  { %601 = vst [vmem:[%s1033_s1 + $0x1d0] sm:$0xff] %v364_v29 }
  0x32   :  { %603 = vst [vmem:[%s1033_s1 + $0xf0] sm:$0xff] %v372_v31 }
  0x33   :  { %605 = vst [vmem:[%s1033_s1 + $0x1f0] sm:$0xff] %v380_v33 }
  0x34   :  { %607 = vst [vmem:[%s1033_s1 + $0x18] sm:$0xff] %v388_v35 }
  0x35   :  { %609 = vst [vmem:[%s1033_s1 + $0x118] sm:$0xff] %v396_v37 }
  0x36   :  { %611 = vst [vmem:[%s1033_s1 + $0x38] sm:$0xff] %v404_v39 }
  0x37   :  { %613 = vst [vmem:[%s1033_s1 + $0x138] sm:$0xff] %v412_v41 }
  0x38   :  { %615 = vst [vmem:[%s1033_s1 + $0x58] sm:$0xff] %v420_v43 }
  0x39   :  { %617 = vst [vmem:[%s1033_s1 + $0x158] sm:$0xff] %v428_v45 }
  0x3a   :  { %619 = vst [vmem:[%s1033_s1 + $0x78] sm:$0xff] %v436_v47 }
  0x3b   :  { %621 = vst [vmem:[%s1033_s1 + $0x178] sm:$0xff] %v444_v49 }
  0x3c   :  { %623 = vst [vmem:[%s1033_s1 + $0x98] sm:$0xff] %v452_v51 }
  0x3d   :  { %625 = vst [vmem:[%s1033_s1 + $0x198] sm:$0xff] %v460_v53 }
  0x3e   :  { %627 = vst [vmem:[%s1033_s1 + $0xb8] sm:$0xff] %v468_v55 }
  0x3f   :  { %629 = vst [vmem:[%s1033_s1 + $0x1b8] sm:$0xff] %v476_v57 }
  0x40   :  { %631 = vst [vmem:[%s1033_s1 + $0xd8] sm:$0xff] %v484_v59 }
  0x41   :  { %633 = vst [vmem:[%s1033_s1 + $0x1d8] sm:$0xff] %v492_v61 }
  0x42   :  { %635 = vst [vmem:[%s1033_s1 + $0xf8] sm:$0xff] %v500_v62 }
  0x43   :  { %637 = vst [vmem:[%s1033_s1 + $0x1f8] sm:$0xff] %v508_v63 }

// kernel: point_feature_propagation_forward.1
= control target key start
LH: loop header
LB: loop body
LE: loop exit
PB: predicated region body
PF: predicated region fallthrough
CT: control target
= control target key end

     0   :  { %14 = vsyncpa [#allocation3], 0  ;;  %s7922_s0 = inlined_call_operand.vmem [shape: s32[2,512,3], index: 0, kind: input, shape index: {}]   ;;  %s7923_s1 = inlined_call_operand.vmem [shape: f32[2,512,3], index: 1, kind: input, shape index: {}]   ;;  %s7924_s2 = inlined_call_operand.vmem [shape: bf16[2,512,16], index: 2, kind: input, shape index: {}]   ;;  %s7925_s3 = inlined_call_operand.vmem [shape: bf16[2,64,32], index: 3, kind: input, shape index: {}]   ;;  %s7926_s4 = inlined_call_operand.vmem [shape: bf16[32,64], index: 4, kind: input, shape index: {}]   ;;  %s7927_s5 = inlined_call_operand.vmem [shape: bf16[16,64], index: 5, kind: input, shape index: {}]   ;;  %s7928_s6 = inlined_call_operand.vmem [shape: f32[1,64], index: 6, kind: input, shape index: {}]   ;;  %s7929_s7 = inlined_call_operand.vmem [shape: bf16[64,128], index: 7, kind: input, shape index: {}]   ;;  %s7930_s8 = inlined_call_operand.vmem [shape: f32[1,128], index: 8, kind: input, shape index: {}]   ;;  %s7931_s9 = inlined_call_operand.hbm [shape: bf16[2,512,128], index: 9, kind: output, shape index: {}]  }
   0x1   :  { %16 = vsyncpa [#allocation3 + $0x1], 0  ;;  %s5433_s30 = smov 0   ;;  %s5435_s10 = smov 0  }
   0x2   :  { %s5437_s11 = smov 0   ;;  %s5439_s12 = smov 0  }
   0x3   :  { %s5441_s13 = smov 0   ;;  %s5443_s14 = smov 0  }
   0x4 LB: > { %s4537_s15 = sadd.s32 4294967295, %s5376_s14   ;;  %s4538_s16 = sadd.s32 4294967294, %s5376_s14   ;;  %s5376_s14 = sphi %s5443_s14, %s22_s14   ;;  %s5372_s13 = sphi %s5441_s13, %s8459_s13   ;;  %s5368_s12 = sphi %s5439_s12, %s8458_s12   ;;  %s5364_s11 = sphi %s5437_s11, %s8457_s11   ;;  %s5360_s10 = sphi %s5435_s10, %s8456_s10   ;;  %s5356_s30 = sphi %s5433_s30, %s8455_s30  }
   0x5   : > { %s34_s17 = sadd.s32 1, %s5372_s13  ;;  %s258_s18 = sadd.s32 1, %s5364_s11 }
   0x6   : > { %p36_p0 = scmp.ge.s32.totalorder %s34_s17, 2  ;;  %p268_p1 = scmp.ne.s32.totalorder %s5364_s11, %s5360_s10 }
   0x7   : > { %p269_p2 = scmp.eq.s32.totalorder %s4537_s15, 1  ;;  %p274_p3 = scmp.ne.s32.totalorder %s5360_s10, %s5356_s30 }
   0x8   : > { %s8461_s17 = smov (%p36_p0, %s34_s17), 0  ;;  %p275_p5 = scmp.eq.s32.totalorder %s4538_s16, 1 }
   0x9   : > { %p5473_p4 = por %p269_p2, %p268_p1  ;;  %s253_s20 = ssub.s32 %s5372_s13, %s8461_s17 }
   0xa   : > { %p4541_p6 = scmp.ge.s32.totalorder %s5376_s14, 1  ;;  %p256_p7 = scmp.eq.s32.totalorder %s253_s20, 0 }
   0xb   : > { %p5480_p8 = por %p275_p5, %p274_p3  ;;  %p355_p9 = scmp.lt.s32.totalorder %s5376_s14, 3 }
   0xc   : > { %s5486_s22 = scalar_select %p256_p7, %s5364_s11, %s258_s18  }
   0xd   : > { %p356_p10 = pnand %p4541_p6, %p355_p9 }
   0xf   : > { %359 = sbr.rel (%p356_p10) target bundleno = 1670 (0x686), region = 56 }
  0x14   : > { %p419_p11 = scmp.lt.s32.totalorder %s5368_s12, 1  ;;  %v5378_v0 = vmov 0   ;;  %vm2521_vm3 = vcmask 523264   ;;  %s5318_s28 = scalar_lea.hbm %s7931_s9, 512 }
  0x15   : > { %5188 = vset.pattern.permute.xlu2 %v5378_v0  ;;  %5187 = vset.pattern.permute.xlu1 %v5378_v0 }
  0x16   : > { %5186 = vset.pattern.permute.xlu0 %v5378_v0  ;;  %s5490_s23 = scalar_select %p419_p11, %s5368_s12, 1 }
  0x18   : > { %s4872_s24 = sshll.u32 %s5490_s23, 9  ;;  %s4875_s16 = sshll.u32 %s5490_s23, 5 }
  0x19   : > { %s5498_s27 = scalar_lea.vmem %s7922_s0, %s4872_s24  ;;  %s5803_s15 = scalar_lea.vmem %s7923_s1, %s4872_s24 }
  0x1a   : > { %v5501_v1 = vld [vmem:[%s5498_s27 + $0x20] sm:$0xff]  ;;  %v5504_v2 = vld [vmem:[%s5498_s27 + $0x10] sm:$0xff]  ;;  %v5513_v4 = vld [vmem:[%s5498_s27 + $0x28] sm:$0xff]  ;;  %s452_s24 = scalar_lea.vmem %s7925_s3, %s4875_s16  ;;  %s4874_s25 = sshll.u32 %s5490_s23, 8 }
  0x1b   : > { %v5507_v3 = vld [vmem:[%s5498_s27] sm:$0xff]  ;;  %598 = vperm.xlu2 %5188, %v5501_v1   ;;  %592 = vperm.xlu1 %5187, %v5504_v2   ;;  %v5516_v5 = vld [vmem:[%s5498_s27 + $0x18] sm:$0xff]  ;;  %v5519_v6 = vld [vmem:[%s5498_s27 + $0x8] sm:$0xff]  ;;  %s6721_s20 = scalar_lea.vmem %s7924_s2, %s4874_s25  ;;  %s415_s23 = sand.u32 1, %s5360_s10  }
  0x1c   : > { %586 = vperm.xlu0 %5186, %v5507_v3   ;;  %v5525_v7 = vld [vmem:[%s5498_s27 + $0x40] sm:$0xff]  ;;  %v5528_v8 = vld [vmem:[%s5498_s27 + $0x38] sm:$0xff]  ;;  %v5531_v9 = vld [vmem:[%s5498_s27 + $0x30] sm:$0xff]  ;;  %s4542_s29 = sshll.u32 %s415_s23, 8  ;;  %s4915_s25 = sshll.u32 %s5368_s12, 8 }
  0x1d   : > { %v5537_v10 = vld [vmem:[%s5498_s27 + $0x58] sm:$0xff]  ;;  %v5540_v11 = vld [vmem:[%s5498_s27 + $0x50] sm:$0xff]  ;;  %v5543_v12 = vld [vmem:[%s5498_s27 + $0x48] sm:$0xff]  ;;  %s7563_s16 = scalar_lea.vmem [#allocation2], %s4542_s29  ;;  %s4393_s12 = scalar_lea.sflag [#allocation3], %s415_s23 }
  0x1e   : > { %v5549_v13 = vld [vmem:[%s5498_s27 + $0x70] sm:$0xff]  ;;  %v5552_v14 = vld [vmem:[%s5498_s27 + $0x68] sm:$0xff]  ;;  %v5555_v15 = vld [vmem:[%s5498_s27 + $0x60] sm:$0xff]  ;;  %s4407_s29 = sshll.u32 %s7563_s16, 4  ;;  %s4408_s29 = int_to_ptr.vmem [resolvable:$true] %s4407_s29 }
  0x1f   : > { %v5561_v16 = vld [vmem:[%s5498_s27 + $0x88] sm:$0xff]  ;;  %v5564_v17 = vld [vmem:[%s5498_s27 + $0x80] sm:$0xff]  ;;  %v5567_v18 = vld [vmem:[%s5498_s27 + $0x78] sm:$0xff] }
  0x20   : > { %v5573_v19 = vld [vmem:[%s5498_s27 + $0xa0] sm:$0xff]  ;;  %v5576_v20 = vld [vmem:[%s5498_s27 + $0x98] sm:$0xff]  ;;  %v5579_v21 = vld [vmem:[%s5498_s27 + $0x90] sm:$0xff] }
  0x21   : > { %v5585_v22 = vld [vmem:[%s5498_s27 + $0xb8] sm:$0xff]  ;;  %v5588_v23 = vld [vmem:[%s5498_s27 + $0xb0] sm:$0xff]  ;;  %v5591_v24 = vld [vmem:[%s5498_s27 + $0xa8] sm:$0xff] }
  0x22   : > { %v5597_v25 = vld [vmem:[%s5498_s27 + $0xd0] sm:$0xff]  ;;  %v5600_v26 = vld [vmem:[%s5498_s27 + $0xc8] sm:$0xff]  ;;  %v5603_v27 = vld [vmem:[%s5498_s27 + $0xc0] sm:$0xff] }
  0x23   : > { %601 = vperm.xlu2 %5188, %v5513_v4   ;;  %595 = vperm.xlu1 %5187, %v5516_v5   ;;  %v5609_v28 = vld [vmem:[%s5498_s27 + $0xe8] sm:$0xff]  ;;  %v5612_v29 = vld [vmem:[%s5498_s27 + $0xe0] sm:$0xff]  ;;  %v5615_v30 = vld [vmem:[%s5498_s27 + $0xd8] sm:$0xff] }
  0x24   : > { %589 = vperm.xlu0 %5186, %v5519_v6   ;;  %v5621_v31 = vld [vmem:[%s5498_s27 + $0x100] sm:$0xff]  ;;  %v5624_v32 = vld [vmem:[%s5498_s27 + $0xf8] sm:$0xff]  ;;  %v5627_v33 = vld [vmem:[%s5498_s27 + $0xf0] sm:$0xff] }
  0x25   : > { %v5633_v34 = vld [vmem:[%s5498_s27 + $0x118] sm:$0xff]  ;;  %v5636_v35 = vld [vmem:[%s5498_s27 + $0x110] sm:$0xff]  ;;  %v5639_v36 = vld [vmem:[%s5498_s27 + $0x108] sm:$0xff] }
  0x26   : > { %v5647_v38 = vld [vmem:[%s5498_s27 + $0x130] sm:$0xff]  ;;  %v5650_v39 = vld [vmem:[%s5498_s27 + $0x128] sm:$0xff]  ;;  %v5653_v40 = vld [vmem:[%s5498_s27 + $0x120] sm:$0xff] }
  0x27   : > { %v5661_v42 = vld [vmem:[%s5498_s27 + $0x148] sm:$0xff]  ;;  %v5664_v43 = vld [vmem:[%s5498_s27 + $0x140] sm:$0xff]  ;;  %v5667_v44 = vld [vmem:[%s5498_s27 + $0x138] sm:$0xff] }
  0x28   : > { %v5675_v46 = vld [vmem:[%s5498_s27 + $0x160] sm:$0xff]  ;;  %v5678_v47 = vld [vmem:[%s5498_s27 + $0x158] sm:$0xff]  ;;  %v5681_v48 = vld [vmem:[%s5498_s27 + $0x150] sm:$0xff] }
  0x29   : > { %v5693_v52 = vld [vmem:[%s5498_s27 + $0x178] sm:$0xff]  ;;  %v5696_v53 = vld [vmem:[%s5498_s27 + $0x170] sm:$0xff]  ;;  %v5699_v54 = vld [vmem:[%s5498_s27 + $0x168] sm:$0xff] }
  0x2a   : > { %v5711_v58 = vld [vmem:[%s5498_s27 + $0x190] sm:$0xff]  ;;  %v5714_v59 = vld [vmem:[%s5498_s27 + $0x188] sm:$0xff]  ;;  %v5717_v60 = vld [vmem:[%s5498_s27 + $0x180] sm:$0xff] }
  0x2b   : > { %610 = vperm.xlu2 %5188, %v5525_v7   ;;  %607 = vperm.xlu1 %5187, %v5528_v8   ;;  %v5729_v0 = vld [vmem:[%s5498_s27 + $0x1a8] sm:$0xff] }
  0x2c   : > { %604 = vperm.xlu0 %5186, %v5531_v9   ;;  %8020 = vst [vmem:[#allocation17_spill] sm:$0xff] %v5729_v0 }
  0x33   : > { %619 = vperm.xlu2 %5188, %v5537_v10   ;;  %616 = vperm.xlu1 %5187, %v5540_v11  }
  0x34   : > { %613 = vperm.xlu0 %5186, %v5543_v12  }
  0x3b   : > { %628 = vperm.xlu2 %5188, %v5549_v13   ;;  %625 = vperm.xlu1 %5187, %v5552_v14  }
  0x3c   : > { %622 = vperm.xlu0 %5186, %v5555_v15  }
  0x43   : > { %637 = vperm.xlu2 %5188, %v5561_v16   ;;  %634 = vperm.xlu1 %5187, %v5564_v17  }
  0x44   : > { %631 = vperm.xlu0 %5186, %v5567_v18  }
  0x4b   : > { %646 = vperm.xlu2 %5188, %v5573_v19   ;;  %643 = vperm.xlu1 %5187, %v5576_v20  }
  0x4c   : > { %640 = vperm.xlu0 %5186, %v5579_v21  }
  0x53   : > { %655 = vperm.xlu2 %5188, %v5585_v22   ;;  %652 = vperm.xlu1 %5187, %v5588_v23  }
  0x54   : > { %649 = vperm.xlu0 %5186, %v5591_v24  }
  0x5b   : > { %664 = vperm.xlu2 %5188, %v5597_v25   ;;  %661 = vperm.xlu1 %5187, %v5600_v26  }
  0x5c   : > { %658 = vperm.xlu0 %5186, %v5603_v27  }
  0x63   : > { %673 = vperm.xlu2 %5188, %v5609_v28   ;;  %670 = vperm.xlu1 %5187, %v5612_v29  }
  0x64   : > { %667 = vperm.xlu0 %5186, %v5615_v30  }
  0x6b   : > { %682 = vperm.xlu2 %5188, %v5621_v31   ;;  %679 = vperm.xlu1 %5187, %v5624_v32  }
  0x6c   : > { %676 = vperm.xlu0 %5186, %v5627_v33  }
  0x73   : > { %691 = vperm.xlu2 %5188, %v5633_v34   ;;  %688 = vperm.xlu1 %5187, %v5636_v35  }
  0x74   : > { %685 = vperm.xlu0 %5186, %v5639_v36  }
  0x75   : > { %v5644_v37 = vpop.permute.xlu2 %598 }
  0x76   : > { %8008 = vst [vmem:[#allocation5_spill] sm:$0xff] %v5644_v37  ;;  %v5753_v37 = vld [vmem:[%s5498_s27 + $0x1b0] sm:$0xff] }
  0x77   : > { %8027 = vst [vmem:[#allocation24_spill] sm:$0xff] %v5753_v37 }
  0x7b   : > { %700 = vperm.xlu2 %5188, %v5647_v38   ;;  %697 = vperm.xlu1 %5187, %v5650_v39  }
  0x7c   : > { %694 = vperm.xlu0 %5186, %v5653_v40  }
  0x7d   : > { %v5658_v41 = vpop.permute.xlu2 %601 }
  0x7e   : > { %8009 = vst [vmem:[#allocation6_spill] sm:$0xff] %v5658_v41  ;;  %v5750_v41 = vld [vmem:[%s5498_s27 + $0x1b8] sm:$0xff] }
  0x7f   : > { %8026 = vst [vmem:[#allocation23_spill] sm:$0xff] %v5750_v41 }
  0x83   : > { %709 = vperm.xlu2 %5188, %v5661_v42   ;;  %706 = vperm.xlu1 %5187, %v5664_v43  }
  0x84   : > { %703 = vperm.xlu0 %5186, %v5667_v44  }
  0x85   : > { %v5672_v45 = vpop.permute.xlu2 %610 }
  0x86   : > { %8010 = vst [vmem:[#allocation7_spill] sm:$0xff] %v5672_v45 }
  0x8b   : > { %718 = vperm.xlu2 %5188, %v5675_v46   ;;  %715 = vperm.xlu1 %5187, %v5678_v47  }
  0x8c   : > { %712 = vperm.xlu0 %5186, %v5681_v48  }
  0x8d   : > { %v5686_v49 = vpop.permute.xlu2 %619  ;;  %v5688_v50 = vpop.permute.xlu1 %592 }
  0x8e   : > { %8011 = vst [vmem:[#allocation8_spill] sm:$0xff] %v5686_v49  ;;  %v5690_v51 = vpop.permute.xlu0 %586  ;;  %v5735_v49 = vld [vmem:[%s5498_s27 + $0x198] sm:$0xff] }
  0x8f   : > { %8012 = vst [vmem:[#allocation9_spill] sm:$0xff] %v5688_v50  ;;  %v5768_v50 = vld [vmem:[%s5498_s27 + $0x1d0] sm:$0xff] }
  0x90   : > { %8013 = vst [vmem:[#allocation10_spill] sm:$0xff] %v5690_v51 }
  0x91   : > { %8032 = vst [vmem:[#allocation29_spill] sm:$0xff] %v5768_v50 }
  0x93   : > { %727 = vperm.xlu2 %5188, %v5693_v52   ;;  %724 = vperm.xlu1 %5187, %v5696_v53  }
  0x94   : > { %721 = vperm.xlu0 %5186, %v5699_v54  }
  0x95   : > { %v5704_v55 = vpop.permute.xlu2 %628  ;;  %v5706_v56 = vpop.permute.xlu1 %595 }
  0x96   : > { %8014 = vst [vmem:[#allocation11_spill] sm:$0xff] %v5704_v55  ;;  %v5708_v57 = vpop.permute.xlu0 %589  ;;  %v5732_v55 = vld [vmem:[%s5498_s27 + $0x1a0] sm:$0xff] }
  0x97   : > { %8015 = vst [vmem:[#allocation12_spill] sm:$0xff] %v5706_v56  ;;  %v5765_v56 = vld [vmem:[%s5498_s27 + $0x1d8] sm:$0xff] }
  0x98   : > { %8016 = vst [vmem:[#allocation13_spill] sm:$0xff] %v5708_v57  ;;  %v5771_v57 = vld [vmem:[%s5498_s27 + $0x1c8] sm:$0xff] }
  0x99   : > { %8021 = vst [vmem:[#allocation18_spill] sm:$0xff] %v5732_v55 }
  0x9a   : > { %8031 = vst [vmem:[#allocation28_spill] sm:$0xff] %v5765_v56 }
  0x9b   : > { %736 = vperm.xlu2 %5188, %v5711_v58   ;;  %733 = vperm.xlu1 %5187, %v5714_v59   ;;  %8033 = vst [vmem:[#allocation30_spill] sm:$0xff] %v5771_v57 }
  0x9c   : > { %730 = vperm.xlu0 %5186, %v5717_v60  }
  0x9d   : > { %v5722_v61 = vpop.permute.xlu2 %637  ;;  %v5724_v62 = vpop.permute.xlu1 %607 }
  0x9e   : > { %8017 = vst [vmem:[#allocation14_spill] sm:$0xff] %v5722_v61  ;;  %v5726_v63 = vpop.permute.xlu0 %604 }
  0x9f   : > { %8018 = vst [vmem:[#allocation15_spill] sm:$0xff] %v5724_v62 }
  0xa0   : > { %8019 = vst [vmem:[#allocation16_spill] sm:$0xff] %v5726_v63  ;;  %v5747_v63 = vld [vmem:[%s5498_s27 + $0x1c0] sm:$0xff] }
  0xa1   : > { %8025 = vst [vmem:[#allocation22_spill] sm:$0xff] %v5747_v63 }
  0xa3   : > { %745 = vperm.xlu2 %5188, %v5729_v0   ;;  %742 = vperm.xlu1 %5187, %v5732_v55   ;;  %v578_v0 = vld [vmem:[%s5803_s15 + $0x1d8] sm:$0xff]  ;;  %v8005_v55 = vmov 1  }
  0xa4   : > { %739 = vperm.xlu0 %5186, %v5735_v49  }
  0xa5   : > { %v5740_v61 = vpop.permute.xlu2 %646  ;;  %v5742_v45 = vpop.permute.xlu1 %616 }
  0xa6   : > { %8022 = vst [vmem:[#allocation19_spill] sm:$0xff] %v5740_v61  ;;  %v5744_v62 = vpop.permute.xlu0 %613 }
  0xa7   : > { %8023 = vst [vmem:[#allocation20_spill] sm:$0xff] %v5742_v45 }
  0xa8   : > { %8024 = vst [vmem:[#allocation21_spill] sm:$0xff] %v5744_v62 }
  0xab   : > { %754 = vperm.xlu2 %5188, %v5747_v63   ;;  %751 = vperm.xlu1 %5187, %v5750_v41   ;;  %v5786_v63 = vld [vmem:[%s5498_s27 + $0x1e8] sm:$0xff]  ;;  %v5789_v41 = vld [vmem:[%s5498_s27 + $0x1e0] sm:$0xff] }
  0xac   : > { %748 = vperm.xlu0 %5186, %v5753_v37   ;;  %8038 = vst [vmem:[#allocation35_spill] sm:$0xff] %v5786_v63  ;;  %v555_v37 = vld [vmem:[%s5803_s15 + $0x120] sm:$0xff] }
  0xad   : > { %v5758_v61 = vpop.permute.xlu2 %655  ;;  %v5760_v45 = vpop.permute.xlu1 %625  ;;  %8039 = vst [vmem:[#allocation36_spill] sm:$0xff] %v5789_v41 }
  0xae   : > { %8028 = vst [vmem:[#allocation25_spill] sm:$0xff] %v5758_v61  ;;  %v5762_v62 = vpop.permute.xlu0 %622 }
  0xaf   : > { %8029 = vst [vmem:[#allocation26_spill] sm:$0xff] %v5760_v45 }
  0xb0   : > { %8030 = vst [vmem:[#allocation27_spill] sm:$0xff] %v5762_v62  ;;  %v5783_v62 = vld [vmem:[%s5498_s27 + $0x1f0] sm:$0xff] }
  0xb1   : > { %8037 = vst [vmem:[#allocation34_spill] sm:$0xff] %v5783_v62 }
  0xb3   : > { %763 = vperm.xlu2 %5188, %v5765_v56   ;;  %760 = vperm.xlu1 %5187, %v5768_v50  }
  0xb4   : > { %757 = vperm.xlu0 %5186, %v5771_v57   ;;  %v5832_v57 = vld [vmem:[%s5803_s15 + $0x10] sm:$0xff] }
  0xb5   : > { %v5776_v51 = vpop.permute.xlu2 %664  ;;  %v5778_v61 = vpop.permute.xlu1 %634  ;;  %8051 = vst [vmem:[#allocation48_spill] sm:$0xff] %v5832_v57 }
  0xb6   : > { %8034 = vst [vmem:[#allocation31_spill] sm:$0xff] %v5776_v51  ;;  %v5780_v45 = vpop.permute.xlu0 %631 }
  0xb7   : > { %8035 = vst [vmem:[#allocation32_spill] sm:$0xff] %v5778_v61  ;;  %v5808_v61 = vld [vmem:[%s5803_s15 + $0x8] sm:$0xff] }
  0xb8   : > { %8036 = vst [vmem:[#allocation33_spill] sm:$0xff] %v5780_v45  ;;  %v5811_v45 = vld [vmem:[%s5803_s15] sm:$0xff] }
  0xb9   : > { %8043 = vst [vmem:[#allocation40_spill] sm:$0xff] %v5808_v61 }
  0xba   : > { %8044 = vst [vmem:[#allocation41_spill] sm:$0xff] %v5811_v45 }
  0xbb   : > { %772 = vperm.xlu2 %5188, %v5783_v62   ;;  %769 = vperm.xlu1 %5187, %v5786_v63   ;;  %v5826_v63 = vld [vmem:[%s5803_s15 + $0x20] sm:$0xff] }
  0xbc   : > { %766 = vperm.xlu0 %5186, %v5789_v41   ;;  %8049 = vst [vmem:[#allocation46_spill] sm:$0xff] %v5826_v63  ;;  %v5829_v41 = vld [vmem:[%s5803_s15 + $0x18] sm:$0xff] }
  0xbd   : > { %v5794_v56 = vpop.permute.xlu2 %673  ;;  %v5796_v50 = vpop.permute.xlu1 %643  ;;  %8050 = vst [vmem:[#allocation47_spill] sm:$0xff] %v5829_v41 }
  0xbe   : > { %8040 = vst [vmem:[#allocation37_spill] sm:$0xff] %v5794_v56  ;;  %v5805_v51 = vpop.permute.xlu0 %640  ;;  %v5814_v56 = vld [vmem:[%s5498_s27 + $0x1f8] sm:$0xff] }
  0xbf   : > { %8041 = vst [vmem:[#allocation38_spill] sm:$0xff] %v5796_v50 }
  0xc0   : > { %8042 = vst [vmem:[#allocation39_spill] sm:$0xff] %v5805_v51 }
  0xc1   : > { %8045 = vst [vmem:[#allocation42_spill] sm:$0xff] %v5814_v56 }
  0xc3   : > { %848 = vperm.xlu2 %5188, %v5808_v61   ;;  %843 = vperm.xlu1 %5187, %v5811_v45   ;;  %v5844_v61 = vld [vmem:[%s5803_s15 + $0x38] sm:$0xff]  ;;  %v5847_v45 = vld [vmem:[%s5803_s15 + $0x30] sm:$0xff] }
  0xc4   : > { %775 = vperm.xlu0 %5186, %v5814_v56   ;;  %8055 = vst [vmem:[#allocation52_spill] sm:$0xff] %v5844_v61  ;;  %v5850_v56 = vld [vmem:[%s5803_s15 + $0x28] sm:$0xff] }
  0xc5   : > { %v5819_v50 = vpop.permute.xlu2 %682  ;;  %v5821_v62 = vpop.permute.xlu1 %652  ;;  %8056 = vst [vmem:[#allocation53_spill] sm:$0xff] %v5847_v45 }
  0xc6   : > { %8046 = vst [vmem:[#allocation43_spill] sm:$0xff] %v5819_v50  ;;  %v5823_v51 = vpop.permute.xlu0 %649 }
  0xc7   : > { %8047 = vst [vmem:[#allocation44_spill] sm:$0xff] %v5821_v62 }
  0xc8   : > { %8048 = vst [vmem:[#allocation45_spill] sm:$0xff] %v5823_v51 }
  0xc9   : > { %8057 = vst [vmem:[#allocation54_spill] sm:$0xff] %v5850_v56 }
  0xcb   : > { %863 = vperm.xlu2 %5188, %v5826_v63   ;;  %858 = vperm.xlu1 %5187, %v5829_v41   ;;  %v5862_v63 = vld [vmem:[%s5803_s15 + $0x50] sm:$0xff]  ;;  %v5865_v41 = vld [vmem:[%s5803_s15 + $0x48] sm:$0xff] }
  0xcc   : > { %853 = vperm.xlu0 %5186, %v5832_v57   ;;  %8061 = vst [vmem:[#allocation58_spill] sm:$0xff] %v5862_v63  ;;  %v5868_v57 = vld [vmem:[%s5803_s15 + $0x40] sm:$0xff] }
  0xcd   : > { %v5837_v50 = vpop.permute.xlu2 %691  ;;  %v5839_v62 = vpop.permute.xlu1 %661  ;;  %8062 = vst [vmem:[#allocation59_spill] sm:$0xff] %v5865_v41 }
  0xce   : > { %8052 = vst [vmem:[#allocation49_spill] sm:$0xff] %v5837_v50  ;;  %v5841_v51 = vpop.permute.xlu0 %658 }
  0xcf   : > { %8053 = vst [vmem:[#allocation50_spill] sm:$0xff] %v5839_v62 }
  0xd0   : > { %8054 = vst [vmem:[#allocation51_spill] sm:$0xff] %v5841_v51 }
  0xd1   : > { %8063 = vst [vmem:[#allocation60_spill] sm:$0xff] %v5868_v57 }
  0xd3   : > { %878 = vperm.xlu2 %5188, %v5844_v61   ;;  %873 = vperm.xlu1 %5187, %v5847_v45   ;;  %v5880_v61 = vld [vmem:[%s5803_s15 + $0x68] sm:$0xff]  ;;  %v5883_v45 = vld [vmem:[%s5803_s15 + $0x60] sm:$0xff] }
  0xd4   : > { %868 = vperm.xlu0 %5186, %v5850_v56   ;;  %8067 = vst [vmem:[#allocation64_spill] sm:$0xff] %v5880_v61  ;;  %v5886_v56 = vld [vmem:[%s5803_s15 + $0x58] sm:$0xff] }
  0xd5   : > { %v5855_v50 = vpop.permute.xlu2 %700  ;;  %v5857_v62 = vpop.permute.xlu1 %670  ;;  %8068 = vst [vmem:[#allocation65_spill] sm:$0xff] %v5883_v45 }
  0xd6   : > { %8058 = vst [vmem:[#allocation55_spill] sm:$0xff] %v5855_v50  ;;  %v5859_v51 = vpop.permute.xlu0 %667 }
  0xd7   : > { %8059 = vst [vmem:[#allocation56_spill] sm:$0xff] %v5857_v62 }
  0xd8   : > { %8060 = vst [vmem:[#allocation57_spill] sm:$0xff] %v5859_v51 }
  0xd9   : > { %8069 = vst [vmem:[#allocation66_spill] sm:$0xff] %v5886_v56 }
  0xdb   : > { %893 = vperm.xlu2 %5188, %v5862_v63   ;;  %888 = vperm.xlu1 %5187, %v5865_v41   ;;  %v5898_v63 = vld [vmem:[%s5803_s15 + $0x80] sm:$0xff]  ;;  %v5901_v41 = vld [vmem:[%s5803_s15 + $0x78] sm:$0xff] }
  0xdc   : > { %883 = vperm.xlu0 %5186, %v5868_v57   ;;  %8073 = vst [vmem:[#allocation70_spill] sm:$0xff] %v5898_v63  ;;  %v5904_v57 = vld [vmem:[%s5803_s15 + $0x70] sm:$0xff] }
  0xdd   : > { %v5873_v50 = vpop.permute.xlu2 %709  ;;  %v5875_v62 = vpop.permute.xlu1 %679  ;;  %8074 = vst [vmem:[#allocation71_spill] sm:$0xff] %v5901_v41 }
  0xde   : > { %8064 = vst [vmem:[#allocation61_spill] sm:$0xff] %v5873_v50  ;;  %v5877_v51 = vpop.permute.xlu0 %676 }
  0xdf   : > { %8065 = vst [vmem:[#allocation62_spill] sm:$0xff] %v5875_v62 }
  0xe0   : > { %8066 = vst [vmem:[#allocation63_spill] sm:$0xff] %v5877_v51 }
  0xe1   : > { %8075 = vst [vmem:[#allocation72_spill] sm:$0xff] %v5904_v57 }
  0xe3   : > { %908 = vperm.xlu2 %5188, %v5880_v61   ;;  %903 = vperm.xlu1 %5187, %v5883_v45   ;;  %v5916_v61 = vld [vmem:[%s5803_s15 + $0x98] sm:$0xff]  ;;  %v5919_v45 = vld [vmem:[%s5803_s15 + $0x90] sm:$0xff] }
  0xe4   : > { %898 = vperm.xlu0 %5186, %v5886_v56   ;;  %8079 = vst [vmem:[#allocation76_spill] sm:$0xff] %v5916_v61  ;;  %v5922_v56 = vld [vmem:[%s5803_s15 + $0x88] sm:$0xff] }
  0xe5   : > { %v5891_v50 = vpop.permute.xlu2 %718  ;;  %v5893_v62 = vpop.permute.xlu1 %688  ;;  %8080 = vst [vmem:[#allocation77_spill] sm:$0xff] %v5919_v45 }
  0xe6   : > { %8070 = vst [vmem:[#allocation67_spill] sm:$0xff] %v5891_v50  ;;  %v5895_v51 = vpop.permute.xlu0 %685 }
  0xe7   : > { %8071 = vst [vmem:[#allocation68_spill] sm:$0xff] %v5893_v62 }
  0xe8   : > { %8072 = vst [vmem:[#allocation69_spill] sm:$0xff] %v5895_v51 }
  0xe9   : > { %8081 = vst [vmem:[#allocation78_spill] sm:$0xff] %v5922_v56 }
  0xeb   : > { %923 = vperm.xlu2 %5188, %v5898_v63   ;;  %918 = vperm.xlu1 %5187, %v5901_v41   ;;  %v5934_v63 = vld [vmem:[%s5803_s15 + $0xb0] sm:$0xff]  ;;  %v5937_v41 = vld [vmem:[%s5803_s15 + $0xa8] sm:$0xff] }
  0xec   : > { %913 = vperm.xlu0 %5186, %v5904_v57   ;;  %8085 = vst [vmem:[#allocation82_spill] sm:$0xff] %v5934_v63  ;;  %v5940_v57 = vld [vmem:[%s5803_s15 + $0xa0] sm:$0xff] }
  0xed   : > { %v5909_v50 = vpop.permute.xlu2 %727  ;;  %v5911_v62 = vpop.permute.xlu1 %697  ;;  %8086 = vst [vmem:[#allocation83_spill] sm:$0xff] %v5937_v41 }
  0xee   : > { %8076 = vst [vmem:[#allocation73_spill] sm:$0xff] %v5909_v50  ;;  %v5913_v51 = vpop.permute.xlu0 %694 }
  0xef   : > { %8077 = vst [vmem:[#allocation74_spill] sm:$0xff] %v5911_v62 }
  0xf0   : > { %8078 = vst [vmem:[#allocation75_spill] sm:$0xff] %v5913_v51 }
  0xf1   : > { %8087 = vst [vmem:[#allocation84_spill] sm:$0xff] %v5940_v57 }
  0xf3   : > { %938 = vperm.xlu2 %5188, %v5916_v61   ;;  %933 = vperm.xlu1 %5187, %v5919_v45   ;;  %v5952_v61 = vld [vmem:[%s5803_s15 + $0xc8] sm:$0xff]  ;;  %v5955_v45 = vld [vmem:[%s5803_s15 + $0xc0] sm:$0xff] }
  0xf4   : > { %928 = vperm.xlu0 %5186, %v5922_v56   ;;  %8091 = vst [vmem:[#allocation88_spill] sm:$0xff] %v5952_v61  ;;  %v5958_v56 = vld [vmem:[%s5803_s15 + $0xb8] sm:$0xff] }
  0xf5   : > { %v5927_v50 = vpop.permute.xlu2 %736  ;;  %v5929_v62 = vpop.permute.xlu1 %706  ;;  %8092 = vst [vmem:[#allocation89_spill] sm:$0xff] %v5955_v45 }
  0xf6   : > { %8082 = vst [vmem:[#allocation79_spill] sm:$0xff] %v5927_v50  ;;  %v5931_v51 = vpop.permute.xlu0 %703 }
  0xf7   : > { %8083 = vst [vmem:[#allocation80_spill] sm:$0xff] %v5929_v62 }
  0xf8   : > { %8084 = vst [vmem:[#allocation81_spill] sm:$0xff] %v5931_v51 }
  0xf9   : > { %8093 = vst [vmem:[#allocation90_spill] sm:$0xff] %v5958_v56 }
  0xfb   : > { %953 = vperm.xlu2 %5188, %v5934_v63   ;;  %948 = vperm.xlu1 %5187, %v5937_v41   ;;  %v5970_v63 = vld [vmem:[%s5803_s15 + $0xe0] sm:$0xff]  ;;  %v5973_v41 = vld [vmem:[%s5803_s15 + $0xd8] sm:$0xff] }
  0xfc   : > { %943 = vperm.xlu0 %5186, %v5940_v57   ;;  %8097 = vst [vmem:[#allocation94_spill] sm:$0xff] %v5970_v63  ;;  %v5976_v57 = vld [vmem:[%s5803_s15 + $0xd0] sm:$0xff] }
  0xfd   : > { %v5945_v50 = vpop.permute.xlu2 %745  ;;  %v5947_v62 = vpop.permute.xlu1 %715  ;;  %8098 = vst [vmem:[#allocation95_spill] sm:$0xff] %v5973_v41 }
  0xfe   : > { %8088 = vst [vmem:[#allocation85_spill] sm:$0xff] %v5945_v50  ;;  %v5949_v51 = vpop.permute.xlu0 %712 }
  0xff   : > { %8089 = vst [vmem:[#allocation86_spill] sm:$0xff] %v5947_v62 }
 0x100   : > { %8090 = vst [vmem:[#allocation87_spill] sm:$0xff] %v5949_v51 }
 0x101   : > { %8099 = vst [vmem:[#allocation96_spill] sm:$0xff] %v5976_v57 }
 0x103   : > { %968 = vperm.xlu2 %5188, %v5952_v61   ;;  %963 = vperm.xlu1 %5187, %v5955_v45   ;;  %v550_v61 = vld [vmem:[%s5803_s15 + $0xf8] sm:$0xff]  ;;  %v5989_v45 = vld [vmem:[%s5803_s15 + $0xf0] sm:$0xff] }
 0x104   : > { %958 = vperm.xlu0 %5186, %v5958_v56   ;;  %8103 = vst [vmem:[#allocation100_spill] sm:$0xff] %v5989_v45  ;;  %v5992_v56 = vld [vmem:[%s5803_s15 + $0xe8] sm:$0xff] }
 0x105   : > { %v5963_v50 = vpop.permute.xlu2 %754  ;;  %v5965_v62 = vpop.permute.xlu1 %724  ;;  %8104 = vst [vmem:[#allocation101_spill] sm:$0xff] %v5992_v56 }
 0x106   : > { %8094 = vst [vmem:[#allocation91_spill] sm:$0xff] %v5963_v50  ;;  %v5967_v51 = vpop.permute.xlu0 %721 }
 0x107   : > { %8095 = vst [vmem:[#allocation92_spill] sm:$0xff] %v5965_v62 }
 0x108   : > { %8096 = vst [vmem:[#allocation93_spill] sm:$0xff] %v5967_v51 }
 0x10b   : > { %983 = vperm.xlu2 %5188, %v5970_v63   ;;  %978 = vperm.xlu1 %5187, %v5973_v41   ;;  %v552_v41 = vld [vmem:[%s5803_s15 + $0x108] sm:$0xff] }
 0x10c   : > { %973 = vperm.xlu0 %5186, %v5976_v57   ;;  %v551_v57 = vld [vmem:[%s5803_s15 + $0x100] sm:$0xff] }
 0x10d   : > { %v5981_v50 = vpop.permute.xlu2 %763  ;;  %v5983_v62 = vpop.permute.xlu1 %733 }
 0x10e   : > { %8100 = vst [vmem:[#allocation97_spill] sm:$0xff] %v5981_v50  ;;  %v5985_v51 = vpop.permute.xlu0 %730 }
 0x10f   : > { %8101 = vst [vmem:[#allocation98_spill] sm:$0xff] %v5983_v62 }
 0x110   : > { %8102 = vst [vmem:[#allocation99_spill] sm:$0xff] %v5985_v51  ;;  %v553_v51 = vld [vmem:[%s5803_s15 + $0x110] sm:$0xff] }
 0x113   : > { %998 = vperm.xlu2 %5188, %v550_v61   ;;  %993 = vperm.xlu1 %5187, %v5989_v45  }
 0x114   : > { %988 = vperm.xlu0 %5186, %v5992_v56  }
 0x115   : > { %v5996_v63 = vpop.permute.xlu2 %772  ;;  %v5998_v50 = vpop.permute.xlu1 %742 }
 0x116   : > { %8105 = vst [vmem:[#allocation102_spill] sm:$0xff] %v5996_v63  ;;  %v6000_v62 = vpop.permute.xlu0 %739  ;;  %v556_v63 = vld [vmem:[%s5803_s15 + $0x128] sm:$0xff] }
 0x117   : > { %8106 = vst [vmem:[#allocation103_spill] sm:$0xff] %v5998_v50  ;;  %v554_v50 = vld [vmem:[%s5803_s15 + $0x118] sm:$0xff] }
 0x118   : > { %8107 = vst [vmem:[#allocation104_spill] sm:$0xff] %v6000_v62  ;;  %v559_v62 = vld [vmem:[%s5803_s15 + $0x140] sm:$0xff] }
 0x11b   : > { %1013 = vperm.xlu2 %5188, %v553_v51   ;;  %1008 = vperm.xlu1 %5187, %v552_v41  }
 0x11c   : > { %1003 = vperm.xlu0 %5186, %v551_v57  }
 0x11d   : > { %v6005_v61 = vpop.permute.xlu2 %848  ;;  %v6007_v45 = vpop.permute.xlu1 %751 }
 0x11e   : > { %8108 = vst [vmem:[#allocation105_spill] sm:$0xff] %v6005_v61  ;;  %v6009_v56 = vpop.permute.xlu0 %748  ;;  %v558_v61 = vld [vmem:[%s5803_s15 + $0x138] sm:$0xff] }
 0x11f   : > { %8109 = vst [vmem:[#allocation106_spill] sm:$0xff] %v6007_v45  ;;  %v557_v45 = vld [vmem:[%s5803_s15 + $0x130] sm:$0xff] }
 0x120   : > { %8110 = vst [vmem:[#allocation107_spill] sm:$0xff] %v6009_v56  ;;  %v562_v56 = vld [vmem:[%s5803_s15 + $0x158] sm:$0xff] }
 0x123   : > { %1028 = vperm.xlu2 %5188, %v556_v63   ;;  %1023 = vperm.xlu1 %5187, %v555_v37  }
 0x124   : > { %1018 = vperm.xlu0 %5186, %v554_v50  }
 0x125   : > { %v6014_v51 = vpop.permute.xlu2 %863  ;;  %v6016_v41 = vpop.permute.xlu1 %760 }
 0x126   : > { %8111 = vst [vmem:[#allocation108_spill] sm:$0xff] %v6014_v51  ;;  %v6018_v57 = vpop.permute.xlu0 %757  ;;  %v561_v51 = vld [vmem:[%s5803_s15 + $0x150] sm:$0xff] }
 0x127   : > { %8112 = vst [vmem:[#allocation109_spill] sm:$0xff] %v6016_v41  ;;  %v560_v41 = vld [vmem:[%s5803_s15 + $0x148] sm:$0xff] }
 0x128   : > { %8113 = vst [vmem:[#allocation110_spill] sm:$0xff] %v6018_v57  ;;  %v565_v57 = vld [vmem:[%s5803_s15 + $0x170] sm:$0xff] }
 0x12b   : > { %1043 = vperm.xlu2 %5188, %v559_v62   ;;  %1038 = vperm.xlu1 %5187, %v558_v61  }
 0x12c   : > { %1033 = vperm.xlu0 %5186, %v557_v45  }
 0x12d   : > { %v6023_v63 = vpop.permute.xlu2 %878  ;;  %v6025_v37 = vpop.permute.xlu1 %769 }
 0x12e   : > { %8114 = vst [vmem:[#allocation111_spill] sm:$0xff] %v6023_v63  ;;  %v6027_v50 = vpop.permute.xlu0 %766  ;;  %v564_v63 = vld [vmem:[%s5803_s15 + $0x168] sm:$0xff] }
 0x12f   : > { %8115 = vst [vmem:[#allocation112_spill] sm:$0xff] %v6025_v37  ;;  %v563_v37 = vld [vmem:[%s5803_s15 + $0x160] sm:$0xff] }
 0x130   : > { %8116 = vst [vmem:[#allocation113_spill] sm:$0xff] %v6027_v50  ;;  %v568_v50 = vld [vmem:[%s5803_s15 + $0x188] sm:$0xff] }
 0x133   : > { %1058 = vperm.xlu2 %5188, %v562_v56   ;;  %1053 = vperm.xlu1 %5187, %v561_v51  }
 0x134   : > { %1048 = vperm.xlu0 %5186, %v560_v41  }
 0x135   : > { %v6032_v62 = vpop.permute.xlu2 %893  ;;  %v6034_v61 = vpop.permute.xlu1 %843 }
 0x136   : > { %8117 = vst [vmem:[#allocation114_spill] sm:$0xff] %v6032_v62  ;;  %v6036_v45 = vpop.permute.xlu0 %775  ;;  %v567_v62 = vld [vmem:[%s5803_s15 + $0x180] sm:$0xff] }
 0x137   : > { %8118 = vst [vmem:[#allocation115_spill] sm:$0xff] %v6034_v61  ;;  %v566_v61 = vld [vmem:[%s5803_s15 + $0x178] sm:$0xff] }
 0x138   : > { %8119 = vst [vmem:[#allocation116_spill] sm:$0xff] %v6036_v45  ;;  %v571_v45 = vld [vmem:[%s5803_s15 + $0x1a0] sm:$0xff] }
 0x13b   : > { %1073 = vperm.xlu2 %5188, %v565_v57   ;;  %1068 = vperm.xlu1 %5187, %v564_v63  }
 0x13c   : > { %1063 = vperm.xlu0 %5186, %v563_v37  }
 0x13d   : > { %v6041_v56 = vpop.permute.xlu2 %908  ;;  %v6043_v51 = vpop.permute.xlu1 %858 }
 0x13e   : > { %8120 = vst [vmem:[#allocation117_spill] sm:$0xff] %v6041_v56  ;;  %v6045_v41 = vpop.permute.xlu0 %853  ;;  %v570_v56 = vld [vmem:[%s5803_s15 + $0x198] sm:$0xff] }
 0x13f   : > { %8121 = vst [vmem:[#allocation118_spill] sm:$0xff] %v6043_v51  ;;  %v569_v51 = vld [vmem:[%s5803_s15 + $0x190] sm:$0xff] }
 0x140   : > { %8122 = vst [vmem:[#allocation119_spill] sm:$0xff] %v6045_v41  ;;  %v573_v41 = vld [vmem:[%s5803_s15 + $0x1b0] sm:$0xff] }
 0x143   : > { %1088 = vperm.xlu2 %5188, %v568_v50   ;;  %1083 = vperm.xlu1 %5187, %v567_v62  }
 0x144   : > { %1078 = vperm.xlu0 %5186, %v566_v61  }
 0x145   : > { %v6050_v57 = vpop.permute.xlu2 %923  ;;  %v6052_v63 = vpop.permute.xlu1 %873 }
 0x146   : > { %8123 = vst [vmem:[#allocation120_spill] sm:$0xff] %v6050_v57  ;;  %v6054_v37 = vpop.permute.xlu0 %868  ;;  %v574_v57 = vld [vmem:[%s5803_s15 + $0x1b8] sm:$0xff] }
 0x147   : > { %8124 = vst [vmem:[#allocation121_spill] sm:$0xff] %v6052_v63  ;;  %v572_v63 = vld [vmem:[%s5803_s15 + $0x1a8] sm:$0xff] }
 0x148   : > { %8125 = vst [vmem:[#allocation122_spill] sm:$0xff] %v6054_v37  ;;  %v576_v37 = vld [vmem:[%s5803_s15 + $0x1c8] sm:$0xff] }
 0x14b   : > { %1103 = vperm.xlu2 %5188, %v571_v45   ;;  %1098 = vperm.xlu1 %5187, %v570_v56  }
 0x14c   : > { %1093 = vperm.xlu0 %5186, %v569_v51  }
 0x14d   : > { %v6059_v50 = vpop.permute.xlu2 %938  ;;  %v6061_v62 = vpop.permute.xlu1 %888 }
 0x14e   : > { %8126 = vst [vmem:[#allocation123_spill] sm:$0xff] %v6059_v50  ;;  %v6063_v61 = vpop.permute.xlu0 %883  ;;  %v577_v50 = vld [vmem:[%s5803_s15 + $0x1d0] sm:$0xff] }
 0x14f   : > { %8127 = vst [vmem:[#allocation124_spill] sm:$0xff] %v6061_v62  ;;  %v575_v62 = vld [vmem:[%s5803_s15 + $0x1c0] sm:$0xff] }
 0x150   : > { %8128 = vst [vmem:[#allocation125_spill] sm:$0xff] %v6063_v61 }
 0x153   : > { %1118 = vperm.xlu2 %5188, %v574_v57   ;;  %1113 = vperm.xlu1 %5187, %v573_v41  }
 0x154   : > { %1108 = vperm.xlu0 %5186, %v572_v63   ;;  %v580_v63 = vld [vmem:[%s5803_s15 + $0x1e8] sm:$0xff] }
 0x155   : > { %v6068_v45 = vpop.permute.xlu2 %953  ;;  %v6070_v56 = vpop.permute.xlu1 %903 }
 0x156   : > { %8129 = vst [vmem:[#allocation126_spill] sm:$0xff] %v6068_v45  ;;  %v6072_v51 = vpop.permute.xlu0 %898  ;;  %v579_v45 = vld [vmem:[%s5803_s15 + $0x1e0] sm:$0xff] }
 0x157   : > { %8130 = vst [vmem:[#allocation127_spill] sm:$0xff] %v6070_v56 }
 0x158   : > { %8131 = vst [vmem:[#allocation128_spill] sm:$0xff] %v6072_v51 }
 0x15b   : > { %1133 = vperm.xlu2 %5188, %v577_v50   ;;  %1128 = vperm.xlu1 %5187, %v576_v37   ;;  %v582_v37 = vld [vmem:[%s5803_s15 + $0x1f8] sm:$0xff] }
 0x15c   : > { %1123 = vperm.xlu0 %5186, %v575_v62   ;;  %v581_v62 = vld [vmem:[%s5803_s15 + $0x1f0] sm:$0xff] }
 0x15d   : > { %v6077_v61 = vpop.permute.xlu2 %968  ;;  %v6079_v57 = vpop.permute.xlu1 %918 }
 0x15e   : > { %8132 = vst [vmem:[#allocation129_spill] sm:$0xff] %v6077_v61  ;;  %v6081_v41 = vpop.permute.xlu0 %913 }
 0x163   : > { %1148 = vperm.xlu2 %5188, %v580_v63   ;;  %1143 = vperm.xlu1 %5187, %v579_v45  }
 0x164   : > { %1138 = vperm.xlu0 %5186, %v578_v0  }
 0x165   : > { %v6086_v56 = vpop.permute.xlu2 %983  ;;  %v6088_v51 = vpop.permute.xlu1 %933 }
 0x166   : > { %8133 = vst [vmem:[#allocation130_spill] sm:$0xff] %v6086_v56  ;;  %v6090_v50 = vpop.permute.xlu0 %928  ;;  %v8233_v56 = vld [vmem:[#allocation77_spill] sm:$0xff] }
 0x167   : > { %8134 = vst [vmem:[#allocation131_spill] sm:$0xff] %v6088_v51 }
 0x168   : > { %8135 = vst [vmem:[#allocation132_spill] sm:$0xff] %v6090_v50 }
 0x16b   : > { %5189 = vset.pattern.permute.xlu2 %v8005_v55  ;;  %1158 = vperm.xlu1 %5187, %v582_v37  }
 0x16c   : > { %1153 = vperm.xlu0 %5186, %v581_v62   ;;  %1226 = vperm.xlu2 %5189, %v5507_v3  }
 0x16d   : > { %v6096_v61 = vpop.permute.xlu2 %998  ;;  %v6098_v63 = vpop.permute.xlu1 %948 }
 0x16e   : > { %8136 = vst [vmem:[#allocation133_spill] sm:$0xff] %v6096_v61  ;;  %v6100_v0 = vpop.permute.xlu0 %943 }
 0x16f   : > { %8137 = vst [vmem:[#allocation134_spill] sm:$0xff] %v6098_v63  ;;  %v8257_v63 = vld [vmem:[#allocation100_spill] sm:$0xff] }
 0x170   : > { %8138 = vst [vmem:[#allocation135_spill] sm:$0xff] %v6100_v0 }
 0x173   : > { %5191 = vset.pattern.permute.xlu1 %v8005_v55 }
 0x174   : > { %5190 = vset.pattern.permute.xlu0 %v8005_v55  ;;  %1232 = vperm.xlu1 %5191, %v5504_v2  }
 0x175   : > { %1235 = vperm.xlu2 %5189, %v5516_v5   ;;  %1229 = vperm.xlu0 %5190, %v5519_v6   ;;  %v6107_v45 = vpop.permute.xlu2 %1013  ;;  %v6109_v37 = vpop.permute.xlu1 %963 }
 0x176   : > { %8139 = vst [vmem:[#allocation136_spill] sm:$0xff] %v6107_v45  ;;  %v6111_v3 = vpop.permute.xlu0 %958 }
 0x177   : > { %8140 = vst [vmem:[#allocation137_spill] sm:$0xff] %v6109_v37  ;;  %v8246_v37 = vld [vmem:[#allocation88_spill] sm:$0xff] }
 0x178   : > { %8141 = vst [vmem:[#allocation138_spill] sm:$0xff] %v6111_v3  ;;  %v8251_v3 = vld [vmem:[#allocation95_spill] sm:$0xff] }
 0x17c   : > { %1238 = vperm.xlu1 %5191, %v5501_v1  }
 0x17d   : > { %1241 = vperm.xlu2 %5189, %v5513_v4   ;;  %1244 = vperm.xlu0 %5190, %v5531_v9   ;;  %v6116_v62 = vpop.permute.xlu2 %1028  ;;  %v6118_v55 = vpop.permute.xlu1 %978 }
 0x17e   : > { %8142 = vst [vmem:[#allocation139_spill] sm:$0xff] %v6116_v62  ;;  %v6120_v2 = vpop.permute.xlu0 %973  ;;  %v8216_v62 = vld [vmem:[#allocation58_spill] sm:$0xff] }
 0x17f   : > { %8143 = vst [vmem:[#allocation140_spill] sm:$0xff] %v6118_v55 }
 0x180   : > { %8144 = vst [vmem:[#allocation141_spill] sm:$0xff] %v6120_v2  ;;  %v8240_v2 = vld [vmem:[#allocation82_spill] sm:$0xff] }
 0x184   : > { %1247 = vperm.xlu1 %5191, %v5528_v8  }
 0x185   : > { %1250 = vperm.xlu2 %5189, %v5525_v7   ;;  %1253 = vperm.xlu0 %5190, %v5543_v12   ;;  %v6125_v5 = vpop.permute.xlu2 %1043  ;;  %v6127_v6 = vpop.permute.xlu1 %993 }
 0x186   : > { %8145 = vst [vmem:[#allocation142_spill] sm:$0xff] %v6125_v5  ;;  %v6129_v1 = vpop.permute.xlu0 %988 }
 0x187   : > { %8146 = vst [vmem:[#allocation143_spill] sm:$0xff] %v6127_v6 }
 0x188   : > { %8147 = vst [vmem:[#allocation144_spill] sm:$0xff] %v6129_v1  ;;  %v8228_v1 = vld [vmem:[#allocation70_spill] sm:$0xff] }
 0x18c   : > { %1256 = vperm.xlu1 %5191, %v5540_v11  }
 0x18d   : > { %1259 = vperm.xlu2 %5189, %v5537_v10   ;;  %1262 = vperm.xlu0 %5190, %v5555_v15   ;;  %v6134_v4 = vpop.permute.xlu2 %1058  ;;  %v6136_v9 = vpop.permute.xlu1 %1008 }
 0x18e   : > { %8148 = vst [vmem:[#allocation145_spill] sm:$0xff] %v6134_v4  ;;  %v6138_v8 = vpop.permute.xlu0 %1003  ;;  %v8210_v4 = vld [vmem:[#allocation52_spill] sm:$0xff] }
 0x18f   : > { %8149 = vst [vmem:[#allocation146_spill] sm:$0xff] %v6136_v9  ;;  %v8221_v9 = vld [vmem:[#allocation65_spill] sm:$0xff] }
 0x190   : > { %8150 = vst [vmem:[#allocation147_spill] sm:$0xff] %v6138_v8  ;;  %v8222_v8 = vld [vmem:[#allocation64_spill] sm:$0xff] }
 0x194   : > { %1265 = vperm.xlu1 %5191, %v5552_v14  }
 0x195   : > { %1268 = vperm.xlu2 %5189, %v5549_v13   ;;  %1271 = vperm.xlu0 %5190, %v5567_v18   ;;  %v6143_v7 = vpop.permute.xlu2 %1073  ;;  %v6145_v12 = vpop.permute.xlu1 %1023 }
 0x196   : > { %8151 = vst [vmem:[#allocation148_spill] sm:$0xff] %v6143_v7  ;;  %v6147_v11 = vpop.permute.xlu0 %1018 }
 0x197   : > { %8152 = vst [vmem:[#allocation149_spill] sm:$0xff] %v6145_v12  ;;  %v8217_v12 = vld [vmem:[#allocation66_spill] sm:$0xff] }
 0x198   : > { %8153 = vst [vmem:[#allocation150_spill] sm:$0xff] %v6147_v11 }
 0x19c   : > { %1274 = vperm.xlu1 %5191, %v5564_v17  }
 0x19d   : > { %1277 = vperm.xlu2 %5189, %v5561_v16   ;;  %1280 = vperm.xlu0 %5190, %v5579_v21   ;;  %v6152_v10 = vpop.permute.xlu2 %1088  ;;  %v6154_v15 = vpop.permute.xlu1 %1038 }
 0x19e   : > { %8154 = vst [vmem:[#allocation151_spill] sm:$0xff] %v6152_v10  ;;  %v6156_v14 = vpop.permute.xlu0 %1033 }
 0x19f   : > { %8155 = vst [vmem:[#allocation152_spill] sm:$0xff] %v6154_v15 }
 0x1a0   : > { %8156 = vst [vmem:[#allocation153_spill] sm:$0xff] %v6156_v14  ;;  %v8215_v14 = vld [vmem:[#allocation59_spill] sm:$0xff] }
 0x1a4   : > { %1283 = vperm.xlu1 %5191, %v5576_v20  }
 0x1a5   : > { %1286 = vperm.xlu2 %5189, %v5573_v19   ;;  %1289 = vperm.xlu0 %5190, %v5591_v24   ;;  %v6161_v13 = vpop.permute.xlu2 %1103  ;;  %v6163_v18 = vpop.permute.xlu1 %1053 }
 0x1a6   : > { %8157 = vst [vmem:[#allocation154_spill] sm:$0xff] %v6161_v13  ;;  %v6165_v17 = vpop.permute.xlu0 %1048 }
 0x1a7   : > { %8158 = vst [vmem:[#allocation155_spill] sm:$0xff] %v6163_v18  ;;  %v8211_v18 = vld [vmem:[#allocation60_spill] sm:$0xff] }
 0x1a8   : > { %8159 = vst [vmem:[#allocation156_spill] sm:$0xff] %v6165_v17 }
 0x1ac   : > { %1292 = vperm.xlu1 %5191, %v5588_v23  }
 0x1ad   : > { %1295 = vperm.xlu2 %5189, %v5585_v22   ;;  %1298 = vperm.xlu0 %5190, %v5603_v27   ;;  %v6170_v16 = vpop.permute.xlu2 %1118  ;;  %v6172_v21 = vpop.permute.xlu1 %1068 }
 0x1ae   : > { %8160 = vst [vmem:[#allocation157_spill] sm:$0xff] %v6170_v16  ;;  %v6174_v20 = vpop.permute.xlu0 %1063 }
 0x1af   : > { %8161 = vst [vmem:[#allocation158_spill] sm:$0xff] %v6172_v21 }
 0x1b0   : > { %8162 = vst [vmem:[#allocation159_spill] sm:$0xff] %v6174_v20  ;;  %v8209_v20 = vld [vmem:[#allocation53_spill] sm:$0xff] }
 0x1b4   : > { %1301 = vperm.xlu1 %5191, %v5600_v26  }
 0x1b5   : > { %1304 = vperm.xlu2 %5189, %v5597_v25   ;;  %1307 = vperm.xlu0 %5190, %v5615_v30   ;;  %v6179_v19 = vpop.permute.xlu2 %1133  ;;  %v6181_v24 = vpop.permute.xlu1 %1083 }
 0x1b6   : > { %8163 = vst [vmem:[#allocation160_spill] sm:$0xff] %v6179_v19  ;;  %v6183_v23 = vpop.permute.xlu0 %1078 }
 0x1b7   : > { %8164 = vst [vmem:[#allocation161_spill] sm:$0xff] %v6181_v24  ;;  %v8205_v24 = vld [vmem:[#allocation54_spill] sm:$0xff] }
 0x1b8   : > { %8165 = vst [vmem:[#allocation162_spill] sm:$0xff] %v6183_v23 }
 0x1bc   : > { %1310 = vperm.xlu1 %5191, %v5612_v29  }
 0x1bd   : > { %1313 = vperm.xlu2 %5189, %v5609_v28   ;;  %1316 = vperm.xlu0 %5190, %v5627_v33   ;;  %v6188_v22 = vpop.permute.xlu2 %1148  ;;  %v6190_v27 = vpop.permute.xlu1 %1098 }
 0x1be   : > { %8166 = vst [vmem:[#allocation163_spill] sm:$0xff] %v6188_v22  ;;  %v6192_v26 = vpop.permute.xlu0 %1093 }
 0x1bf   : > { %8167 = vst [vmem:[#allocation164_spill] sm:$0xff] %v6190_v27  ;;  %v8199_v27 = vld [vmem:[#allocation48_spill] sm:$0xff] }
 0x1c0   : > { %8168 = vst [vmem:[#allocation165_spill] sm:$0xff] %v6192_v26 }
 0x1c4   : > { %1319 = vperm.xlu1 %5191, %v5624_v32  }
 0x1c5   : > { %1322 = vperm.xlu2 %5189, %v5621_v31   ;;  %1325 = vperm.xlu0 %5190, %v5639_v36   ;;  %v6197_v25 = vpop.permute.xlu1 %1113 }
 0x1c6   : > { %8169 = vst [vmem:[#allocation166_spill] sm:$0xff] %v6197_v25  ;;  %v6199_v30 = vpop.permute.xlu0 %1108  ;;  %v6201_v29 = vpop.permute.xlu2 %1226  ;;  %v8193_v25 = vld [vmem:[#allocation42_spill] sm:$0xff] }
 0x1c7   : > { %8170 = vst [vmem:[#allocation167_spill] sm:$0xff] %v6199_v30 }
 0x1cc   : > { %1328 = vperm.xlu1 %5191, %v5636_v35  }
 0x1cd   : > { %1331 = vperm.xlu2 %5189, %v5633_v34   ;;  %1334 = vperm.xlu0 %5190, %v5653_v40   ;;  %v6206_v28 = vpop.permute.xlu1 %1128 }
 0x1ce   : > { %8171 = vst [vmem:[#allocation168_spill] sm:$0xff] %v6206_v28  ;;  %v6208_v33 = vpop.permute.xlu0 %1123  ;;  %v8188_v28 = vld [vmem:[#allocation36_spill] sm:$0xff] }
 0x1cf   : > { %8172 = vst [vmem:[#allocation169_spill] sm:$0xff] %v6208_v33  ;;  %v6210_v32 = vpop.permute.xlu2 %1235 }
 0x1d4   : > { %1337 = vperm.xlu1 %5191, %v5650_v39  }
 0x1d5   : > { %1340 = vperm.xlu2 %5189, %v5647_v38   ;;  %1343 = vperm.xlu0 %5190, %v5667_v44   ;;  %v6215_v31 = vpop.permute.xlu1 %1143 }
 0x1d6   : > { %8173 = vst [vmem:[#allocation170_spill] sm:$0xff] %v6215_v31  ;;  %v6217_v36 = vpop.permute.xlu0 %1138  ;;  %v8184_v31 = vld [vmem:[#allocation30_spill] sm:$0xff] }
 0x1d7   : > { %8174 = vst [vmem:[#allocation171_spill] sm:$0xff] %v6217_v36  ;;  %v6219_v35 = vpop.permute.xlu2 %1241 }
 0x1dc   : > { %1346 = vperm.xlu1 %5191, %v5664_v43  }
 0x1dd   : > { %1349 = vperm.xlu2 %5189, %v5661_v42   ;;  %1352 = vperm.xlu0 %5190, %v5681_v48   ;;  %v6224_v34 = vpop.permute.xlu1 %1158 }
 0x1de   : > { %8175 = vst [vmem:[#allocation172_spill] sm:$0xff] %v6224_v34  ;;  %v6226_v40 = vpop.permute.xlu0 %1153  ;;  %v8180_v34 = vld [vmem:[#allocation24_spill] sm:$0xff] }
 0x1df   : > { %8176 = vst [vmem:[#allocation173_spill] sm:$0xff] %v6226_v40  ;;  %v6228_v39 = vpop.permute.xlu2 %1250 }
 0x1e4   : > { %1355 = vperm.xlu1 %5191, %v5678_v47  }
 0x1e5   : > { %1358 = vperm.xlu2 %5189, %v5675_v46   ;;  %1361 = vperm.xlu0 %5190, %v5699_v54  }
 0x1e6   : > { %v6233_v38 = vpop.permute.xlu1 %1232 }
 0x1e7   : > { %v6235_v44 = vpop.permute.xlu2 %1259  ;;  %v6237_v43 = vpop.permute.xlu0 %1229 }
 0x1ec   : > { %1364 = vperm.xlu1 %5191, %v5696_v53  }
 0x1ed   : > { %1367 = vperm.xlu2 %5189, %v5693_v52   ;;  %1370 = vperm.xlu0 %5190, %v5717_v60   ;;  %v8178_v52 = vld [vmem:[#allocation18_spill] sm:$0xff]  ;;  %v8179_v60 = vld [vmem:[#allocation17_spill] sm:$0xff] }
 0x1ee   : > { %v6242_v42 = vpop.permute.xlu1 %1238 }
 0x1ef   : > { %v6244_v48 = vpop.permute.xlu2 %1268  ;;  %v6246_v47 = vpop.permute.xlu0 %1244 }
 0x1f4   : > { %1373 = vperm.xlu1 %5191, %v5714_v59  }
 0x1f5   : > { %1376 = vperm.xlu2 %5189, %v5711_v58   ;;  %1379 = vperm.xlu0 %5190, %v5735_v49   ;;  %v8182_v58 = vld [vmem:[#allocation23_spill] sm:$0xff]  ;;  %v8183_v49 = vld [vmem:[#allocation22_spill] sm:$0xff] }
 0x1f6   : > { %v6251_v46 = vpop.permute.xlu1 %1247 }
 0x1f7   : > { %v6253_v54 = vpop.permute.xlu2 %1277  ;;  %v6255_v53 = vpop.permute.xlu0 %1253 }
 0x1f8   : > { %8177 = vst [vmem:[#allocation174_spill] sm:$0xff] %v6253_v54 }
 0x1fc   : > { %1382 = vperm.xlu1 %5191, %v8178_v52  }
 0x1fd   : > { %1385 = vperm.xlu2 %5189, %v8179_v60   ;;  %1388 = vperm.xlu0 %5190, %v8180_v34   ;;  %v8186_v60 = vld [vmem:[#allocation29_spill] sm:$0xff]  ;;  %v8187_v34 = vld [vmem:[#allocation28_spill] sm:$0xff] }
 0x1fe   : > { %v6260_v40 = vpop.permute.xlu1 %1256 }
 0x1ff   : > { %v6262_v22 = vpop.permute.xlu2 %1286  ;;  %v6264_v59 = vpop.permute.xlu0 %1262 }
 0x200   : > { %8181 = vst [vmem:[#allocation18_spill] sm:$0xff] %v6262_v22 }
 0x204   : > { %1391 = vperm.xlu1 %5191, %v8182_v58  }
 0x205   : > { %1394 = vperm.xlu2 %5189, %v8183_v49   ;;  %1397 = vperm.xlu0 %5190, %v8184_v31   ;;  %v8191_v49 = vld [vmem:[#allocation35_spill] sm:$0xff]  ;;  %v8192_v31 = vld [vmem:[#allocation34_spill] sm:$0xff] }
 0x206   : > { %v6269_v36 = vpop.permute.xlu1 %1265 }
 0x207   : > { %v6271_v19 = vpop.permute.xlu2 %1295  ;;  %v6273_v52 = vpop.permute.xlu0 %1271 }
 0x208   : > { %8185 = vst [vmem:[#allocation17_spill] sm:$0xff] %v6271_v19 }
 0x20c   : > { %1400 = vperm.xlu1 %5191, %v8186_v60  }
 0x20d   : > { %1403 = vperm.xlu2 %5189, %v8187_v34   ;;  %1406 = vperm.xlu0 %5190, %v8188_v28   ;;  %v8197_v34 = vld [vmem:[#allocation41_spill] sm:$0xff]  ;;  %v8198_v28 = vld [vmem:[#allocation40_spill] sm:$0xff] }
 0x20e   : > { %v6278_v33 = vpop.permute.xlu1 %1274 }
 0x20f   : > { %v6280_v16 = vpop.permute.xlu2 %1304  ;;  %v6282_v58 = vpop.permute.xlu0 %1280 }
 0x210   : > { %8189 = vst [vmem:[#allocation24_spill] sm:$0xff] %v6280_v16 }
 0x211   : > { %8190 = vst [vmem:[#allocation23_spill] sm:$0xff] %v6282_v58 }
 0x214   : > { %1409 = vperm.xlu1 %5191, %v8191_v49  }
 0x215   : > { %1412 = vperm.xlu2 %5189, %v8192_v31   ;;  %1415 = vperm.xlu0 %5190, %v8193_v25   ;;  %v8203_v31 = vld [vmem:[#allocation47_spill] sm:$0xff]  ;;  %v8204_v25 = vld [vmem:[#allocation46_spill] sm:$0xff] }
 0x216   : > { %v6287_v30 = vpop.permute.xlu1 %1283 }
 0x217   : > { %8194 = vst [vmem:[#allocation22_spill] sm:$0xff] %v6287_v30  ;;  %v6289_v13 = vpop.permute.xlu2 %1313  ;;  %v6291_v60 = vpop.permute.xlu0 %1289  ;;  %v5093_v30 = vld [vmem:[%s452_s24 + $0x10] sm:$0xff]  }
 0x218   : > { %8195 = vst [vmem:[#allocation30_spill] sm:$0xff] %v6289_v13  ;;  %v4926_v50 = vunpack.c.l.bf16 %v5093_v30 }
 0x219   : > { %8196 = vst [vmem:[#allocation29_spill] sm:$0xff] %v6291_v60 }
 0x21c   : > { %1482 = vperm.xlu1 %5191, %v8197_v34  }
 0x21d   : > { %1486 = vperm.xlu2 %5189, %v8198_v28   ;;  %1490 = vperm.xlu0 %5190, %v8199_v27  }
 0x21e   : > { %v6296_v26 = vpop.permute.xlu1 %1292 }
 0x21f   : > { %8200 = vst [vmem:[#allocation28_spill] sm:$0xff] %v6296_v26  ;;  %v6298_v10 = vpop.permute.xlu2 %1322  ;;  %v6300_v49 = vpop.permute.xlu0 %1298 }
 0x220   : > { %8201 = vst [vmem:[#allocation36_spill] sm:$0xff] %v6298_v10  ;;  %v8223_v10 = vld [vmem:[#allocation72_spill] sm:$0xff] }
 0x221   : > { %8202 = vst [vmem:[#allocation35_spill] sm:$0xff] %v6300_v49 }
 0x224   : > { %1494 = vperm.xlu1 %5191, %v8203_v31  }
 0x225   : > { %1498 = vperm.xlu2 %5189, %v8204_v25   ;;  %1502 = vperm.xlu0 %5190, %v8205_v24  }
 0x226   : > { %v6305_v23 = vpop.permute.xlu1 %1301 }
 0x227   : > { %8206 = vst [vmem:[#allocation34_spill] sm:$0xff] %v6305_v23  ;;  %v6307_v7 = vpop.permute.xlu2 %1331  ;;  %v6309_v21 = vpop.permute.xlu0 %1307  ;;  %v8245_v23 = vld [vmem:[#allocation89_spill] sm:$0xff] }
 0x228   : > { %8207 = vst [vmem:[#allocation42_spill] sm:$0xff] %v6307_v7 }
 0x229   : > { %8208 = vst [vmem:[#allocation41_spill] sm:$0xff] %v6309_v21  ;;  %v8239_v21 = vld [vmem:[#allocation83_spill] sm:$0xff] }
 0x22c   : > { %1506 = vperm.xlu1 %5191, %v8209_v20  }
 0x22d   : > { %1510 = vperm.xlu2 %5189, %v8210_v4   ;;  %1514 = vperm.xlu0 %5190, %v8211_v18  }
 0x22e   : > { %v6314_v17 = vpop.permute.xlu1 %1310 }
 0x22f   : > { %8212 = vst [vmem:[#allocation40_spill] sm:$0xff] %v6314_v17  ;;  %v6316_v5 = vpop.permute.xlu2 %1340  ;;  %v6318_v15 = vpop.permute.xlu0 %1316  ;;  %v8234_v17 = vld [vmem:[#allocation76_spill] sm:$0xff] }
 0x230   : > { %8213 = vst [vmem:[#allocation48_spill] sm:$0xff] %v6316_v5 }
 0x231   : > { %8214 = vst [vmem:[#allocation47_spill] sm:$0xff] %v6318_v15  ;;  %v8227_v15 = vld [vmem:[#allocation71_spill] sm:$0xff] }
 0x234   : > { %1518 = vperm.xlu1 %5191, %v8215_v14  }
 0x235   : > { %1522 = vperm.xlu2 %5189, %v8216_v62   ;;  %1526 = vperm.xlu0 %5190, %v8217_v12  }
 0x236   : > { %v6323_v11 = vpop.permute.xlu1 %1319 }
 0x237   : > { %8218 = vst [vmem:[#allocation46_spill] sm:$0xff] %v6323_v11  ;;  %v6325_v7 = vpop.permute.xlu2 %1349  ;;  %v6327_v45 = vpop.permute.xlu0 %1325  ;;  %v8229_v11 = vld [vmem:[#allocation78_spill] sm:$0xff] }
 0x238   : > { %8219 = vst [vmem:[#allocation54_spill] sm:$0xff] %v6325_v7 }
 0x239   : > { %8220 = vst [vmem:[#allocation53_spill] sm:$0xff] %v6327_v45 }
 0x23c   : > { %1530 = vperm.xlu1 %5191, %v8221_v9  }
 0x23d   : > { %1534 = vperm.xlu2 %5189, %v8222_v8   ;;  %1538 = vperm.xlu0 %5190, %v8223_v10  }
 0x23e   : > { %v6332_v5 = vpop.permute.xlu1 %1328 }
 0x23f   : > { %8224 = vst [vmem:[#allocation52_spill] sm:$0xff] %v6332_v5  ;;  %v6334_v61 = vpop.permute.xlu2 %1358  ;;  %v6336_v6 = vpop.permute.xlu0 %1334  ;;  %v8235_v5 = vld [vmem:[#allocation84_spill] sm:$0xff] }
 0x240   : > { %8225 = vst [vmem:[#allocation60_spill] sm:$0xff] %v6334_v61 }
 0x241   : > { %8226 = vst [vmem:[#allocation59_spill] sm:$0xff] %v6336_v6 }
 0x244   : > { %1542 = vperm.xlu1 %5191, %v8227_v15  }
 0x245   : > { %1546 = vperm.xlu2 %5189, %v8228_v1   ;;  %1550 = vperm.xlu0 %5190, %v8229_v11  }
 0x246   : > { %v6341_v7 = vpop.permute.xlu1 %1337 }
 0x247   : > { %8230 = vst [vmem:[#allocation58_spill] sm:$0xff] %v6341_v7  ;;  %v6343_v45 = vpop.permute.xlu2 %1367  ;;  %v6345_v13 = vpop.permute.xlu0 %1343  ;;  %v8241_v7 = vld [vmem:[#allocation90_spill] sm:$0xff] }
 0x248   : > { %8231 = vst [vmem:[#allocation66_spill] sm:$0xff] %v6343_v45 }
 0x249   : > { %8232 = vst [vmem:[#allocation65_spill] sm:$0xff] %v6345_v13 }
 0x24c   : > { %1554 = vperm.xlu1 %5191, %v8233_v56  }
 0x24d   : > { %1558 = vperm.xlu2 %5189, %v8234_v17   ;;  %1562 = vperm.xlu0 %5190, %v8235_v5  }
 0x24e   : > { %v6350_v61 = vpop.permute.xlu1 %1346 }
 0x24f   : > { %8236 = vst [vmem:[#allocation64_spill] sm:$0xff] %v6350_v61  ;;  %v6352_v6 = vpop.permute.xlu2 %1376  ;;  %v6354_v55 = vpop.permute.xlu0 %1352 }
 0x250   : > { %8237 = vst [vmem:[#allocation72_spill] sm:$0xff] %v6352_v6  ;;  %v8247_v6 = vld [vmem:[#allocation96_spill] sm:$0xff] }
 0x251   : > { %8238 = vst [vmem:[#allocation71_spill] sm:$0xff] %v6354_v55 }
 0x254   : > { %1566 = vperm.xlu1 %5191, %v8239_v21  }
 0x255   : > { %1570 = vperm.xlu2 %5189, %v8240_v2   ;;  %1574 = vperm.xlu0 %5190, %v8241_v7  }
 0x256   : > { %v6359_v45 = vpop.permute.xlu1 %1355 }
 0x257   : > { %8242 = vst [vmem:[#allocation70_spill] sm:$0xff] %v6359_v45  ;;  %v6361_v13 = vpop.permute.xlu2 %1385  ;;  %v6363_v16 = vpop.permute.xlu0 %1361  ;;  %v8252_v45 = vld [vmem:[#allocation94_spill] sm:$0xff] }
 0x258   : > { %8243 = vst [vmem:[#allocation78_spill] sm:$0xff] %v6361_v13  ;;  %v8253_v13 = vld [vmem:[#allocation101_spill] sm:$0xff] }
 0x259   : > { %8244 = vst [vmem:[#allocation77_spill] sm:$0xff] %v6363_v16 }
 0x25c   : > { %1578 = vperm.xlu1 %5191, %v8245_v23  }
 0x25d   : > { %1582 = vperm.xlu2 %5189, %v8246_v37   ;;  %1586 = vperm.xlu0 %5190, %v8247_v6  }
 0x25e   : > { %v6368_v55 = vpop.permute.xlu1 %1364 }
 0x25f   : > { %8248 = vst [vmem:[#allocation76_spill] sm:$0xff] %v6368_v55  ;;  %v6370_v61 = vpop.permute.xlu2 %1394  ;;  %v6372_v49 = vpop.permute.xlu0 %1370  ;;  %v5380_v55 = vmov 2  }
 0x260   : > { %8249 = vst [vmem:[#allocation84_spill] sm:$0xff] %v6370_v61  ;;  %v5198_v61 = vld [vmem:[%s5498_s27] sm:$0xff] }
 0x261   : > { %8250 = vst [vmem:[#allocation83_spill] sm:$0xff] %v6372_v49 }
 0x264   : > { %1590 = vperm.xlu1 %5191, %v8251_v3  }
 0x265   : > { %1594 = vperm.xlu2 %5189, %v8252_v45   ;;  %1598 = vperm.xlu0 %5190, %v8253_v13  }
 0x266   : > { %v6377_v16 = vpop.permute.xlu1 %1373 }
 0x267   : > { %8254 = vst [vmem:[#allocation82_spill] sm:$0xff] %v6377_v16  ;;  %v6379_v19 = vpop.permute.xlu2 %1403  ;;  %v6381_v26 = vpop.permute.xlu0 %1379 }
 0x268   : > { %8255 = vst [vmem:[#allocation90_spill] sm:$0xff] %v6379_v19  ;;  %v5199_v19 = vld [vmem:[%s5498_s27 + $0x8] sm:$0xff] }
 0x269   : > { %8256 = vst [vmem:[#allocation89_spill] sm:$0xff] %v6381_v26 }
 0x26c   : > { %1602 = vperm.xlu1 %5191, %v8257_v63   ;;  %v5200_v63 = vld [vmem:[%s5498_s27 + $0x18] sm:$0xff] }
 0x26d   : > { %5192 = vset.pattern.permute.xlu2 %v5380_v55  ;;  %5193 = vset.pattern.permute.xlu0 %v5380_v55 }
 0x26e   : > { %1866 = vperm.xlu2 %5192, %v5198_v61   ;;  %2122 = vperm.xlu0 %5193, %v8197_v34   ;;  %v6386_v49 = vpop.permute.xlu1 %1382 }
 0x26f   : > { %8258 = vst [vmem:[#allocation88_spill] sm:$0xff] %v6386_v49  ;;  %v6388_v60 = vpop.permute.xlu2 %1412  ;;  %v6390_v16 = vpop.permute.xlu0 %1388  ;;  %v5201_v49 = vld [vmem:[%s5498_s27 + $0x10] sm:$0xff] }
 0x270   : > { %8259 = vst [vmem:[#allocation96_spill] sm:$0xff] %v6388_v60  ;;  %v5203_v60 = vld [vmem:[%s5498_s27 + $0x30] sm:$0xff] }
 0x271   : > { %8260 = vst [vmem:[#allocation95_spill] sm:$0xff] %v6390_v16 }
 0x274   : > { %5194 = vset.pattern.permute.xlu1 %v5380_v55 }
 0x275   : > { %1869 = vperm.xlu1 %5194, %v5199_v19  }
 0x276   : > { %2126 = vperm.xlu2 %5192, %v8198_v28   ;;  %1875 = vperm.xlu0 %5193, %v5200_v63   ;;  %v6395_v26 = vpop.permute.xlu1 %1391  ;;  %v5202_v63 = vld [vmem:[%s5498_s27 + $0x20] sm:$0xff] }
 0x277   : > { %8261 = vst [vmem:[#allocation94_spill] sm:$0xff] %v6395_v26  ;;  %v6397_v61 = vpop.permute.xlu2 %1486  ;;  %v6399_v34 = vpop.permute.xlu0 %1397  ;;  %v5209_v26 = vld [vmem:[%s5498_s27 + $0x60] sm:$0xff] }
 0x278   : > { %8262 = vst [vmem:[#allocation101_spill] sm:$0xff] %v6399_v34 }
 0x27d   : > { %1872 = vperm.xlu1 %5194, %v5201_v49  }
 0x27e   : > { %2130 = vperm.xlu2 %5192, %v8199_v27   ;;  %2138 = vperm.xlu0 %5193, %v8204_v25   ;;  %v6404_v55 = vpop.permute.xlu1 %1400  ;;  %v5204_v25 = vld [vmem:[%s5498_s27 + $0x28] sm:$0xff] }
 0x27f   : > { %8263 = vst [vmem:[#allocation100_spill] sm:$0xff] %v6404_v55  ;;  %v6406_v19 = vpop.permute.xlu2 %1498  ;;  %v6408_v28 = vpop.permute.xlu0 %1406 }
 0x280   : > { %8264 = vst [vmem:[#allocation175_spill] sm:$0xff] %v6408_v28 }
 0x285   : > { %2134 = vperm.xlu1 %5194, %v8203_v31  }
 0x286   : > { %1878 = vperm.xlu2 %5192, %v5202_v63   ;;  %1884 = vperm.xlu0 %5193, %v5203_v60   ;;  %v6413_v34 = vpop.permute.xlu1 %1409  ;;  %v5205_v60 = vld [vmem:[%s5498_s27 + $0x38] sm:$0xff] }
 0x287   : > { %8265 = vst [vmem:[#allocation176_spill] sm:$0xff] %v6413_v34  ;;  %v6415_v49 = vpop.permute.xlu2 %1510  ;;  %v6417_v27 = vpop.permute.xlu0 %1415 }
 0x288   : > { %8266 = vst [vmem:[#allocation177_spill] sm:$0xff] %v6417_v27  ;;  %v5206_v27 = vld [vmem:[%s5498_s27 + $0x48] sm:$0xff] }
 0x28d   : > { %1881 = vperm.xlu1 %5194, %v5204_v25  }
 0x28e   : > { %2142 = vperm.xlu2 %5192, %v8205_v24   ;;  %2150 = vperm.xlu0 %5193, %v8210_v4   ;;  %v6422_v31 = vpop.permute.xlu1 %1482  ;;  %v5207_v4 = vld [vmem:[%s5498_s27 + $0x40] sm:$0xff] }
 0x28f   : > { %v6424_v28 = vpop.permute.xlu2 %1522  ;;  %v6426_v63 = vpop.permute.xlu0 %1490 }
 0x295   : > { %2146 = vperm.xlu1 %5194, %v8209_v20  }
 0x296   : > { %1887 = vperm.xlu2 %5192, %v5205_v60   ;;  %1893 = vperm.xlu0 %5193, %v5206_v27   ;;  %v6431_v34 = vpop.permute.xlu1 %1494  ;;  %v5208_v27 = vld [vmem:[%s5498_s27 + $0x50] sm:$0xff] }
 0x297   : > { %v6433_v25 = vpop.permute.xlu2 %1534  ;;  %v6435_v24 = vpop.permute.xlu0 %1502 }
 0x29d   : > { %1890 = vperm.xlu1 %5194, %v5207_v4  }
 0x29e   : > { %2154 = vperm.xlu2 %5192, %v8211_v18   ;;  %2162 = vperm.xlu0 %5193, %v8216_v62   ;;  %v6440_v20 = vpop.permute.xlu1 %1506  ;;  %v5210_v62 = vld [vmem:[%s5498_s27 + $0x58] sm:$0xff] }
 0x29f   : > { %v6442_v60 = vpop.permute.xlu2 %1546  ;;  %v6444_v55 = vpop.permute.xlu0 %1514 }
 0x2a5   : > { %2158 = vperm.xlu1 %5194, %v8215_v14  }
 0x2a6   : > { %1896 = vperm.xlu2 %5192, %v5208_v27   ;;  %1902 = vperm.xlu0 %5193, %v5209_v26   ;;  %v6449_v16 = vpop.permute.xlu1 %1518  ;;  %v5094_v27 = vld [vmem:[%s452_s24 + $0x18] sm:$0xff]  }
 0x2a7   : > { %v6451_v0 = vpop.permute.xlu2 %1558  ;;  %v6453_v18 = vpop.permute.xlu0 %1526  ;;  %v4931_v22 = vunpack.c.h.bf16 %v5094_v27 }
 0x2a8   : > { %8267 = vst [vmem:[#allocation178_spill] sm:$0xff] %v6451_v0 }
 0x2a9   : > { %2722 = vmatpush.msra.mxu0 %v4931_v22  ;;  %v5092_v22 = vld [vmem:[%s452_s24 + $0x8] sm:$0xff]  }
 0x2aa   : > { %v4923_v54 = vunpack.c.h.bf16 %v5092_v22 }
 0x2ad   : > { %1899 = vperm.xlu1 %5194, %v5210_v62   ;;  %v4930_v62 = vunpack.c.l.bf16 %v5094_v27  ;;  %v4922_v27 = vunpack.c.l.bf16 %v5092_v22 }
 0x2ae   : > { %2166 = vperm.xlu2 %5192, %v8217_v12   ;;  %2174 = vperm.xlu0 %5193, %v8222_v8   ;;  %v6459_v14 = vpop.permute.xlu1 %1530  ;;  %v5211_v12 = vld [vmem:[%s5498_s27 + $0x68] sm:$0xff]  ;;  %v5212_v8 = vld [vmem:[%s5498_s27 + $0x78] sm:$0xff] }
 0x2af   : > { %v6464_v26 = vpop.permute.xlu2 %1570  ;;  %v6466_v4 = vpop.permute.xlu0 %1538  ;;  %2723 = vmatpush.msra.mxu0 %v4930_v62 }
 0x2b0   : > { %8268 = vst [vmem:[#allocation179_spill] sm:$0xff] %v6464_v26  ;;  %v4927_v26 = vunpack.c.h.bf16 %v5093_v30 }
 0x2b2   : > { %2724 = vmatpush.msra.mxu0 %v4927_v26 }
 0x2b4   : > { %2725 = vmatpush.msra.mxu0 %v4926_v50 }
 0x2b5   : > { %2170 = vperm.xlu1 %5194, %v8221_v9   ;;  %v5213_v9 = vld [vmem:[%s5498_s27 + $0x70] sm:$0xff] }
 0x2b6   : > { %1905 = vperm.xlu2 %5192, %v5211_v12   ;;  %1911 = vperm.xlu0 %5193, %v5212_v8   ;;  %v6471_v0 = vpop.permute.xlu1 %1542  ;;  %v4917_v8 = vld [vmem:[%s452_s24] sm:$0xff]  }
 0x2b7   : > { %v6473_v51 = vpop.permute.xlu2 %1582  ;;  %v6475_v58 = vpop.permute.xlu0 %1550  ;;  %2726 = vmatpush.msra.mxu0 %v4923_v54  ;;  %v4919_v50 = vunpack.c.h.bf16 %v4917_v8  ;;  %v4918_v26 = vunpack.c.l.bf16 %v4917_v8  ;;  %v5214_v54 = vld [vmem:[%s5498_s27 + $0x80] sm:$0xff] }
 0x2b8   : > { %8269 = vst [vmem:[#allocation180_spill] sm:$0xff] %v6473_v51 }
 0x2b9   : > { %2727 = vmatpush.msra.mxu0 %v4922_v27 }
 0x2bb   : > { %2728 = vmatpush.msra.mxu0 %v4919_v50  ;;  %v583_v50 = vlaneseq }
 0x2bd   : > { %1908 = vperm.xlu1 %5194, %v5213_v9   ;;  %2729 = vmatpush.msra.mxu0 %v4918_v26  ;;  %v5217_v26 = vld [vmem:[%s5498_s27 + $0x98] sm:$0xff]  ;;  %v6507_v51 = vand.u32 127, %v583_v50 }
 0x2be   : > { %2178 = vperm.xlu2 %5192, %v8223_v10   ;;  %2186 = vperm.xlu0 %5193, %v8228_v1   ;;  %v6480_v12 = vpop.permute.xlu1 %1554  ;;  %v5215_v10 = vld [vmem:[%s5498_s27 + $0x90] sm:$0xff] }
 0x2bf   : > { %v6482_v62 = vpop.permute.xlu2 %1594  ;;  %v6484_v30 = vpop.permute.xlu0 %1562  ;;  %vm1417_vm0 = vcmp.eq.s32.totalorder %v6507_v51, %v6201_v29  ;;  %vm1418_vm4 = vcmp.eq.s32.totalorder %v6507_v51, %v6237_v43  ;;  %vm1419_vm7 = vcmp.eq.s32.totalorder %v6507_v51, %v6233_v38  ;;  %vm1420_vm10 = vcmp.eq.s32.totalorder %v6507_v51, %v6210_v32 }
 0x2c0   : > { %8270 = vst [vmem:[#allocation181_spill] sm:$0xff] %v6482_v62  ;;  %v5216_v62 = vld [vmem:[%s5498_s27 + $0x88] sm:$0xff]  ;;  %vm1421_vm13 = vcmp.eq.s32.totalorder %v6507_v51, %v6242_v42  ;;  %v8283_v42 = vld [vmem:[#allocation108_spill] sm:$0xff] }
 0x2c5   : > { %2182 = vperm.xlu1 %5194, %v8227_v15  }
 0x2c6   : > { %1914 = vperm.xlu2 %5192, %v5214_v54   ;;  %1920 = vperm.xlu0 %5193, %v5215_v10   ;;  %v6489_v1 = vpop.permute.xlu1 %1566  ;;  %v5218_v54 = vld [vmem:[%s5498_s27 + $0xa8] sm:$0xff] }
 0x2c7   : > { %v6491_v22 = vpop.permute.xlu0 %1574 }
 0x2c8   : > { %v1867_v9 = vpop.permute.xlu2 %1866 }
 0x2c9   : > { %vm2057_vm2 = vcmp.eq.s32.totalorder %v6507_v51, %v1867_v9  ;;  %v5220_v9 = vld [vmem:[%s5498_s27 + $0xb0] sm:$0xff] }
 0x2cd   : > { %1917 = vperm.xlu1 %5194, %v5216_v62  }
 0x2ce   : > { %2190 = vperm.xlu2 %5192, %v8229_v11   ;;  %2198 = vperm.xlu0 %5193, %v8234_v17   ;;  %v6496_v27 = vpop.permute.xlu1 %1578  ;;  %v1737_v17 = vsel %vm1417_vm0, %v6422_v31, 0.0  ;;  %vm1422_vm0 = vcmp.eq.s32.totalorder %v6507_v51, %v6219_v35  ;;  %v8285_v35 = vld [vmem:[#allocation122_spill] sm:$0xff] }
 0x2cf   : > { %v6498_v15 = vpop.permute.xlu0 %1586 }
 0x2d0   : > { %8271 = vst [vmem:[#allocation182_spill] sm:$0xff] %v6498_v15  ;;  %v2127_v8 = vpop.permute.xlu2 %2126  ;;  %v5219_v15 = vld [vmem:[%s5498_s27 + $0xa0] sm:$0xff] }
 0x2d5   : > { %2194 = vperm.xlu1 %5194, %v8233_v56   ;;  %v8274_v56 = vld [vmem:[#allocation10_spill] sm:$0xff] }
 0x2d6   : > { %1923 = vperm.xlu2 %5192, %v5217_v26   ;;  %1929 = vperm.xlu0 %5193, %v5218_v54   ;;  %v6503_v10 = vpop.permute.xlu1 %1590  ;;  %vm777_vm1 = vcmp.eq.s32.totalorder %v6507_v51, %v8274_v56  ;;  %v8275_v26 = vld [vmem:[#allocation115_spill] sm:$0xff]  ;;  %v8277_v56 = vld [vmem:[#allocation105_spill] sm:$0xff] }
 0x2d7   : > { %8272 = vst [vmem:[#allocation183_spill] sm:$0xff] %v6503_v10  ;;  %v6505_v62 = vpop.permute.xlu0 %1598  ;;  %v1161_v54 = vsel %vm777_vm1, %v8275_v26, 0.0 }
 0x2d8   : > { %8273 = vst [vmem:[#allocation184_spill] sm:$0xff] %v6505_v62  ;;  %v2131_v11 = vpop.permute.xlu2 %2130  ;;  %v1801_v29 = vadd.f32 %v1737_v17, %v1161_v54  ;;  %v5221_v17 = vld [vmem:[%s5498_s27 + $0xc0] sm:$0xff] }
 0x2dd   : > { %1926 = vperm.xlu1 %5194, %v5219_v15  }
 0x2de   : > { %2202 = vperm.xlu2 %5192, %v8235_v5   ;;  %2210 = vperm.xlu0 %5193, %v8240_v2   ;;  %v6518_v50 = vpop.permute.xlu1 %1602  ;;  %v1738_v5 = vsel %vm1418_vm4, %v6397_v61, 0.0  ;;  %v8276_v2 = vld [vmem:[#allocation13_spill] sm:$0xff]  ;;  %vm1423_vm4 = vcmp.eq.s32.totalorder %v6507_v51, %v6246_v47 }
 0x2df   : > { %vm778_vm5 = vcmp.eq.s32.totalorder %v6507_v51, %v8276_v2  ;;  %v8278_v2 = vld [vmem:[#allocation9_spill] sm:$0xff] }
 0x2e0   : > { %v6521_v62 = vpop.permute.xlu2 %1878  ;;  %v2123_v31 = vpop.permute.xlu0 %2122  ;;  %v1162_v26 = vsel %vm778_vm5, %v8277_v56, 0.0  ;;  %vm779_vm8 = vcmp.eq.s32.totalorder %v6507_v51, %v8278_v2 }
 0x2e1   : > { %v2377_v15 = vsel %vm2057_vm2, %v2123_v31, 0.0  ;;  %vm2061_vm15 = vcmp.eq.s32.totalorder %v6507_v51, %v6521_v62  ;;  %v1742_v62 = vsel %vm1422_vm0, %v6435_v24, 0.0  ;;  %vm1427_vm0 = vcmp.eq.s32.totalorder %v6507_v51, %v6260_v40 }
 0x2e2   : > { %v2441_v10 = vadd.f32 %v2377_v15, %v1801_v29  ;;  %v1802_v29 = vadd.f32 %v1738_v5, %v1162_v26  ;;  %v5222_v15 = vld [vmem:[%s5498_s27 + $0xb8] sm:$0xff]  ;;  %v8279_v5 = vld [vmem:[#allocation119_spill] sm:$0xff] }
 0x2e4   : > { %4551 = vmatmul.msk.f32.vlgmr.msra.gmra.mxu0 %vm2521_vm3, %v2441_v10 }
 0x2e5   : > { %2206 = vperm.xlu1 %5194, %v8239_v21   ;;  %v1739_v21 = vsel %vm1419_vm7, %v6426_v63, 0.0  ;;  %vm1424_vm7 = vcmp.eq.s32.totalorder %v6507_v51, %v6251_v46 }
 0x2e6   : > { %1932 = vperm.xlu2 %5192, %v5220_v9   ;;  %1938 = vperm.xlu0 %5193, %v5221_v17  }
 0x2e7   : > { %v1870_v54 = vpop.permute.xlu1 %1869 }
 0x2e8   : > { %vm2058_vm6 = vcmp.eq.s32.totalorder %v6507_v51, %v1870_v54  ;;  %v6534_v43 = vpop.permute.xlu2 %2142  ;;  %v1876_v10 = vpop.permute.xlu0 %1875  ;;  %v8281_v54 = vld [vmem:[#allocation118_spill] sm:$0xff] }
 0x2e9   : > { %v2378_v61 = vsel %vm2058_vm6, %v2127_v8, 0.0  ;;  %v1163_v8 = vsel %vm779_vm8, %v8279_v5, 0.0  ;;  %vm2060_vm12 = vcmp.eq.s32.totalorder %v6507_v51, %v1876_v10  ;;  %v5225_v5 = vld [vmem:[%s5498_s27 + $0xd0] sm:$0xff] }
 0x2ea   : > { %v2442_v31 = vadd.f32 %v2378_v61, %v1802_v29  ;;  %v1803_v17 = vadd.f32 %v1739_v21, %v1163_v8  ;;  %v5223_v61 = vld [vmem:[%s5498_s27 + $0xc8] sm:$0xff]  ;;  %v8282_v8 = vld [vmem:[#allocation5_spill] sm:$0xff] }
 0x2eb   : > { %vm781_vm14 = vcmp.eq.s32.totalorder %v6507_v51, %v8282_v8 }
 0x2ec   : > { %4552 = vmatmul.msk.f32.gmra.mxu0 %vm2521_vm3, %v2442_v31  ;;  %v1165_v10 = vsel %vm781_vm14, %v8283_v42, 0.0 }
 0x2ed   : > { %1935 = vperm.xlu1 %5194, %v5222_v15  }
 0x2ee   : > { %2214 = vperm.xlu2 %5192, %v8241_v7   ;;  %2222 = vperm.xlu0 %5193, %v8246_v37   ;;  %v1740_v7 = vsel %vm1420_vm10, %v6431_v34, 0.0  ;;  %v8280_v37 = vld [vmem:[#allocation12_spill] sm:$0xff]  ;;  %vm1425_vm10 = vcmp.eq.s32.totalorder %v6507_v51, %v6228_v39 }
 0x2ef   : > { %v1873_v9 = vpop.permute.xlu1 %1872  ;;  %vm780_vm11 = vcmp.eq.s32.totalorder %v6507_v51, %v8280_v37 }
 0x2f0   : > { %vm2059_vm9 = vcmp.eq.s32.totalorder %v6507_v51, %v1873_v9  ;;  %v2139_v38 = vpop.permute.xlu0 %2138  ;;  %v6547_v26 = vpop.permute.xlu2 %1887  ;;  %v1164_v29 = vsel %vm780_vm11, %v8281_v54, 0.0 }
 0x2f1   : > { %v2379_v56 = vsel %vm2059_vm9, %v2131_v11, 0.0  ;;  %v5224_v11 = vld [vmem:[%s5498_s27 + $0xd8] sm:$0xff]  ;;  %v1804_v31 = vadd.f32 %v1740_v7, %v1164_v29  ;;  %v2381_v9 = vsel %vm2061_vm15, %v2139_v38, 0.0  ;;  %v5226_v38 = vld [vmem:[%s5498_s27 + $0xe0] sm:$0xff]  ;;  %v5227_v7 = vld [vmem:[%s5498_s27 + $0xf0] sm:$0xff]  ;;  %vm2064_vm9 = vcmp.eq.s32.totalorder %v6507_v51, %v6547_v26 }
 0x2f2   : > { %v2443_v63 = vadd.f32 %v2379_v56, %v1803_v17  ;;  %v1745_v26 = vsel %vm1425_vm10, %v6444_v55, 0.0  ;;  %vm1430_vm10 = vcmp.eq.s32.totalorder %v6507_v51, %v6269_v36  ;;  %v4910_v36 = vld [vmem:[%s7927_s5] sm:$0xff] }
 0x2f3   : > { %3295 = vmatpush.bf16.msra.mxu1 %v4910_v36 }
 0x2f4   : > { %4553 = vmatmul.msk.f32.gmra.mxu0 %vm2521_vm3, %v2443_v63 }
 0x2f5   : > { %2218 = vperm.xlu1 %5194, %v8245_v23   ;;  %v1741_v23 = vsel %vm1421_vm13, %v6406_v19, 0.0  ;;  %vm1426_vm13 = vcmp.eq.s32.totalorder %v6507_v51, %v6255_v53  ;;  %v5236_v53 = vld [vmem:[%s5803_s15 + $0x108] sm:$0xff] }
 0x2f6   : > { %1941 = vperm.xlu2 %5192, %v5223_v61   ;;  %1947 = vperm.xlu0 %5193, %v5224_v11   ;;  %v1805_v56 = vadd.f32 %v1741_v23, %v1165_v10  ;;  %v1743_v11 = vsel %vm1423_vm4, %v6440_v20, 0.0  ;;  %v8288_v10 = vld [vmem:[#allocation15_spill] sm:$0xff]  ;;  %vm1428_vm4 = vcmp.eq.s32.totalorder %v6507_v51, %v6235_v44 }
 0x2f7   : > { %v2135_v32 = vpop.permute.xlu1 %2134  ;;  %vm784_vm8 = vcmp.eq.s32.totalorder %v6507_v51, %v8288_v10 }
 0x2f8   : > { %v2380_v21 = vsel %vm2060_vm12, %v2135_v32, 0.0  ;;  %v1885_v34 = vpop.permute.xlu0 %1884  ;;  %v6562_v2 = vpop.permute.xlu2 %2154  ;;  %v2445_v63 = vadd.f32 %v2381_v9, %v1805_v56  ;;  %v8286_v32 = vld [vmem:[#allocation16_spill] sm:$0xff]  ;;  %v8289_v9 = vmov 1   ;;  %v8290_v56 = vld [vmem:[#allocation111_spill] sm:$0xff] }
 0x2f9   : > { %v2444_v15 = vadd.f32 %v2380_v21, %v1804_v31  ;;  %v5228_v31 = vld [vmem:[%s5498_s27 + $0xe8] sm:$0xff]  ;;  %vm783_vm5 = vcmp.eq.s32.totalorder %v6507_v51, %v8286_v32  ;;  %vm2063_vm6 = vcmp.eq.s32.totalorder %v6507_v51, %v1885_v34  ;;  %v8287_v21 = vld [vmem:[#allocation121_spill] sm:$0xff]  ;;  %v5230_v34 = vld [vmem:[%s5803_s15 + $0xf0] sm:$0xff] }
 0x2fc   : > { %4554 = vmatmul.msk.f32.gmra.mxu0 %vm2521_vm3, %v2444_v15  ;;  %v1167_v15 = vsel %vm783_vm5, %v8287_v21, 0.0  ;;  %v8293_v21 = vld [vmem:[#allocation21_spill] sm:$0xff] }
 0x2fd   : > { %1944 = vperm.xlu1 %5194, %v5225_v5   ;;  %v1807_v5 = vadd.f32 %v1743_v11, %v1167_v15  ;;  %vm786_vm14 = vcmp.eq.s32.totalorder %v6507_v51, %v8293_v21  ;;  %v8294_v15 = vld [vmem:[#allocation124_spill] sm:$0xff]  ;;  %v5242_v21 = vld [vmem:[%s5803_s15 + $0x120] sm:$0xff] }
 0x2fe   : > { %2226 = vperm.xlu2 %5192, %v8247_v6   ;;  %2234 = vperm.xlu0 %5193, %v8252_v45   ;;  %v8284_v45 = vld [vmem:[#allocation6_spill] sm:$0xff] }
 0x2ff   : > { %v1882_v17 = vpop.permute.xlu1 %1881  ;;  %vm782_vm2 = vcmp.eq.s32.totalorder %v6507_v51, %v8284_v45 }
 0x300   : > { %v2151_v19 = vpop.permute.xlu0 %2150  ;;  %vm2062_vm1 = vcmp.eq.s32.totalorder %v6507_v51, %v1882_v17  ;;  %v6582_v6 = vpop.permute.xlu2 %1896  ;;  %v1166_v37 = vsel %vm782_vm2, %v8285_v35, 0.0  ;;  %v5231_v17 = vld [vmem:[%s5498_s27 + $0x100] sm:$0xff] }
 0x301   : > { %v2382_v54 = vsel %vm2062_vm1, %v6534_v43, 0.0  ;;  %v1806_v61 = vadd.f32 %v1742_v62, %v1166_v37  ;;  %v5229_v43 = vld [vmem:[%s5498_s27 + $0xf8] sm:$0xff]  ;;  %v2384_v46 = vsel %vm2064_vm9, %v2151_v19, 0.0  ;;  %v8291_v19 = vld [vmem:[#allocation7_spill] sm:$0xff]  ;;  %v5233_v37 = vld [vmem:[%s5498_s27 + $0x108] sm:$0xff]  ;;  %vm2067_vm2 = vcmp.eq.s32.totalorder %v6507_v51, %v6582_v6 }
 0x302   : > { %v5232_v62 = vld [vmem:[%s5803_s15 + $0xf8] sm:$0xff]  ;;  %vm785_vm12 = vcmp.eq.s32.totalorder %v6507_v51, %v8291_v19  ;;  %v1748_v6 = vsel %vm1428_vm4, %v6453_v18, 0.0 }
 0x304   : > { %4555 = vmatmul.msk.f32.gmra.mxu0 %vm2521_vm3, %v2445_v63  ;;  %v1168_v63 = vsel %vm784_vm8, %v8290_v56, 0.0 }
 0x305   : > { %2230 = vperm.xlu1 %5194, %v8251_v3   ;;  %v2446_v3 = vadd.f32 %v2382_v54, %v1806_v61  ;;  %v8292_v54 = vld [vmem:[#allocation125_spill] sm:$0xff] }
 0x306   : > { %1950 = vperm.xlu2 %5192, %v5226_v38   ;;  %1956 = vperm.xlu0 %5193, %v5227_v7  }
 0x307   : > { %v2147_v29 = vpop.permute.xlu1 %2146 }
 0x308   : > { %v6588_v24 = vpop.permute.xlu0 %1893  ;;  %v2383_v47 = vsel %vm2063_vm6, %v2147_v29, 0.0  ;;  %v6601_v20 = vpop.permute.xlu2 %2166  ;;  %v1169_v29 = vsel %vm785_vm12, %v8292_v54, 0.0 }
 0x309   : > { %v2447_v42 = vadd.f32 %v2383_v47, %v1807_v5  ;;  %v1809_v11 = vadd.f32 %v1745_v26, %v1169_v29  ;;  %vm2066_vm15 = vcmp.eq.s32.totalorder %v6507_v51, %v6588_v24  ;;  %v1170_v47 = vsel %vm786_vm14, %v8294_v15, 0.0 }
 0x30a   : > { %v1747_v24 = vsel %vm1427_vm0, %v6424_v28, 0.0  ;;  %vm1431_vm14 = vcmp.eq.s32.totalorder %v6507_v51, %v6244_v48 }
 0x30c   : > { %4556 = vmatmul.msk.f32.gmra.mxu0 %vm2521_vm3, %v2446_v3  ;;  %v5234_v3 = vld [vmem:[%s5803_s15 + $0x100] sm:$0xff] }
 0x30d   : > { %1953 = vperm.xlu1 %5194, %v5228_v31  }
 0x30e   : > { %2238 = vperm.xlu2 %5192, %v8253_v13   ;;  %1959 = vperm.xlu0 %5193, %v5229_v43   ;;  %v1744_v13 = vsel %vm1424_vm7, %v6415_v49, 0.0  ;;  %v1746_v43 = vsel %vm1426_vm13, %v6449_v16, 0.0  ;;  %vm1429_vm7 = vcmp.eq.s32.totalorder %v6507_v51, %v6264_v59  ;;  %vm3191_vm13 = vcmask 130048  }
 0x30f   : > { %v1891_v23 = vpop.permute.xlu1 %1890  ;;  %v1808_v45 = vadd.f32 %v1744_v13, %v1168_v63  ;;  %v5238_v63 = vld [vmem:[%s5803_s15 + $0x110] sm:$0xff] }
 0x310   : > { %v6603_v8 = vpop.permute.xlu0 %2162  ;;  %v6620_v35 = vpop.permute.xlu2 %1905  ;;  %vm2065_vm11 = vcmp.eq.s32.totalorder %v6507_v51, %v1891_v23 }
 0x311   : > { %v2448_v7 = vadd.f32 %v2384_v46, %v1808_v45  ;;  %v2385_v61 = vsel %vm2065_vm11, %v6562_v2, 0.0  ;;  %v5235_v2 = vld [vmem:[%s5498_s27 + $0x110] sm:$0xff]  ;;  %v2387_v40 = vsel %vm2067_vm2, %v6603_v8, 0.0  ;;  %v8297_v8 = vld [vmem:[#allocation8_spill] sm:$0xff]  ;;  %v5239_v45 = vld [vmem:[%s5498_s27 + $0x120] sm:$0xff]  ;;  %vm2070_vm12 = vcmp.eq.s32.totalorder %v6507_v51, %v6620_v35 }
 0x312   : > { %v2449_v32 = vadd.f32 %v2385_v61, %v1809_v11  ;;  %vm788_vm6 = vcmp.eq.s32.totalorder %v6507_v51, %v8297_v8  ;;  %v8300_v11 = vld [vmem:[#allocation127_spill] sm:$0xff] }
 0x314   : > { %4557 = vmatmul.msk.f32.gmra.mxu0 %vm2521_vm3, %v2447_v42  ;;  %v1810_v42 = vadd.f32 %v1746_v43, %v1170_v47 }
 0x315   : > { %2242 = vperm.xlu1 %5194, %v5230_v34   ;;  %v8295_v34 = vld [vmem:[#allocation20_spill] sm:$0xff] }
 0x316   : > { %5195 = vset.pattern.permute.xlu2 %v8289_v9  ;;  %1962 = vperm.xlu0 %5193, %v5231_v17   ;;  %vm787_vm1 = vcmp.eq.s32.totalorder %v6507_v51, %v8295_v34  ;;  %v5237_v9 = vld [vmem:[%s5498_s27 + $0x118] sm:$0xff]  ;;  %v8296_v17 = vld [vmem:[#allocation114_spill] sm:$0xff] }
 0x317   : > { %1606 = vperm.xlu2 %5195, %v5232_v62   ;;  %v2159_v49 = vpop.permute.xlu1 %2158  ;;  %v1171_v56 = vsel %vm787_vm1, %v8296_v17, 0.0  ;;  %v4878_v17 = vld [vmem:[%s6721_s20] sm:$0xff]  ;;  %vm1432_vm1 = vcmp.eq.s32.totalorder %v6507_v51, %v6273_v52 }
 0x318   : > { %v6618_v38 = vpop.permute.xlu0 %1902  ;;  %v6637_v55 = vpop.permute.xlu2 %2178  ;;  %v2386_v23 = vsel %vm2066_vm15, %v2159_v49, 0.0  ;;  %v1811_v46 = vadd.f32 %v1747_v24, %v1171_v56  ;;  %v5244_v24 = vld [vmem:[%s5803_s15 + $0x128] sm:$0xff]  ;;  %4747 = vmatmul.msk.bf16.vlgmr.msra.gmra.mxu1 %vm3191_vm13, %v4878_v17 }
 0x319   : > { %v2450_v16 = vadd.f32 %v2386_v23, %v1810_v42  ;;  %vm2069_vm9 = vcmp.eq.s32.totalorder %v6507_v51, %v6618_v38  ;;  %v4877_v38 = vld [vmem:[%s7926_s4 + $0x8] sm:$0xff]  ;;  %v1750_v23 = vsel %vm1430_vm10, %v6433_v25, 0.0  ;;  %v8302_v25 = vld [vmem:[#allocation117_spill] sm:$0xff] }
 0x31a   : > { %v2451_v49 = vadd.f32 %v2387_v40, %v1811_v46  ;;  %3572 = vmatpush.bf16.msra.mxu2 %v4877_v38  ;;  %v1751_v40 = vsel %vm1431_vm14, %v6466_v4, 0.0  ;;  %v8303_v46 = vld [vmem:[#allocation11_spill] sm:$0xff] }
 0x31b   : > { %vm791_vm0 = vcmp.eq.s32.totalorder %v6507_v51, %v8303_v46  ;;  %v8311_v46 = vld [vmem:[#allocation39_spill] sm:$0xff] }
 0x31c   : > { %4558 = vmatmul.msk.f32.gmra.mxu0 %vm2521_vm3, %v2448_v7  ;;  %v8298_v7 = vld [vmem:[#allocation128_spill] sm:$0xff]  ;;  %v1175_v48 = vsel %vm791_vm0, %v6081_v41, 0.0  ;;  %vm795_vm14 = vcmp.eq.s32.totalorder %v6507_v51, %v8311_v46 }
 0x31d   : > { %2246 = vperm.xlu1 %5194, %v5232_v62   ;;  %v1172_v26 = vsel %vm788_vm6, %v8298_v7, 0.0  ;;  %v1752_v7 = vsel %vm1432_vm1, %v6471_v0, 0.0 }
 0x31e   : > { %1965 = vperm.xlu0 %5193, %v5233_v37   ;;  %v5240_v37 = vld [vmem:[%s5803_s15 + $0x118] sm:$0xff]  ;;  %v1812_v54 = vadd.f32 %v1748_v6, %v1172_v26  ;;  %v8304_v26 = vld [vmem:[#allocation33_spill] sm:$0xff] }
 0x31f   : > { %1610 = vperm.xlu2 %5195, %v5234_v3   ;;  %v1900_v39 = vpop.permute.xlu1 %1899  ;;  %vm792_vm2 = vcmp.eq.s32.totalorder %v6507_v51, %v8304_v26 }
 0x320   : > { %v6633_v31 = vpop.permute.xlu0 %2174  ;;  %v6658_v10 = vpop.permute.xlu2 %1914  ;;  %vm2068_vm5 = vcmp.eq.s32.totalorder %v6507_v51, %v1900_v39  ;;  %v5241_v39 = vld [vmem:[%s5498_s27 + $0x128] sm:$0xff] }
 0x321   : > { %v2388_v19 = vsel %vm2068_vm5, %v6601_v20, 0.0  ;;  %v8299_v20 = vld [vmem:[#allocation27_spill] sm:$0xff]  ;;  %vm1433_vm5 = vcmp.eq.s32.totalorder %v6507_v51, %v6278_v33 }
 0x322   : > { %v2452_v61 = vadd.f32 %v2388_v19, %v1812_v54  ;;  %vm789_vm8 = vcmp.eq.s32.totalorder %v6507_v51, %v8299_v20  ;;  %v1176_v19 = vsel %vm792_vm2, %v6079_v57, 0.0  ;;  %v5248_v54 = vld [vmem:[%s5803_s15 + $0x138] sm:$0xff]  ;;  %v1753_v57 = vsel %vm1433_vm5, %v6442_v60, 0.0 }
 0x324   : > { %4559 = vmatmul.msk.f32.gmra.mxu0 %vm2521_vm3, %v2449_v32  ;;  %v1173_v32 = vsel %vm789_vm8, %v8300_v11, 0.0 }
 0x325   : > { %2250 = vperm.xlu1 %5194, %v5234_v3   ;;  %v1749_v3 = vsel %vm1429_vm7, %v6459_v14, 0.0  ;;  %vm2073_vm7 = vcmp.eq.s32.totalorder %v6507_v51, %v6658_v10  ;;  %v8307_v10 = vld [vmem:[#allocation174_spill] sm:$0xff] }
 0x326   : > { %1968 = vperm.xlu0 %5193, %v5235_v2   ;;  %v1813_v2 = vadd.f32 %v1749_v3, %v1173_v32  ;;  %v4879_v3 = vld [vmem:[%s6721_s20 + $0x8] sm:$0xff]  ;;  %vm1434_vm8 = vcmp.eq.s32.totalorder %v6507_v51, %v8307_v10 }
 0x327   : > { %1614 = vperm.xlu2 %5195, %v5236_v53   ;;  %v2171_v5 = vpop.permute.xlu1 %2170  ;;  %v5257_v10 = vld [vmem:[%s5498_s27 + $0x168] sm:$0xff] }
 0x328   : > { %v6648_v13 = vpop.permute.xlu0 %1911  ;;  %v6681_v29 = vpop.permute.xlu2 %2190  ;;  %v2389_v43 = vsel %vm2069_vm9, %v2171_v5, 0.0  ;;  %v5243_v5 = vld [vmem:[%s5498_s27 + $0x130] sm:$0xff]  ;;  %4748 = vmatmul.msk.bf16.gmra.mxu1 %vm3191_vm13, %v4879_v3 }
 0x329   : > { %v2453_v15 = vadd.f32 %v2389_v43, %v1813_v2  ;;  %vm2072_vm4 = vcmp.eq.s32.totalorder %v6507_v51, %v6648_v13  ;;  %v8305_v13 = vld [vmem:[#allocation32_spill] sm:$0xff]  ;;  %v5250_v43 = vld [vmem:[%s5803_s15 + $0x140] sm:$0xff]  ;;  %v8316_v3 = vld [vmem:[#allocation123_spill] sm:$0xff] }
 0x32a   : > { %vm793_vm6 = vcmp.eq.s32.totalorder %v6507_v51, %v8305_v13  ;;  %v5256_v13 = vld [vmem:[%s5803_s15 + $0x158] sm:$0xff] }
 0x32c   : > { %4560 = vmatmul.msk.f32.gmra.mxu0 %vm2521_vm3, %v2450_v16  ;;  %v2390_v16 = vsel %vm2070_vm12, %v6633_v31, 0.0 }
 0x32d   : > { %2254 = vperm.xlu1 %5194, %v5236_v53   ;;  %v8301_v53 = vld [vmem:[#allocation26_spill] sm:$0xff] }
 0x32e   : > { %1971 = vperm.xlu0 %5193, %v5237_v9   ;;  %vm790_vm11 = vcmp.eq.s32.totalorder %v6507_v51, %v8301_v53  ;;  %v4876_v9 = vld [vmem:[%s7926_s4] sm:$0xff]  ;;  %v5251_v53 = vld [vmem:[%s5498_s27 + $0x150] sm:$0xff] }
 0x32f   : > { %1618 = vperm.xlu2 %5195, %v5238_v63   ;;  %v6664_v28 = vpop.permute.xlu1 %1908  ;;  %v1174_v42 = vsel %vm790_vm11, %v8302_v25, 0.0  ;;  %3573 = vmatpush.bf16.msra.mxu2 %v4876_v9  ;;  %vm3469_vm11 = vcmask 261120  }
 0x330   : > { %v6666_v62 = vpop.permute.xlu0 %2186  ;;  %v6698_v14 = vpop.permute.xlu2 %1923  ;;  %v1814_v34 = vadd.f32 %v1750_v23, %v1174_v42  ;;  %vm2071_vm15 = vcmp.eq.s32.totalorder %v6507_v51, %v6664_v28  ;;  %v5246_v28 = vld [vmem:[%s5803_s15 + $0x130] sm:$0xff]  ;;  %v8308_v23 = vld [vmem:[#allocation14_spill] sm:$0xff] }
 0x331   : > { %v2391_v6 = vsel %vm2071_vm15, %v6637_v55, 0.0  ;;  %v5247_v55 = vld [vmem:[%s5498_s27 + $0x140] sm:$0xff]  ;;  %v2393_v32 = vsel %vm2073_vm7, %v6666_v62, 0.0  ;;  %v1754_v62 = vsel %vm1434_vm8, %v6475_v58, 0.0  ;;  %vm794_vm10 = vcmp.eq.s32.totalorder %v6507_v51, %v8308_v23  ;;  %v5252_v42 = vld [vmem:[%s5803_s15 + $0x148] sm:$0xff] }
 0x332   : > { %v2454_v56 = vadd.f32 %v2390_v16, %v1814_v34  ;;  %v4880_v34 = vld [vmem:[%s6721_s20 + $0x10] sm:$0xff]  ;;  %vm2076_vm2 = vcmp.eq.s32.totalorder %v6507_v51, %v6698_v14  ;;  %v8317_v14 = vld [vmem:[#allocation18_spill] sm:$0xff] }
 0x334   : > { %4561 = vmatmul.msk.f32.gmra.mxu0 %vm2521_vm3, %v2451_v49  ;;  %v5245_v49 = vld [vmem:[%s5498_s27 + $0x138] sm:$0xff] }
 0x335   : > { %2258 = vperm.xlu1 %5194, %v5238_v63  }
 0x336   : > { %1974 = vperm.xlu0 %5193, %v5239_v45   ;;  %v1815_v45 = vadd.f32 %v1751_v40, %v1175_v48  ;;  %v8310_v40 = vld [vmem:[#allocation23_spill] sm:$0xff] }
 0x337   : > { %1622 = vperm.xlu2 %5195, %v5240_v37   ;;  %v6679_v44 = vpop.permute.xlu1 %2182  ;;  %vm1435_vm12 = vcmp.eq.s32.totalorder %v6507_v51, %v8310_v40  ;;  %v8312_v48 = vld [vmem:[#allocation131_spill] sm:$0xff] }
 0x338   : > { %v6683_v18 = vpop.permute.xlu0 %1920  ;;  %v6737_v31 = vpop.permute.xlu2 %2202  ;;  %v2455_v4 = vadd.f32 %v2391_v6, %v1815_v45  ;;  %v2392_v52 = vsel %vm2072_vm4, %v6679_v44, 0.0  ;;  %v5249_v44 = vld [vmem:[%s5498_s27 + $0x148] sm:$0xff]  ;;  %4749 = vmatmul.msk.bf16.gmra.mxu1 %vm3191_vm13, %v4880_v34  ;;  %v1179_v6 = vsel %vm795_vm14, %v8312_v48, 0.0  ;;  %v5254_v45 = vld [vmem:[%s5803_s15 + $0x150] sm:$0xff]  ;;  %vm1437_vm4 = vcmp.eq.s32.totalorder %v6507_v51, %v8317_v14 }
 0x339   : > { %vm2075_vm15 = vcmp.eq.s32.totalorder %v6507_v51, %v6683_v18  ;;  %v8314_v18 = vld [vmem:[#allocation178_spill] sm:$0xff]  ;;  %v5259_v34 = vld [vmem:[%s5498_s27 + $0x170] sm:$0xff] }
 0x33c   : > { %4562 = vmatmul.msk.f32.gmra.mxu0 %vm2521_vm3, %v2452_v61  ;;  %v1816_v61 = vadd.f32 %v1752_v7, %v1176_v19 }
 0x33d   : > { %2262 = vperm.xlu1 %5194, %v5240_v37  }
 0x33e   : > { %1977 = vperm.xlu0 %5193, %v5241_v39   ;;  %v2456_v20 = vadd.f32 %v2392_v52, %v1816_v61  ;;  %v8306_v39 = vld [vmem:[#allocation120_spill] sm:$0xff]  ;;  %v5255_v61 = vld [vmem:[%s5498_s27 + $0x160] sm:$0xff] }
 0x33f   : > { %1626 = vperm.xlu2 %5195, %v5242_v21   ;;  %v6696_v59 = vpop.permute.xlu1 %1917  ;;  %v1177_v11 = vsel %vm793_vm6, %v8306_v39, 0.0 }
 0x340   : > { %v6700_v47 = vpop.permute.xlu0 %2198  ;;  %v6759_v41 = vpop.permute.xlu2 %1932  ;;  %v1817_v60 = vadd.f32 %v1753_v57, %v1177_v11  ;;  %vm2074_vm9 = vcmp.eq.s32.totalorder %v6507_v51, %v6696_v59 }
 0x341   : > { %v2394_v25 = vsel %vm2074_vm9, %v6681_v29, 0.0  ;;  %v1755_v29 = vsel %vm1435_vm12, %v6480_v12, 0.0  ;;  %v2396_v57 = vsel %vm2076_vm2, %v6700_v47, 0.0  ;;  %v1757_v47 = vsel %vm1437_vm4, %v6484_v30, 0.0 }
 0x342   : > { %v2457_v38 = vadd.f32 %v2393_v32, %v1817_v60  ;;  %v1819_v12 = vadd.f32 %v1755_v29, %v1179_v6  ;;  %v4881_v32 = vld [vmem:[%s6721_s20 + $0x18] sm:$0xff]  ;;  %v5260_v29 = vld [vmem:[%s5803_s15 + $0x168] sm:$0xff]  ;;  %v4882_v6 = vld [vmem:[%s6721_s20 + $0x20] sm:$0xff]  ;;  %vm2079_vm14 = vcmp.eq.s32.totalorder %v6507_v51, %v6759_v41 }
 0x344   : > { %4563 = vmatmul.msk.f32.gmra.mxu0 %vm2521_vm3, %v2453_v15 }
 0x345   : > { %2266 = vperm.xlu1 %5194, %v5242_v21  }
 0x346   : > { %1980 = vperm.xlu0 %5193, %v5243_v5   ;;  %v8309_v5 = vld [vmem:[#allocation132_spill] sm:$0xff] }
 0x347   : > { %1630 = vperm.xlu2 %5195, %v5244_v24   ;;  %v6726_v35 = vpop.permute.xlu1 %2194  ;;  %v1178_v36 = vsel %vm794_vm10, %v8309_v5, 0.0  ;;  %v5258_v5 = vld [vmem:[%s5803_s15 + $0x160] sm:$0xff] }
 0x348   : > { %v6741_v63 = vpop.permute.xlu0 %1929  ;;  %v6785_v21 = vpop.permute.xlu2 %2214  ;;  %4750 = vmatmul.msk.bf16.gmra.mxu1 %vm3191_vm13, %v4881_v32  ;;  %v8328_v32 = vld [vmem:[#allocation25_spill] sm:$0xff] }
 0x349   : > { %vm2078_vm9 = vcmp.eq.s32.totalorder %v6507_v51, %v6741_v63 }
 0x34c   : > { %4564 = vmatmul.msk.f32.gmra.mxu0 %vm2521_vm3, %v2454_v56 }
 0x34d   : > { %2270 = vperm.xlu1 %5194, %v5244_v24   ;;  %v1818_v24 = vadd.f32 %v1754_v62, %v1178_v36  ;;  %v8319_v62 = vld [vmem:[#allocation135_spill] sm:$0xff] }
 0x34e   : > { %1983 = vperm.xlu0 %5193, %v5245_v49   ;;  %v5253_v49 = vld [vmem:[%s5498_s27 + $0x158] sm:$0xff] }
 0x34f   : > { %1634 = vperm.xlu2 %5195, %v5246_v28   ;;  %v6749_v8 = vpop.permute.xlu1 %1926  ;;  %v2458_v58 = vadd.f32 %v2394_v25, %v1818_v24  ;;  %v8320_v24 = vld [vmem:[#allocation29_spill] sm:$0xff] }
 0x350   : > { %v6764_v37 = vpop.permute.xlu0 %2210  ;;  %v6804_v9 = vpop.permute.xlu2 %1941  ;;  %vm2077_vm5 = vcmp.eq.s32.totalorder %v6507_v51, %v6749_v8  ;;  %vm1438_vm7 = vcmp.eq.s32.totalorder %v6507_v51, %v8320_v24  ;;  %v5265_v24 = vld [vmem:[%s5498_s27 + $0x188] sm:$0xff] }
 0x354   : > { %4565 = vmatmul.msk.f32.gmra.mxu0 %vm2521_vm3, %v2455_v4 }
 0x355   : > { %2274 = vperm.xlu1 %5194, %v5246_v28   ;;  %v2395_v28 = vsel %vm2075_vm15, %v6726_v35, 0.0  ;;  %v8315_v35 = vld [vmem:[#allocation38_spill] sm:$0xff] }
 0x356   : > { %1986 = vperm.xlu0 %5193, %v5247_v55   ;;  %v2459_v26 = vadd.f32 %v2395_v28, %v1819_v12  ;;  %v8313_v55 = vld [vmem:[#allocation22_spill] sm:$0xff]  ;;  %vm796_vm1 = vcmp.eq.s32.totalorder %v6507_v51, %v8315_v35  ;;  %v8323_v12 = vld [vmem:[#allocation28_spill] sm:$0xff]  ;;  %v2399_v35 = vsel %vm2079_vm14, %v6764_v37, 0.0 }
 0x357   : > { %1638 = vperm.xlu2 %5195, %v5248_v54   ;;  %v6767_v0 = vpop.permute.xlu1 %2206  ;;  %vm1436_vm0 = vcmp.eq.s32.totalorder %v6507_v51, %v8313_v55  ;;  %vm1439_vm10 = vcmp.eq.s32.totalorder %v6507_v51, %v8323_v12  ;;  %v5261_v55 = vld [vmem:[%s5498_s27 + $0x178] sm:$0xff] }
 0x358   : > { %v6787_v2 = vpop.permute.xlu0 %1938  ;;  %v6826_v19 = vpop.permute.xlu2 %2226  ;;  %v1756_v52 = vsel %vm1436_vm0, %v8314_v18, 0.0  ;;  %v2398_v40 = vsel %vm2078_vm9, %v6767_v0, 0.0  ;;  %4751 = vmatmul.msk.bf16.gmra.mxu1 %vm3191_vm13, %v4882_v6  ;;  %v8324_v0 = vld [vmem:[#allocation179_spill] sm:$0xff]  ;;  %v8326_v18 = vld [vmem:[#allocation126_spill] sm:$0xff] }
 0x359   : > { %v5267_v6 = vld [vmem:[%s5498_s27 + $0x190] sm:$0xff] }
 0x35c   : > { %4566 = vmatmul.msk.f32.gmra.mxu0 %vm2521_vm3, %v2456_v20  ;;  %v1180_v20 = vsel %vm796_vm1, %v8316_v3, 0.0  ;;  %vm800_vm1 = vcmp.eq.s32.totalorder %v6507_v51, %v8328_v32 }
 0x35d   : > { %2278 = vperm.xlu1 %5194, %v5248_v54   ;;  %v1820_v39 = vadd.f32 %v1756_v52, %v1180_v20 }
 0x35e   : > { %1989 = vperm.xlu0 %5193, %v5249_v44  }
 0x35f   : > { %1642 = vperm.xlu2 %5195, %v5250_v43   ;;  %v6783_v33 = vpop.permute.xlu1 %1935 }
 0x360   : > { %v6806_v56 = vpop.permute.xlu0 %2222  ;;  %vm2080_vm0 = vcmp.eq.s32.totalorder %v6507_v51, %v6783_v33 }
 0x361   : > { %v2731_v15 = vpop.f32.mrf.mxu0 }
 0x364   : > { %4567 = vmatmul.msk.f32.gmra.mxu0 %vm2521_vm3, %v2457_v38  ;;  %v6853_v38 = vpop.permute.xlu2 %1950 }
 0x365   : > { %2282 = vperm.xlu1 %5194, %v5250_v43   ;;  %v2460_v43 = vadd.f32 %v2396_v57, %v1820_v39 }
 0x366   : > { %1992 = vperm.xlu0 %5193, %v5251_v53   ;;  %v2397_v53 = vsel %vm2077_vm5, %v6737_v31, 0.0  ;;  %v8321_v31 = vld [vmem:[#allocation45_spill] sm:$0xff]  ;;  %vm2081_vm5 = vcmp.eq.s32.totalorder %v6507_v51, %v6787_v2  ;;  %v8334_v2 = vld [vmem:[#allocation180_spill] sm:$0xff] }
 0x367   : > { %1646 = vperm.xlu2 %5195, %v5252_v42   ;;  %v6801_v16 = vpop.permute.xlu1 %2218  ;;  %vm798_vm8 = vcmp.eq.s32.totalorder %v6507_v51, %v8321_v31 }
 0x368   : > { %v6830_v54 = vpop.permute.xlu0 %1947 }
 0x369   : > { %v2734_v59 = vpop.f32.mrf.mxu0 }
 0x36a   : > { %v2923_v17 = vpack.c.bf16 %v2734_v59, %v2731_v15  ;;  %v8318_v15 = vld [vmem:[#allocation19_spill] sm:$0xff]  ;;  %v1758_v59 = vsel %vm1438_vm7, %v6489_v1, 0.0 }
 0x36b   : > { %vm797_vm6 = vcmp.eq.s32.totalorder %v6507_v51, %v8318_v15  ;;  %v5264_v15 = vld [vmem:[%s5803_s15 + $0x178] sm:$0xff] }
 0x36c   : > { %4568 = vmatmul.msk.f32.gmra.mxu0 %vm2521_vm3, %v2458_v58  ;;  %4787 = vmatmul.msk.bf16.vlgmr.msra.gmra.mxu2 %vm3469_vm11, %v2923_v17  ;;  %v1181_v23 = vsel %vm797_vm6, %v8319_v62, 0.0  ;;  %v8322_v58 = vld [vmem:[#allocation134_spill] sm:$0xff] }
 0x36d   : > { %2286 = vperm.xlu1 %5194, %v5252_v42   ;;  %v1821_v36 = vadd.f32 %v1757_v47, %v1181_v23  ;;  %v1182_v17 = vsel %vm798_vm8, %v8322_v58, 0.0  ;;  %v2400_v47 = vsel %vm2080_vm0, %v6785_v21, 0.0  ;;  %v4883_v62 = vld [vmem:[%s6721_s20 + $0x28] sm:$0xff]  ;;  %v5266_v58 = vld [vmem:[%s5803_s15 + $0x180] sm:$0xff]  ;;  %vm2082_vm8 = vcmp.eq.s32.totalorder %v6507_v51, %v6804_v9 }
 0x36e   : > { %1995 = vperm.xlu0 %5193, %v5253_v49   ;;  %v1822_v46 = vadd.f32 %v1758_v59, %v1182_v17  ;;  %v6875_v49 = vpop.permute.xlu2 %2238  ;;  %4752 = vmatmul.msk.bf16.gmra.mxu1 %vm3191_vm13, %v4883_v62  ;;  %v8332_v59 = vld [vmem:[#allocation137_spill] sm:$0xff]  ;;  %v2402_v12 = vsel %vm2082_vm8, %v6806_v56, 0.0  ;;  %v8338_v56 = vld [vmem:[#allocation182_spill] sm:$0xff]  ;;  %v8342_v62 = vld [vmem:[#allocation183_spill] sm:$0xff]  ;;  %vm2084_vm0 = vcmp.eq.s32.totalorder %v6507_v51, %v6830_v54 }
 0x36f   : > { %1650 = vperm.xlu2 %5195, %v5254_v45   ;;  %v6822_v4 = vpop.permute.xlu1 %1944  ;;  %v2461_v42 = vadd.f32 %v2397_v53, %v1821_v36  ;;  %v8345_v54 = vld [vmem:[#allocation40_spill] sm:$0xff] }
 0x370   : > { %v6858_v8 = vpop.permute.xlu0 %2234  ;;  %v2462_v28 = vadd.f32 %v2398_v40, %v1822_v46 }
 0x371   : > { %v2737_v7 = vpop.f32.mrf.mxu0 }
 0x374   : > { %4569 = vmatmul.msk.f32.gmra.mxu0 %vm2521_vm3, %v2459_v26  ;;  %v8325_v26 = vld [vmem:[#allocation44_spill] sm:$0xff] }
 0x375   : > { %2290 = vperm.xlu1 %5194, %v5254_v45   ;;  %vm799_vm12 = vcmp.eq.s32.totalorder %v6507_v51, %v8325_v26 }
 0x376   : > { %1998 = vperm.xlu0 %5193, %v5255_v61   ;;  %v1183_v52 = vsel %vm799_vm12, %v8326_v18, 0.0  ;;  %v5262_v61 = vld [vmem:[%s5803_s15 + $0x170] sm:$0xff] }
 0x377   : > { %1654 = vperm.xlu2 %5195, %v5256_v13   ;;  %v6840_v44 = vpop.permute.xlu1 %2230 }
 0x378   : > { %v6877_v1 = vpop.permute.xlu0 %1956 }
 0x379   : > { %v2740_v11 = vpop.f32.mrf.mxu0 }
 0x37a   : > { %v2924_v60 = vpack.c.bf16 %v2740_v11, %v2737_v7  ;;  %v1759_v7 = vsel %vm1439_vm10, %v8324_v0, 0.0  ;;  %v8327_v11 = vld [vmem:[#allocation17_spill] sm:$0xff]  ;;  %vm2083_vm10 = vcmp.eq.s32.totalorder %v6507_v51, %v6822_v4 }
 0x37b   : > { %v1823_v3 = vadd.f32 %v1759_v7, %v1183_v52  ;;  %vm1440_vm15 = vcmp.eq.s32.totalorder %v6507_v51, %v8327_v11  ;;  %v5268_v7 = vld [vmem:[%s5803_s15 + $0x188] sm:$0xff]  ;;  %v4884_v52 = vld [vmem:[%s6721_s20 + $0x30] sm:$0xff]  ;;  %v8340_v11 = vld [vmem:[#allocation141_spill] sm:$0xff]  ;;  %v2403_v32 = vsel %vm2083_vm10, %v6826_v19, 0.0  ;;  %vm2087_vm10 = vcmp.eq.s32.totalorder %v6507_v51, %v6877_v1 }
 0x37c   : > { %4570 = vmatmul.msk.f32.gmra.mxu0 %vm2521_vm3, %v2460_v43  ;;  %4788 = vmatmul.msk.bf16.gmra.mxu2 %vm3469_vm11, %v2924_v60  ;;  %v1760_v37 = vsel %vm1440_vm15, %v6491_v22, 0.0  ;;  %v5263_v43 = vld [vmem:[%s5498_s27 + $0x180] sm:$0xff]  ;;  %v8329_v60 = vld [vmem:[#allocation138_spill] sm:$0xff]  ;;  %v8330_v22 = vld [vmem:[#allocation35_spill] sm:$0xff] }
 0x37d   : > { %2294 = vperm.xlu1 %5194, %v5256_v13   ;;  %v2463_v57 = vadd.f32 %v2399_v35, %v1823_v3  ;;  %v6896_v13 = vpop.permute.xlu2 %1606  ;;  %v1184_v14 = vsel %vm800_vm1, %v8329_v60, 0.0  ;;  %vm1441_vm2 = vcmp.eq.s32.totalorder %v6507_v51, %v8330_v22  ;;  %v8344_v22 = vld [vmem:[#allocation140_spill] sm:$0xff]  ;;  %vm1445_vm1 = vcmp.eq.s32.totalorder %v6507_v51, %v8345_v54 }
 0x37e   : > { %2001 = vperm.xlu0 %5193, %v5257_v10   ;;  %v1824_v10 = vadd.f32 %v1760_v37, %v1184_v14  ;;  %v1761_v21 = vsel %vm1441_vm2, %v6496_v27, 0.0  ;;  %4753 = vmatmul.msk.bf16.gmra.mxu1 %vm3191_vm13, %v4884_v52  ;;  %v8349_v52 = vld [vmem:[#allocation30_spill] sm:$0xff]  ;;  %v4914_v1 = vld [vmem:[%s7929_s7 + $0x18] sm:$0xff] }
 0x37f   : > { %1658 = vperm.xlu2 %5195, %v5258_v5   ;;  %v6861_v30 = vpop.permute.xlu1 %1953  ;;  %4035 = vmatpush.bf16.msra.mxu3 %v4914_v1 }
 0x380   : > { %v6898_v39 = vpop.permute.xlu0 %1959  ;;  %v2464_v23 = vadd.f32 %v2400_v47, %v1824_v10 }
 0x381   : > { %v2743_v25 = vpop.f32.mrf.mxu0 }
 0x384   : > { %4571 = vmatmul.msk.f32.gmra.mxu0 %vm2521_vm3, %v2461_v42 }
 0x385   : > { %2298 = vperm.xlu1 %5194, %v5258_v5   ;;  %v6918_v5 = vpop.permute.xlu2 %1610 }
 0x386   : > { %2004 = vperm.xlu0 %5193, %v5259_v34   ;;  %v2401_v34 = vsel %vm2081_vm5, %v6801_v16, 0.0  ;;  %vm1446_vm5 = vcmp.eq.s32.totalorder %v6507_v51, %v8349_v52 }
 0x387   : > { %1662 = vperm.xlu2 %5195, %v5260_v29   ;;  %v6880_v45 = vpop.permute.xlu1 %2242 }
 0x388   : > { %v6923_v36 = vpop.permute.xlu0 %1962 }
 0x389   : > { %v2746_v48 = vpop.f32.mrf.mxu0 }
 0x38a   : > { %v2925_v63 = vpack.c.bf16 %v2746_v48, %v2743_v25  ;;  %v8331_v25 = vld [vmem:[#allocation51_spill] sm:$0xff]  ;;  %v8335_v48 = vld [vmem:[#allocation50_spill] sm:$0xff] }
 0x38b   : > { %vm801_vm4 = vcmp.eq.s32.totalorder %v6507_v51, %v8331_v25  ;;  %vm802_vm7 = vcmp.eq.s32.totalorder %v6507_v51, %v8335_v48  ;;  %v2404_v25 = vsel %vm2084_vm0, %v6840_v44, 0.0  ;;  %v8346_v44 = vld [vmem:[#allocation181_spill] sm:$0xff]  ;;  %v5273_v48 = vld [vmem:[%s5498_s27 + $0x1a8] sm:$0xff] }
 0x38c   : > { %4572 = vmatmul.msk.f32.gmra.mxu0 %vm2521_vm3, %v2462_v28  ;;  %4789 = vmatmul.msk.bf16.gmra.mxu2 %vm3469_vm11, %v2925_v63  ;;  %v1185_v31 = vsel %vm801_vm4, %v8332_v59, 0.0  ;;  %v8336_v28 = vld [vmem:[#allocation129_spill] sm:$0xff]  ;;  %vm2085_vm4 = vcmp.eq.s32.totalorder %v6507_v51, %v6853_v38 }
 0x38d   : > { %2302 = vperm.xlu1 %5194, %v5260_v29   ;;  %v1825_v27 = vadd.f32 %v1761_v21, %v1185_v31  ;;  %v8333_v29 = vld [vmem:[#allocation34_spill] sm:$0xff]  ;;  %v6943_v16 = vpop.permute.xlu2 %1614  ;;  %v1186_v63 = vsel %vm802_vm7, %v8336_v28, 0.0 }
 0x38e   : > { %2007 = vperm.xlu0 %5193, %v5261_v55   ;;  %vm1442_vm6 = vcmp.eq.s32.totalorder %v6507_v51, %v8333_v29 }
 0x38f   : > { %1666 = vperm.xlu2 %5195, %v5262_v61   ;;  %v6904_v41 = vpop.permute.xlu1 %2246  ;;  %v2465_v40 = vadd.f32 %v2401_v34, %v1825_v27  ;;  %v1762_v46 = vsel %vm1442_vm6, %v8334_v2, 0.0  ;;  %v4885_v34 = vld [vmem:[%s6721_s20 + $0x38] sm:$0xff]  ;;  %v1765_v2 = vsel %vm1445_vm1, %v8346_v44, 0.0  ;;  %vm2086_vm6 = vcmp.eq.s32.totalorder %v6507_v51, %v6861_v30  ;;  %v8357_v44 = vld [vmem:[#allocation62_spill] sm:$0xff] }
 0x390   : > { %v6948_v0 = vpop.permute.xlu0 %1965  ;;  %v1826_v26 = vadd.f32 %v1762_v46, %v1186_v63  ;;  %4754 = vmatmul.msk.bf16.gmra.mxu1 %vm3191_vm13, %v4885_v34  ;;  %v8347_v46 = vld [vmem:[#allocation56_spill] sm:$0xff]  ;;  %v2405_v63 = vsel %vm2085_vm4, %v6858_v8, 0.0  ;;  %v2406_v30 = vsel %vm2086_vm6, %v6875_v49, 0.0 }
 0x391   : > { %v2749_v20 = vpop.f32.mrf.mxu0  ;;  %vm805_vm2 = vcmp.eq.s32.totalorder %v6507_v51, %v8347_v46  ;;  %v8358_v46 = vld [vmem:[#allocation133_spill] sm:$0xff]  ;;  %vm2090_vm6 = vcmp.eq.s32.totalorder %v6507_v51, %v6948_v0  ;;  %v8365_v0 = vld [vmem:[#allocation52_spill] sm:$0xff] }
 0x392   : > { %v2466_v9 = vadd.f32 %v2402_v12, %v1826_v26  ;;  %v5274_v12 = vld [vmem:[%s5803_s15 + $0x1a0] sm:$0xff] }
 0x394   : > { %4573 = vmatmul.msk.f32.gmra.mxu0 %vm2521_vm3, %v2463_v57  ;;  %v5269_v57 = vld [vmem:[%s5498_s27 + $0x198] sm:$0xff] }
 0x395   : > { %2306 = vperm.xlu1 %5194, %v5262_v61   ;;  %v8337_v61 = vld [vmem:[#allocation24_spill] sm:$0xff]  ;;  %v6968_v60 = vpop.permute.xlu2 %1618 }
 0x396   : > { %2010 = vperm.xlu0 %5193, %v5263_v43   ;;  %vm1443_vm9 = vcmp.eq.s32.totalorder %v6507_v51, %v8337_v61  ;;  %v5270_v43 = vld [vmem:[%s5803_s15 + $0x190] sm:$0xff]  ;;  %v8351_v61 = vld [vmem:[#allocation37_spill] sm:$0xff] }
 0x397   : > { %1670 = vperm.xlu2 %5195, %v5264_v15   ;;  %v6929_v42 = vpop.permute.xlu1 %2250  ;;  %v1763_v3 = vsel %vm1443_vm9, %v8338_v56, 0.0  ;;  %vm806_vm7 = vcmp.eq.s32.totalorder %v6507_v51, %v8351_v61  ;;  %v4911_v61 = vld [vmem:[%s7929_s7] sm:$0xff] }
 0x398   : > { %v6970_v14 = vpop.permute.xlu0 %1968 }
 0x399   : > { %v2752_v33 = vpop.f32.mrf.mxu0 }
 0x39a   : > { %v2926_v53 = vpack.c.bf16 %v2752_v33, %v2749_v20  ;;  %v8339_v20 = vld [vmem:[#allocation31_spill] sm:$0xff]  ;;  %v8341_v33 = vld [vmem:[#allocation41_spill] sm:$0xff] }
 0x39b   : > { %vm803_vm12 = vcmp.eq.s32.totalorder %v6507_v51, %v8339_v20  ;;  %vm1444_vm14 = vcmp.eq.s32.totalorder %v6507_v51, %v8341_v33  ;;  %v8352_v20 = vld [vmem:[#allocation144_spill] sm:$0xff]  ;;  %v8353_v33 = vld [vmem:[#allocation47_spill] sm:$0xff] }
 0x39c   : > { %4574 = vmatmul.msk.f32.gmra.mxu0 %vm2521_vm3, %v2464_v23  ;;  %4790 = vmatmul.msk.bf16.gmra.mxu2 %vm3469_vm11, %v2926_v53  ;;  %v1187_v37 = vsel %vm803_vm12, %v8340_v11, 0.0  ;;  %v1764_v19 = vsel %vm1444_vm14, %v8342_v62, 0.0  ;;  %v8343_v23 = vld [vmem:[#allocation57_spill] sm:$0xff]  ;;  %v5276_v11 = vld [vmem:[%s5803_s15 + $0x1a8] sm:$0xff]  ;;  %vm1447_vm8 = vcmp.eq.s32.totalorder %v6507_v51, %v8353_v33  ;;  %v8354_v62 = vld [vmem:[#allocation63_spill] sm:$0xff]  ;;  %vm808_vm14 = vcmp.eq.s32.totalorder %v6507_v51, %v8357_v44 }
 0x39d   : > { %2310 = vperm.xlu1 %5194, %v5264_v15   ;;  %v1827_v4 = vadd.f32 %v1763_v3, %v1187_v37  ;;  %vm804_vm15 = vcmp.eq.s32.totalorder %v6507_v51, %v8343_v23  ;;  %v5271_v53 = vld [vmem:[%s5498_s27 + $0x1a0] sm:$0xff]  ;;  %v6987_v27 = vpop.permute.xlu2 %1622  ;;  %v5275_v3 = vld [vmem:[%s5498_s27 + $0x1b0] sm:$0xff]  ;;  %v1767_v49 = vsel %vm1447_vm8, %v6518_v50, 0.0  ;;  %vm807_vm9 = vcmp.eq.s32.totalorder %v6507_v51, %v8354_v62  ;;  %v5277_v23 = vld [vmem:[%s5498_s27 + $0x1b8] sm:$0xff] }
 0x39e   : > { %2013 = vperm.xlu0 %5193, %v5265_v24   ;;  %v1188_v21 = vsel %vm804_vm15, %v8344_v22, 0.0  ;;  %v5272_v24 = vld [vmem:[%s5803_s15 + $0x198] sm:$0xff]  ;;  %vm2088_vm15 = vcmp.eq.s32.totalorder %v6507_v51, %v6898_v39 }
 0x39f   : > { %1674 = vperm.xlu2 %5195, %v5266_v58   ;;  %v6951_v55 = vpop.permute.xlu1 %2254  ;;  %v2467_v15 = vadd.f32 %v2403_v32, %v1827_v4  ;;  %v1828_v59 = vadd.f32 %v1764_v19, %v1188_v21  ;;  %v7025_v32 = vpop.f32.mrf.mxu1  ;;  %v4886_v4 = vld [vmem:[%s6721_s20 + $0x40] sm:$0xff]  ;;  %v2407_v21 = vsel %vm2087_vm10, %v6880_v45, 0.0  ;;  %v4913_v45 = vld [vmem:[%s7929_s7 + $0x10] sm:$0xff] }
 0x3a0   : > { %4755 = vmatmul.msk.bf16.gmra.mxu1 %vm3191_vm13, %v4886_v4  ;;  %4036 = vmatpush.bf16.msra.mxu3 %v4913_v45 }
 0x3a1   : > { %v2755_v17 = vpop.f32.mrf.mxu0 }
 0x3a4   : > { %4575 = vmatmul.msk.f32.gmra.mxu0 %vm2521_vm3, %v2465_v40  ;;  %v6989_v40 = vpop.permute.xlu0 %1971 }
 0x3a5   : > { %2314 = vperm.xlu1 %5194, %v5266_v58   ;;  %v2468_v58 = vadd.f32 %v2404_v25, %v1828_v59  ;;  %v7011_v38 = vpop.permute.xlu2 %1626 }
 0x3a6   : > { %2016 = vperm.xlu0 %5193, %v5267_v6   ;;  %v8348_v6 = vld [vmem:[#allocation130_spill] sm:$0xff] }
 0x3a7   : > { %1678 = vperm.xlu2 %5195, %v5268_v7   ;;  %v6972_v10 = vpop.permute.xlu1 %2258  ;;  %v1189_v28 = vsel %vm805_vm2, %v8348_v6, 0.0  ;;  %v2408_v6 = vsel %vm2088_vm15, %v6904_v41, 0.0  ;;  %vm2089_vm2 = vcmp.eq.s32.totalorder %v6507_v51, %v6923_v36  ;;  %v8362_v36 = vld [vmem:[#allocation53_spill] sm:$0xff] }
 0x3a8   : > { %vm1450_vm4 = vcmp.eq.s32.totalorder %v6507_v51, %v8362_v36 }
 0x3a9   : > { %v2758_v18 = vpop.f32.mrf.mxu0 }
 0x3aa   : > { %v2927_v35 = vpack.c.bf16 %v2758_v18, %v2755_v17 }
 0x3ac   : > { %4576 = vmatmul.msk.f32.gmra.mxu0 %vm2521_vm3, %v2466_v9  ;;  %4791 = vmatmul.msk.bf16.gmra.mxu2 %vm3469_vm11, %v2927_v35  ;;  %v8350_v9 = vld [vmem:[#allocation184_spill] sm:$0xff]  ;;  %v7015_v8 = vpop.permute.xlu0 %1974 }
 0x3ad   : > { %2318 = vperm.xlu1 %5194, %v5268_v7   ;;  %v1829_v7 = vadd.f32 %v1765_v2, %v1189_v28  ;;  %v1766_v35 = vsel %vm1446_vm5, %v8350_v9, 0.0  ;;  %v7038_v19 = vpop.permute.xlu2 %1630  ;;  %v5279_v2 = vld [vmem:[%s5498_s27 + $0x1c0] sm:$0xff]  ;;  %v5280_v28 = vld [vmem:[%s5803_s15 + $0x1b8] sm:$0xff] }
 0x3ae   : > { %2019 = vperm.xlu0 %5193, %v5269_v57   ;;  %v1190_v57 = vsel %vm806_vm7, %v8352_v20, 0.0  ;;  %v8360_v20 = vld [vmem:[#allocation43_spill] sm:$0xff]  ;;  %vm1451_vm7 = vcmp.eq.s32.totalorder %v6507_v51, %v8365_v0 }
 0x3af   : > { %1682 = vperm.xlu2 %5195, %v5270_v43   ;;  %v6994_v29 = vpop.permute.xlu1 %2262  ;;  %v2469_v18 = vadd.f32 %v2405_v63, %v1829_v7  ;;  %v1830_v37 = vadd.f32 %v1766_v35, %v1190_v57  ;;  %v4912_v7 = vld [vmem:[%s7929_s7 + $0x8] sm:$0xff]  ;;  %v8359_v35 = vld [vmem:[#allocation36_spill] sm:$0xff]  ;;  %vm809_vm1 = vcmp.eq.s32.totalorder %v6507_v51, %v8360_v20 }
 0x3b0   : > { %4037 = vmatpush.bf16.msra.mxu3 %v4912_v7  ;;  %vm1449_vm0 = vcmp.eq.s32.totalorder %v6507_v51, %v8359_v35  ;;  %v5281_v57 = vld [vmem:[%s5498_s27 + $0x1c8] sm:$0xff]  ;;  %v5286_v7 = vld [vmem:[%s5803_s15 + $0x1d0] sm:$0xff] }
 0x3b1   : > { %v2761_v47 = vpop.f32.mrf.mxu0  ;;  %v8368_v35 = vld [vmem:[#allocation42_spill] sm:$0xff] }
 0x3b2   : > { %vm1452_vm10 = vcmp.eq.s32.totalorder %v6507_v51, %v8368_v35  ;;  %v8376_v35 = vld [vmem:[#allocation139_spill] sm:$0xff] }
 0x3b4   : > { %4577 = vmatmul.msk.f32.gmra.mxu0 %vm2521_vm3, %v2467_v15  ;;  %v7043_v25 = vpop.permute.xlu0 %1977  ;;  %4038 = vmatpush.bf16.msra.mxu3 %v4911_v61  ;;  %v7148_v61 = vld [vmem:[%s7928_s6] ss:$0 sm:$0xff] }
 0x3b5   : > { %2322 = vperm.xlu1 %5194, %v5270_v43  }
 0x3b6   : > { %2022 = vperm.xlu0 %5193, %v5271_v53   ;;  %v8355_v53 = vld [vmem:[#allocation143_spill] sm:$0xff] }
 0x3b7   : > { %1686 = vperm.xlu2 %5195, %v5272_v24   ;;  %v7019_v56 = vpop.permute.xlu1 %2266  ;;  %v1191_v22 = vsel %vm807_vm9, %v8355_v53, 0.0  ;;  %v5283_v53 = vld [vmem:[%s5498_s27 + $0x1d0] sm:$0xff]  ;;  %vm2091_vm9 = vcmp.eq.s32.totalorder %v6507_v51, %v6970_v14 }
 0x3b8   : > { %v1831_v50 = vadd.f32 %v1767_v49, %v1191_v22  ;;  %v8364_v22 = vld [vmem:[#allocation146_spill] sm:$0xff] }
 0x3b9   : > { %v2764_v31 = vpop.f32.mrf.mxu0 }
 0x3ba   : > { %v2928_v17 = vpack.c.bf16 %v2764_v31, %v2761_v47  ;;  %v2470_v47 = vadd.f32 %v2406_v30, %v1830_v37  ;;  %v7048_v31 = vpop.f32.mrf.mxu1  ;;  %v8361_v30 = vld [vmem:[#allocation147_spill] sm:$0xff]  ;;  %v2409_v37 = vsel %vm2089_vm2, %v6929_v42, 0.0  ;;  %v1770_v42 = vsel %vm1450_vm4, %v6943_v16, 0.0 }
 0x3bc   : > { %4578 = vmatmul.msk.f32.gmra.mxu0 %vm2521_vm3, %v2468_v58  ;;  %4792 = vmatmul.msk.bf16.gmra.mxu2 %vm3469_vm11, %v2928_v17  ;;  %v2471_v58 = vadd.f32 %v2407_v21, %v1831_v50  ;;  %v8356_v17 = vld [vmem:[#allocation46_spill] sm:$0xff] }
 0x3bd   : > { %2326 = vperm.xlu1 %5194, %v5272_v24   ;;  %v5278_v24 = vld [vmem:[%s5803_s15 + $0x1b0] sm:$0xff]  ;;  %vm1448_vm12 = vcmp.eq.s32.totalorder %v6507_v51, %v8356_v17  ;;  %v5284_v50 = vld [vmem:[%s5803_s15 + $0x1c8] sm:$0xff] }
 0x3be   : > { %2025 = vperm.xlu0 %5193, %v5273_v48   ;;  %v1768_v54 = vsel %vm1448_vm12, %v6896_v13, 0.0  ;;  %v1192_v48 = vsel %vm808_vm14, %v8358_v46, 0.0  ;;  %vm2092_vm14 = vcmp.eq.s32.totalorder %v6507_v51, %v6989_v40 }
 0x3bf   : > { %1690 = vperm.xlu2 %5195, %v5274_v12   ;;  %v7046_v59 = vpop.permute.xlu1 %2270  ;;  %v1832_v63 = vadd.f32 %v1768_v54, %v1192_v48  ;;  %v5285_v48 = vld [vmem:[%s5498_s27 + $0x1d8] sm:$0xff] }
 0x3c1   : > { %v2767_v26 = vpop.f32.mrf.mxu0  ;;  %v2472_v52 = vadd.f32 %v2408_v6, %v1832_v63  ;;  %v8367_v6 = vld [vmem:[#allocation136_spill] sm:$0xff]  ;;  %v2411_v63 = vsel %vm2091_vm9, %v6972_v10, 0.0  ;;  %v1772_v10 = vsel %vm1452_vm10, %v6987_v27, 0.0 }
 0x3c2   : > { %v7070_v13 = vpop.f32.mrf.mxu1 }
 0x3c4   : > { %4579 = vmatmul.msk.f32.gmra.mxu0 %vm2521_vm3, %v2469_v18  ;;  %v4887_v18 = vld [vmem:[%s6721_s20 + $0x48] sm:$0xff] }
 0x3c5   : > { %2330 = vperm.xlu1 %5194, %v5274_v12   ;;  %v7068_v12 = vpop.permute.xlu2 %1634  ;;  %4756 = vmatmul.msk.bf16.gmra.mxu1 %vm3191_vm13, %v4887_v18 }
 0x3c6   : > { %2028 = vperm.xlu0 %5193, %v5275_v3   ;;  %v1769_v3 = vsel %vm1449_vm0, %v6918_v5, 0.0 }
 0x3c7   : > { %1694 = vperm.xlu2 %5195, %v5276_v11   ;;  %v7078_v9 = vpop.permute.xlu1 %2274 }
 0x3c9   : > { %v2770_v43 = vpop.f32.mrf.mxu0 }
 0x3ca   : > { %v2929_v15 = vpack.c.bf16 %v2770_v43, %v2767_v26  ;;  %v7075_v26 = vpop.permute.xlu0 %1980  ;;  %v5282_v43 = vld [vmem:[%s5803_s15 + $0x1c0] sm:$0xff] }
 0x3cc   : > { %4580 = vmatmul.msk.f32.gmra.mxu0 %vm2521_vm3, %v2470_v47  ;;  %4793 = vmatmul.msk.bf16.gmra.mxu2 %vm3469_vm11, %v2929_v15  ;;  %v7097_v47 = vpop.f32.mrf.mxu1 }
 0x3cd   : > { %2334 = vperm.xlu1 %5194, %v5276_v11   ;;  %v1193_v11 = vsel %vm809_vm1, %v8361_v30, 0.0  ;;  %v7099_v33 = vpop.permute.xlu2 %1638  ;;  %vm2093_vm1 = vcmp.eq.s32.totalorder %v6507_v51, %v7015_v8 }
 0x3ce   : > { %2031 = vperm.xlu0 %5193, %v5277_v23   ;;  %v1833_v4 = vadd.f32 %v1769_v3, %v1193_v11  ;;  %v8363_v23 = vld [vmem:[#allocation69_spill] sm:$0xff]  ;;  %v2412_v11 = vsel %vm2092_vm14, %v6994_v29, 0.0  ;;  %v2413_v0 = vsel %vm2093_vm1, %v7019_v56, 0.0 }
 0x3cf   : > { %1698 = vperm.xlu2 %5195, %v5278_v24   ;;  %v7105_v62 = vpop.permute.xlu1 %2278  ;;  %vm810_vm5 = vcmp.eq.s32.totalorder %v6507_v51, %v8363_v23  ;;  %v8369_v3 = vld [vmem:[#allocation49_spill] sm:$0xff]  ;;  %v4889_v23 = vld [vmem:[%s6721_s20 + $0x58] sm:$0xff] }
 0x3d0   : > { %v2473_v15 = vadd.f32 %v2409_v37, %v1833_v4  ;;  %v1194_v21 = vsel %vm810_vm5, %v8364_v22, 0.0  ;;  %vm812_vm12 = vcmp.eq.s32.totalorder %v6507_v51, %v8369_v3  ;;  %vm2094_vm5 = vcmp.eq.s32.totalorder %v6507_v51, %v7043_v25  ;;  %v5292_v3 = vld [vmem:[%s5803_s15 + $0x1e8] sm:$0xff] }
 0x3d1   : > { %v2773_v34 = vpop.f32.mrf.mxu0  ;;  %v1834_v1 = vadd.f32 %v1770_v42, %v1194_v21  ;;  %v8371_v21 = vld [vmem:[#allocation59_spill] sm:$0xff] }
 0x3d2   : > { %v7101_v49 = vpop.permute.xlu0 %1983  ;;  %vm1453_vm15 = vcmp.eq.s32.totalorder %v6507_v51, %v8371_v21 }
 0x3d4   : > { %4581 = vmatmul.msk.f32.gmra.mxu0 %vm2521_vm3, %v2471_v58  ;;  %v4888_v58 = vld [vmem:[%s6721_s20 + $0x50] sm:$0xff] }
 0x3d5   : > { %2338 = vperm.xlu1 %5194, %v5278_v24   ;;  %v2410_v24 = vsel %vm2090_vm6, %v6951_v55, 0.0  ;;  %4757 = vmatmul.msk.bf16.gmra.mxu1 %vm3191_vm13, %v4888_v58  ;;  %v7123_v54 = vpop.permute.xlu2 %1642  ;;  %v1771_v55 = vsel %vm1451_vm7, %v6968_v60, 0.0 }
 0x3d6   : > { %2034 = vperm.xlu0 %5193, %v5279_v2   ;;  %v2474_v17 = vadd.f32 %v2410_v24, %v1834_v1  ;;  %v8366_v2 = vld [vmem:[#allocation68_spill] sm:$0xff]  ;;  %v8372_v1 = vld [vmem:[#allocation75_spill] sm:$0xff] }
 0x3d7   : > { %1702 = vperm.xlu2 %5195, %v5280_v28   ;;  %vm811_vm8 = vcmp.eq.s32.totalorder %v6507_v51, %v8366_v2  ;;  %v7134_v46 = vpop.permute.xlu1 %2282  ;;  %vm813_vm0 = vcmp.eq.s32.totalorder %v6507_v51, %v8372_v1  ;;  %v5294_v1 = vld [vmem:[%s5803_s15 + $0x1f0] sm:$0xff] }
 0x3d9   : > { %v2776_v39 = vpop.f32.mrf.mxu0 }
 0x3da   : > { %v2930_v41 = vpack.c.bf16 %v2776_v39, %v2773_v34  ;;  %v7117_v34 = vpop.f32.mrf.mxu1  ;;  %v7128_v44 = vpop.permute.xlu0 %1986 }
 0x3dc   : > { %4582 = vmatmul.msk.f32.gmra.mxu0 %vm2521_vm3, %v2472_v52  ;;  %4794 = vmatmul.msk.bf16.gmra.mxu2 %vm3469_vm11, %v2930_v41 }
 0x3dd   : > { %2342 = vperm.xlu1 %5194, %v5280_v28   ;;  %v1195_v28 = vsel %vm811_vm8, %v8367_v6, 0.0  ;;  %v7156_v20 = vpop.permute.xlu2 %1646  ;;  %vm2095_vm8 = vcmp.eq.s32.totalorder %v6507_v51, %v7075_v26 }
 0x3de   : > { %2037 = vperm.xlu0 %5193, %v5281_v57   ;;  %v1835_v39 = vadd.f32 %v1771_v55, %v1195_v28  ;;  %v8370_v57 = vld [vmem:[#allocation150_spill] sm:$0xff]  ;;  %v5290_v55 = vld [vmem:[%s5803_s15 + $0x1e0] sm:$0xff] }
 0x3df   : > { %1706 = vperm.xlu2 %5195, %v5282_v43   ;;  %v1196_v30 = vsel %vm812_vm12, %v8370_v57, 0.0  ;;  %vm2096_vm12 = vcmp.eq.s32.totalorder %v6507_v51, %v7101_v49 }
 0x3e0   : > { %v2475_v41 = vadd.f32 %v2411_v63, %v1835_v39  ;;  %v1836_v4 = vadd.f32 %v1772_v10, %v1196_v30  ;;  %v2414_v10 = vsel %vm2094_vm5, %v7046_v59, 0.0 }
 0x3e1   : > { %v2779_v5 = vpop.f32.mrf.mxu0 }
 0x3e2   : > { %v7140_v18 = vpop.f32.mrf.mxu1  ;;  %v7161_v37 = vpop.permute.xlu0 %1989 }
 0x3e4   : > { %4583 = vmatmul.msk.f32.gmra.mxu0 %vm2521_vm3, %v2473_v15 }
 0x3e5   : > { %2346 = vperm.xlu1 %5194, %v5282_v43   ;;  %v5288_v43 = vld [vmem:[%s5803_s15 + $0x1d8] sm:$0xff]  ;;  %4758 = vmatmul.msk.bf16.gmra.mxu1 %vm3191_vm13, %v4889_v23 }
 0x3e6   : > { %2040 = vperm.xlu0 %5193, %v5283_v53   ;;  %v2476_v53 = vadd.f32 %v2412_v11, %v1836_v4 }
 0x3e7   : > { %1710 = vperm.xlu2 %5195, %v5284_v50  }
 0x3e9   : > { %v2782_v16 = vpop.f32.mrf.mxu0 }
 0x3ea   : > { %v2931_v45 = vpack.c.bf16 %v2782_v16, %v2779_v5  ;;  %v7164_v5 = vpop.permute.xlu1 %2286  ;;  %v7168_v36 = vpop.f32.mrf.mxu1  ;;  %v5289_v16 = vld [vmem:[%s5498_s27 + $0x1e8] sm:$0xff] }
 0x3eb   : > { %v7191_v8 = vpop.permute.xlu0 %1992 }
 0x3ec   : > { %4584 = vmatmul.msk.f32.gmra.mxu0 %vm2521_vm3, %v2474_v17  ;;  %4795 = vmatmul.msk.bf16.gmra.mxu2 %vm3469_vm11, %v2931_v45  ;;  %v8373_v17 = vld [vmem:[#allocation149_spill] sm:$0xff] }
 0x3ed   : > { %2350 = vperm.xlu1 %5194, %v5284_v50   ;;  %v1197_v45 = vsel %vm813_vm0, %v8373_v17, 0.0  ;;  %vm2097_vm0 = vcmp.eq.s32.totalorder %v6507_v51, %v7128_v44  ;;  %v8386_v44 = vld [vmem:[#allocation54_spill] sm:$0xff] }
 0x3ee   : > { %2043 = vperm.xlu0 %5193, %v5285_v48   ;;  %vm1458_vm1 = vcmp.eq.s32.totalorder %v6507_v51, %v8386_v44 }
 0x3ef   : > { %1714 = vperm.xlu2 %5195, %v5286_v7   ;;  %v3575_v60 = vpop.f32.mrf.mxu2 }
 0x3f0   : > { %v3576_v14 = vadd.f32 %v3575_v60, %v7025_v32  ;;  %v5287_v32 = vld [vmem:[%s5498_s27 + $0x1e0] sm:$0xff]  ;;  %v8374_v60 = vld [vmem:[#allocation58_spill] sm:$0xff] }
 0x3f1   : > { %v2785_v52 = vpop.f32.mrf.mxu0  ;;  %vm1454_vm2 = vcmp.eq.s32.totalorder %v6507_v51, %v8374_v60 }
 0x3f2   : > { %v3739_v15 = vadd.f32 %v7148_v61, %v3576_v14  ;;  %v7189_v6 = vpop.f32.mrf.mxu1  ;;  %v1774_v39 = vsel %vm1454_vm2, %v7038_v19, 0.0 }
 0x3f3   : > { %v7216_v59 = vpop.permute.xlu0 %1995 }
 0x3f4   : > { %4585 = vmatmul.msk.f32.gmra.mxu0 %vm2521_vm3, %v2475_v41  ;;  %v3803_v24 = vmax.f32 %v3739_v15, 0.0  ;;  %v5291_v41 = vld [vmem:[%s5498_s27 + $0x1f0] sm:$0xff] }
 0x3f5   : > { %2354 = vperm.xlu1 %5194, %v5286_v7   ;;  %v7193_v7 = vpop.permute.xlu1 %2290 }
 0x3f6   : > { %2046 = vperm.xlu0 %5193, %v5287_v32  }
 0x3f7   : > { %1718 = vperm.xlu2 %5195, %v5288_v43   ;;  %v3577_v27 = vpop.f32.mrf.mxu2 }
 0x3f8   : > { %v3578_v40 = vadd.f32 %v3577_v27, %v7048_v31  ;;  %v1773_v31 = vsel %vm1453_vm15, %v7011_v38, 0.0  ;;  %v7186_v38 = vpop.permute.xlu2 %1650 }
 0x3f9   : > { %v2788_v42 = vpop.f32.mrf.mxu0  ;;  %v1837_v48 = vadd.f32 %v1773_v31, %v1197_v45  ;;  %v2415_v31 = vsel %vm2095_vm8, %v7078_v9, 0.0 }
 0x3fa   : > { %v3740_v29 = vadd.f32 %v7148_v61, %v3578_v40  ;;  %v2932_v22 = vpack.c.bf16 %v2788_v42, %v2785_v52  ;;  %v8375_v52 = vld [vmem:[#allocation74_spill] sm:$0xff]  ;;  %v7210_v30 = vpop.f32.mrf.mxu1  ;;  %v8377_v40 = vld [vmem:[#allocation48_spill] sm:$0xff] }
 0x3fb   : > { %v2477_v63 = vadd.f32 %v2413_v0, %v1837_v48  ;;  %vm814_vm4 = vcmp.eq.s32.totalorder %v6507_v51, %v8375_v52  ;;  %vm1455_vm6 = vcmp.eq.s32.totalorder %v6507_v51, %v8377_v40  ;;  %v8380_v0 = vld [vmem:[#allocation65_spill] sm:$0xff] }
 0x3fc   : > { %v3804_v50 = vmax.f32 %v3740_v29, 0.0  ;;  %4586 = vmatmul.msk.f32.gmra.mxu0 %vm2521_vm3, %v2476_v53  ;;  %4796 = vmatmul.msk.bf16.gmra.mxu2 %vm3469_vm11, %v2932_v22  ;;  %v1198_v14 = vsel %vm814_vm4, %v8376_v35, 0.0  ;;  %v1775_v53 = vsel %vm1455_vm6, %v7068_v12, 0.0  ;;  %v8378_v29 = vld [vmem:[#allocation55_spill] sm:$0xff]  ;;  %v5293_v22 = vld [vmem:[%s5498_s27 + $0x1f8] sm:$0xff]  ;;  %vm1456_vm9 = vcmp.eq.s32.totalorder %v6507_v51, %v8380_v0  ;;  %v8381_v48 = vld [vmem:[#allocation81_spill] sm:$0xff] }
 0x3fd   : > { %2358 = vperm.xlu1 %5194, %v5288_v43   ;;  %v1838_v32 = vadd.f32 %v1774_v39, %v1198_v14  ;;  %v4890_v43 = vld [vmem:[%s6721_s20 + $0x60] sm:$0xff]  ;;  %vm815_vm7 = vcmp.eq.s32.totalorder %v6507_v51, %v8378_v29  ;;  %v1776_v9 = vsel %vm1456_vm9, %v7099_v33, 0.0  ;;  %vm816_vm10 = vcmp.eq.s32.totalorder %v6507_v51, %v8381_v48 }
 0x3fe   : > { %2049 = vperm.xlu0 %5193, %v5289_v16   ;;  %v3867_v58 = vpack.c.bf16 %v3804_v50, %v3803_v24  ;;  %4759 = vmatmul.msk.bf16.gmra.mxu1 %vm3191_vm13, %v4890_v43  ;;  %v8379_v24 = vld [vmem:[#allocation153_spill] sm:$0xff]  ;;  %vm2098_vm4 = vcmp.eq.s32.totalorder %v6507_v51, %v7161_v37 }
 0x3ff   : > { %1722 = vperm.xlu2 %5195, %v5290_v55   ;;  %v3580_v2 = vpop.f32.mrf.mxu2  ;;  %v2478_v27 = vadd.f32 %v2414_v10, %v1838_v32  ;;  %v1199_v50 = vsel %vm815_vm7, %v8379_v24, 0.0  ;;  %v4891_v10 = vld [vmem:[%s6721_s20 + $0x68] sm:$0xff]  ;;  %v8383_v32 = vld [vmem:[#allocation64_spill] sm:$0xff]  ;;  %v8387_v24 = vld [vmem:[#allocation61_spill] sm:$0xff]  ;;  %vm2099_vm7 = vcmp.eq.s32.totalorder %v6507_v51, %v7191_v8 }
 0x400   : > { %4835 = vmatmul.msk.bf16.vlgmr.msra.gmra.mxu3 %vm2521_vm3, %v3867_v58  ;;  %v3581_v56 = vadd.f32 %v3580_v2, %v7070_v13  ;;  %v7213_v25 = vpop.permute.xlu2 %1654  ;;  %v1839_v58 = vadd.f32 %v1775_v53, %v1199_v50  ;;  %v7244_v2 = vpop.permute.xlu0 %1998  ;;  %vm1457_vm14 = vcmp.eq.s32.totalorder %v6507_v51, %v8383_v32  ;;  %vm818_vm2 = vcmp.eq.s32.totalorder %v6507_v51, %v8387_v24  ;;  %v8388_v50 = vld [vmem:[#allocation156_spill] sm:$0xff] }
 0x401   : > { %v2791_v28 = vpop.f32.mrf.mxu0 }
 0x402   : > { %v3741_v19 = vadd.f32 %v7148_v61, %v3581_v56  ;;  %v7235_v12 = vpop.f32.mrf.mxu1  ;;  %v2479_v45 = vadd.f32 %v2415_v31, %v1839_v58  ;;  %v5295_v56 = vld [vmem:[%s5803_s15 + $0x1f8] sm:$0xff]  ;;  %v1202_v31 = vsel %vm818_vm2, %v8388_v50, 0.0  ;;  %s4406_s15 = scalar_lea.hbm %s7931_s9, %s4915_s25 }
 0x403   : > { %s4409_s18 = sshll.u32 %s4406_s15, 4  ;;  %s4410_s18 = int_to_ptr.hbm [resolvable:$true] %s4409_s18 }
 0x404   : > { %4587 = vmatmul.msk.f32.gmra.mxu0 %vm2521_vm3, %v2477_v63  ;;  %v3805_v42 = vmax.f32 %v3741_v19, 0.0  ;;  %v8382_v63 = vld [vmem:[#allocation152_spill] sm:$0xff]  ;;  %s5312_s24 = sshra.s32 %s4410_s18, 4  ;;  %s5313_s24 = int_to_ptr.hbm [resolvable:$true] %s5312_s24 }
 0x405   : > { %2362 = vperm.xlu1 %5194, %v5290_v55   ;;  %v1200_v60 = vsel %vm816_vm10, %v8382_v63, 0.0  ;;  %vm2100_vm10 = vcmp.eq.s32.totalorder %v6507_v51, %v7216_v59  ;;  %v8395_v59 = vld [vmem:[#allocation60_spill] sm:$0xff]  ;;  %p5319_p1 = scmp.lt.s32.totalorder %s5313_s24, %s7931_s9 }
 0x406   : > { %2052 = vperm.xlu0 %5193, %v5291_v41   ;;  %v1840_v33 = vadd.f32 %v1776_v9, %v1200_v60  ;;  %v4892_v9 = vld [vmem:[%s6721_s20 + $0x70] sm:$0xff] }
 0x407   : > { %1726 = vperm.xlu2 %5195, %v5292_v3   ;;  %v3582_v13 = vpop.f32.mrf.mxu2  ;;  %v8389_v60 = vld [vmem:[#allocation71_spill] sm:$0xff] }
 0x408   : > { %v3583_v57 = vadd.f32 %v3582_v13, %v7097_v47  ;;  %v7221_v47 = vpop.permute.xlu1 %2294  ;;  %v7239_v26 = vpop.permute.xlu2 %1658  ;;  %vm1459_vm5 = vcmp.eq.s32.totalorder %v6507_v51, %v8389_v60  ;;  %v8398_v60 = vld [vmem:[#allocation77_spill] sm:$0xff] }
 0x409   : > { %v2794_v11 = vpop.f32.mrf.mxu0  ;;  %v7275_v40 = vpop.permute.xlu0 %2001 }
 0x40a   : > { %v3742_v4 = vadd.f32 %v7148_v61, %v3583_v57  ;;  %v2933_v15 = vpack.c.bf16 %v2794_v11, %v2791_v28  ;;  %v7257_v35 = vpop.f32.mrf.mxu1  ;;  %v8384_v57 = vld [vmem:[#allocation80_spill] sm:$0xff]  ;;  %vm2102_vm2 = vcmp.eq.s32.totalorder %v6507_v51, %v7275_v40  ;;  %v4894_v40 = vld [vmem:[%s6721_s20 + $0x80] sm:$0xff] }
 0x40b   : > { %vm817_vm15 = vcmp.eq.s32.totalorder %v6507_v51, %v8384_v57  ;;  %v8393_v57 = vld [vmem:[#allocation86_spill] sm:$0xff] }
 0x40c   : > { %v3806_v23 = vmax.f32 %v3742_v4, 0.0  ;;  %4588 = vmatmul.msk.f32.gmra.mxu0 %vm2521_vm3, %v2478_v27  ;;  %4797 = vmatmul.msk.bf16.gmra.mxu2 %vm3469_vm11, %v2933_v15  ;;  %v8385_v27 = vld [vmem:[#allocation142_spill] sm:$0xff]  ;;  %v2417_v15 = vsel %vm2097_vm0, %v7134_v46, 0.0  ;;  %v1778_v46 = vsel %vm1458_vm1, %v7156_v20, 0.0  ;;  %vm820_vm9 = vcmp.eq.s32.totalorder %v6507_v51, %v8393_v57 }
 0x40d   : > { %2366 = vperm.xlu1 %5194, %v5292_v3   ;;  %v1201_v4 = vsel %vm817_vm15, %v8385_v27, 0.0  ;;  %v1842_v58 = vadd.f32 %v1778_v46, %v1202_v31  ;;  %vm2101_vm15 = vcmp.eq.s32.totalorder %v6507_v51, %v7244_v2  ;;  %vm1462_vm0 = vcmp.eq.s32.totalorder %v6507_v51, %v8398_v60 }
 0x40e   : > { %2055 = vperm.xlu0 %5193, %v5293_v22   ;;  %v3868_v21 = vpack.c.bf16 %v3806_v23, %v3805_v42  ;;  %4760 = vmatmul.msk.bf16.gmra.mxu1 %vm3191_vm13, %v4891_v10 }
 0x40f   : > { %1730 = vperm.xlu2 %5195, %v5294_v1   ;;  %v3585_v16 = vpop.f32.mrf.mxu2 }
 0x410   : > { %4836 = vmatmul.msk.bf16.gmra.mxu3 %vm2521_vm3, %v3868_v21  ;;  %v3586_v55 = vadd.f32 %v3585_v16, %v7117_v34  ;;  %v7250_v28 = vpop.permute.xlu1 %2298  ;;  %v2416_v34 = vsel %vm2096_vm12, %v7105_v62, 0.0  ;;  %v7271_v11 = vpop.permute.xlu2 %1662  ;;  %vm1461_vm12 = vcmp.eq.s32.totalorder %v6507_v51, %v8395_v59 }
 0x411   : > { %v2797_v17 = vpop.f32.mrf.mxu0  ;;  %v2480_v3 = vadd.f32 %v2416_v34, %v1840_v33  ;;  %v7299_v20 = vpop.permute.xlu0 %2004 }
 0x412   : > { %v3743_v52 = vadd.f32 %v7148_v61, %v3586_v55 }
 0x414   : > { %4589 = vmatmul.msk.f32.gmra.mxu0 %vm2521_vm3, %v2479_v45  ;;  %v3807_v62 = vmax.f32 %v3743_v52, 0.0  ;;  %v8391_v52 = vld [vmem:[#allocation155_spill] sm:$0xff] }
 0x415   : > { %2370 = vperm.xlu1 %5194, %v5294_v1   ;;  %v2418_v1 = vsel %vm2098_vm4, %v7164_v5, 0.0 }
 0x416   : > { %v2482_v48 = vadd.f32 %v2418_v1, %v1842_v58  ;;  %v8396_v1 = vld [vmem:[#allocation67_spill] sm:$0xff] }
 0x417   : > { %1734 = vperm.xlu2 %5195, %v5295_v56   ;;  %v3587_v39 = vpop.f32.mrf.mxu2 }
 0x418   : > { %v3588_v41 = vadd.f32 %v3587_v39, %v7140_v18  ;;  %v1777_v18 = vsel %vm1457_vm14, %v7123_v54, 0.0  ;;  %v7277_v53 = vpop.permute.xlu1 %2302  ;;  %v7280_v54 = vpop.f32.mrf.mxu1  ;;  %v8390_v39 = vld [vmem:[#allocation87_spill] sm:$0xff]  ;;  %vm821_vm14 = vcmp.eq.s32.totalorder %v6507_v51, %v8396_v1 }
 0x419   : > { %v2800_v14 = vpop.f32.mrf.mxu0  ;;  %v1841_v23 = vadd.f32 %v1777_v18, %v1201_v4  ;;  %vm819_vm6 = vcmp.eq.s32.totalorder %v6507_v51, %v8390_v39  ;;  %v2420_v4 = vsel %vm2100_vm10, %v7221_v47, 0.0 }
 0x41a   : > { %v3744_v49 = vadd.f32 %v7148_v61, %v3588_v41  ;;  %v2934_v13 = vpack.c.bf16 %v2800_v14, %v2797_v17  ;;  %v7293_v17 = vpop.permute.xlu2 %1666  ;;  %v1203_v41 = vsel %vm819_vm6, %v8391_v52, 0.0  ;;  %v2419_v14 = vsel %vm2099_vm7, %v7193_v7, 0.0 }
 0x41b   : > { %v2481_v22 = vadd.f32 %v2417_v15, %v1841_v23  ;;  %vm2103_vm6 = vcmp.eq.s32.totalorder %v6507_v51, %v7299_v20  ;;  %v8404_v20 = vld [vmem:[#allocation66_spill] sm:$0xff] }
 0x41c   : > { %v3808_v19 = vmax.f32 %v3744_v49, 0.0  ;;  %4590 = vmatmul.msk.f32.gmra.mxu0 %vm2521_vm3, %v2480_v3  ;;  %4798 = vmatmul.msk.bf16.gmra.mxu2 %vm3469_vm11, %v2934_v13  ;;  %vm1464_vm7 = vcmp.eq.s32.totalorder %v6507_v51, %v8404_v20 }
 0x41d   : > { %2374 = vperm.xlu1 %5194, %v5295_v56  }
 0x41e   : > { %v3869_v43 = vpack.c.bf16 %v3808_v19, %v3807_v62  ;;  %4761 = vmatmul.msk.bf16.gmra.mxu1 %vm3191_vm13, %v4892_v9  ;;  %v7322_v62 = vpop.permute.xlu0 %2007  ;;  %v8392_v19 = vld [vmem:[#allocation70_spill] sm:$0xff] }
 0x41f   : > { %v3590_v42 = vpop.f32.mrf.mxu2  ;;  %vm1460_vm8 = vcmp.eq.s32.totalorder %v6507_v51, %v8392_v19 }
 0x420   : > { %4837 = vmatmul.msk.bf16.gmra.mxu3 %vm2521_vm3, %v3869_v43  ;;  %v3591_v21 = vadd.f32 %v3590_v42, %v7168_v36  ;;  %v7297_v0 = vpop.f32.mrf.mxu1  ;;  %v7302_v37 = vpop.permute.xlu1 %2306  ;;  %v1780_v18 = vsel %vm1460_vm8, %v7213_v25, 0.0  ;;  %v8394_v43 = vld [vmem:[#allocation145_spill] sm:$0xff]  ;;  %v4893_v25 = vld [vmem:[%s6721_s20 + $0x78] sm:$0xff] }
 0x421   : > { %v2803_v29 = vpop.f32.mrf.mxu0  ;;  %v1204_v27 = vsel %vm820_vm9, %v8394_v43, 0.0  ;;  %v8402_v43 = vld [vmem:[#allocation92_spill] sm:$0xff]  ;;  %vm2104_vm9 = vcmp.eq.s32.totalorder %v6507_v51, %v7322_v62 }
 0x422   : > { %v3745_v36 = vadd.f32 %v7148_v61, %v3591_v21  ;;  %v1844_v42 = vadd.f32 %v1780_v18, %v1204_v27 }
 0x424   : > { %4591 = vmatmul.msk.f32.gmra.mxu0 %vm2521_vm3, %v2481_v22  ;;  %v3809_v34 = vmax.f32 %v3745_v36, 0.0  ;;  %v2484_v44 = vadd.f32 %v2420_v4, %v1844_v42  ;;  %v8397_v36 = vld [vmem:[#allocation159_spill] sm:$0xff]  ;;  %v8403_v4 = vld [vmem:[#allocation148_spill] sm:$0xff]  ;;  %v2423_v42 = vsel %vm2103_vm6, %v7302_v37, 0.0 }
 0x426   : > { %v7351_v31 = vpop.permute.xlu0 %2010 }
 0x427   : > { %v3592_v16 = vpop.f32.mrf.mxu2 }
 0x428   : > { %v3593_v45 = vadd.f32 %v3592_v16, %v7189_v6  ;;  %v1779_v6 = vsel %vm1459_vm5, %v7186_v38, 0.0  ;;  %v7318_v49 = vpop.f32.mrf.mxu1  ;;  %v7320_v38 = vpop.permute.xlu2 %1670  ;;  %vm823_vm5 = vcmp.eq.s32.totalorder %v6507_v51, %v8402_v43 }
 0x429   : > { %v2806_v55 = vpop.f32.mrf.mxu0  ;;  %v1843_v3 = vadd.f32 %v1779_v6, %v1203_v41  ;;  %v7326_v8 = vpop.permute.xlu1 %2310  ;;  %v8400_v6 = vld [vmem:[#allocation158_spill] sm:$0xff]  ;;  %v1784_v59 = vsel %vm1464_vm7, %v7320_v38, 0.0 }
 0x42a   : > { %v3746_v63 = vadd.f32 %v7148_v61, %v3593_v45  ;;  %v2935_v5 = vpack.c.bf16 %v2806_v55, %v2803_v29  ;;  %v1205_v45 = vsel %vm821_vm14, %v8397_v36, 0.0  ;;  %v2421_v55 = vsel %vm2101_vm15, %v7250_v28, 0.0  ;;  %v4895_v38 = vld [vmem:[%s6721_s20 + $0x88] sm:$0xff] }
 0x42b   : > { %v2483_v32 = vadd.f32 %v2419_v14, %v1843_v3  ;;  %v2424_v1 = vsel %vm2104_vm9, %v7326_v8, 0.0  ;;  %v8407_v8 = vld [vmem:[#allocation83_spill] sm:$0xff]  ;;  %vm2105_vm14 = vcmp.eq.s32.totalorder %v6507_v51, %v7351_v31 }
 0x42c   : > { %v3810_v56 = vmax.f32 %v3746_v63, 0.0  ;;  %4592 = vmatmul.msk.f32.gmra.mxu0 %vm2521_vm3, %v2482_v48  ;;  %4799 = vmatmul.msk.bf16.gmra.mxu2 %vm3469_vm11, %v2935_v5  ;;  %vm1465_vm10 = vcmp.eq.s32.totalorder %v6507_v51, %v8407_v8 }
 0x42e   : > { %v3870_v33 = vpack.c.bf16 %v3810_v56, %v3809_v34  ;;  %4762 = vmatmul.msk.bf16.gmra.mxu1 %vm3191_vm13, %v4893_v25  ;;  %v1782_v34 = vsel %vm1462_vm0, %v7271_v11, 0.0  ;;  %v8399_v56 = vld [vmem:[#allocation93_spill] sm:$0xff]  ;;  %v7377_v52 = vpop.permute.xlu0 %2013 }
 0x42f   : > { %v3595_v10 = vpop.f32.mrf.mxu2  ;;  %vm822_vm1 = vcmp.eq.s32.totalorder %v6507_v51, %v8399_v56 }
 0x430   : > { %4838 = vmatmul.msk.bf16.gmra.mxu3 %vm2521_vm3, %v3870_v33  ;;  %v3596_v7 = vadd.f32 %v3595_v10, %v7210_v30  ;;  %v7339_v29 = vpop.f32.mrf.mxu1  ;;  %v7346_v47 = vpop.permute.xlu2 %1674  ;;  %v1206_v39 = vsel %vm822_vm1, %v8400_v6, 0.0  ;;  %v2422_v33 = vsel %vm2102_vm2, %v7277_v53, 0.0  ;;  %v8401_v53 = vld [vmem:[#allocation76_spill] sm:$0xff]  ;;  %v8408_v6 = vld [vmem:[#allocation99_spill] sm:$0xff]  ;;  %vm2106_vm1 = vcmp.eq.s32.totalorder %v6507_v51, %v7377_v52 }
 0x431   : > { %v2809_v13 = vpop.f32.mrf.mxu0  ;;  %v7357_v16 = vpop.permute.xlu1 %2314  ;;  %v1846_v41 = vadd.f32 %v1782_v34, %v1206_v39  ;;  %vm1463_vm4 = vcmp.eq.s32.totalorder %v6507_v51, %v8401_v53  ;;  %v1785_v56 = vsel %vm1465_vm10, %v7346_v47, 0.0  ;;  %v8410_v47 = vld [vmem:[#allocation82_spill] sm:$0xff] }
 0x432   : > { %v3747_v23 = vadd.f32 %v7148_v61, %v3596_v7  ;;  %vm1466_vm15 = vcmp.eq.s32.totalorder %v6507_v51, %v8410_v47  ;;  %v8411_v53 = vld [vmem:[#allocation98_spill] sm:$0xff] }
 0x433   : > { %vm826_vm0 = vcmp.eq.s32.totalorder %v6507_v51, %v8411_v53  ;;  %v8421_v53 = vld [vmem:[#allocation154_spill] sm:$0xff] }
 0x434   : > { %4593 = vmatmul.msk.f32.gmra.mxu0 %vm2521_vm3, %v2483_v32  ;;  %v3811_v24 = vmax.f32 %v3747_v23, 0.0  ;;  %v2486_v32 = vadd.f32 %v2422_v33, %v1846_v41  ;;  %v8409_v33 = vld [vmem:[#allocation161_spill] sm:$0xff]  ;;  %v2425_v41 = vsel %vm2105_vm14, %v7357_v16, 0.0 }
 0x437   : > { %v3597_v15 = vpop.f32.mrf.mxu2 }
 0x438   : > { %v3598_v30 = vadd.f32 %v3597_v15, %v7235_v12  ;;  %v1781_v12 = vsel %vm1461_vm12, %v7239_v26, 0.0  ;;  %v7362_v26 = vpop.f32.mrf.mxu1  ;;  %v7373_v28 = vpop.permute.xlu2 %1678  ;;  %v1207_v15 = vsel %vm823_vm5, %v8403_v4, 0.0  ;;  %vm825_vm12 = vcmp.eq.s32.totalorder %v6507_v51, %v8408_v6 }
 0x439   : > { %v2812_v22 = vpop.f32.mrf.mxu0  ;;  %v1845_v48 = vadd.f32 %v1781_v12, %v1205_v45  ;;  %v7379_v14 = vpop.permute.xlu1 %2318  ;;  %v1786_v16 = vsel %vm1466_vm15, %v7373_v28, 0.0 }
 0x43a   : > { %v3748_v21 = vadd.f32 %v7148_v61, %v3598_v30  ;;  %v2936_v46 = vpack.c.bf16 %v2812_v22, %v2809_v13  ;;  %v2426_v43 = vsel %vm2106_vm1, %v7379_v14, 0.0 }
 0x43b   : > { %v2485_v5 = vadd.f32 %v2421_v55, %v1845_v48 }
 0x43c   : > { %v3812_v50 = vmax.f32 %v3748_v21, 0.0  ;;  %4594 = vmatmul.msk.f32.gmra.mxu0 %vm2521_vm3, %v2484_v44  ;;  %4800 = vmatmul.msk.bf16.gmra.mxu2 %vm3469_vm11, %v2936_v46 }
 0x43e   : > { %v3871_v58 = vpack.c.bf16 %v3812_v50, %v3811_v24  ;;  %4763 = vmatmul.msk.bf16.gmra.mxu1 %vm3191_vm13, %v4894_v40  ;;  %v8405_v24 = vld [vmem:[#allocation73_spill] sm:$0xff]  ;;  %v8406_v50 = vld [vmem:[#allocation162_spill] sm:$0xff] }
 0x43f   : > { %v3600_v9 = vpop.f32.mrf.mxu2  ;;  %vm824_vm8 = vcmp.eq.s32.totalorder %v6507_v51, %v8405_v24 }
 0x440   : > { %4839 = vmatmul.msk.bf16.gmra.mxu3 %vm2521_vm3, %v3871_v58  ;;  %v3601_v2 = vadd.f32 %v3600_v9, %v7257_v35  ;;  %v7383_v3 = vpop.f32.mrf.mxu1  ;;  %v7399_v22 = vpop.permute.xlu2 %1682  ;;  %v1208_v12 = vsel %vm824_vm8, %v8406_v50, 0.0  ;;  %v8415_v50 = vld [vmem:[#allocation165_spill] sm:$0xff] }
 0x441   : > { %v2815_v63 = vpop.f32.mrf.mxu0  ;;  %v7406_v46 = vpop.permute.xlu1 %2322  ;;  %v1848_v36 = vadd.f32 %v1784_v59, %v1208_v12 }
 0x442   : > { %v3749_v11 = vadd.f32 %v7148_v61, %v3601_v2 }
 0x443   : > { %v2488_v48 = vadd.f32 %v2424_v1, %v1848_v36 }
 0x444   : > { %4595 = vmatmul.msk.f32.gmra.mxu0 %vm2521_vm3, %v2485_v5  ;;  %v3813_v18 = vmax.f32 %v3749_v11, 0.0 }
 0x447   : > { %v3602_v35 = vpop.f32.mrf.mxu2 }
 0x448   : > { %v3603_v10 = vadd.f32 %v3602_v35, %v7280_v54  ;;  %v1783_v54 = vsel %vm1463_vm4, %v7293_v17, 0.0  ;;  %v7402_v25 = vpop.f32.mrf.mxu1  ;;  %v7404_v17 = vpop.permute.xlu0 %2016  ;;  %v1209_v35 = vsel %vm825_vm12, %v8409_v33, 0.0 }
 0x449   : > { %v2818_v13 = vpop.f32.mrf.mxu0  ;;  %v1847_v30 = vadd.f32 %v1783_v54, %v1207_v15  ;;  %v7432_v2 = vpop.permute.xlu1 %2326  ;;  %vm2107_vm5 = vcmp.eq.s32.totalorder %v6507_v51, %v7404_v17 }
 0x44a   : > { %v3750_v19 = vadd.f32 %v7148_v61, %v3603_v10  ;;  %v2937_v7 = vpack.c.bf16 %v2818_v13, %v2815_v63  ;;  %v7424_v63 = vpop.permute.xlu2 %1686  ;;  %v1849_v10 = vadd.f32 %v1785_v56, %v1209_v35  ;;  %v2427_v1 = vsel %vm2107_vm5, %v7406_v46, 0.0 }
 0x44b   : > { %v2487_v21 = vadd.f32 %v2423_v42, %v1847_v30 }
 0x44c   : > { %v3814_v57 = vmax.f32 %v3750_v19, 0.0  ;;  %4596 = vmatmul.msk.f32.gmra.mxu0 %vm2521_vm3, %v2486_v32  ;;  %4801 = vmatmul.msk.bf16.gmra.mxu2 %vm3469_vm11, %v2937_v7  ;;  %v2489_v32 = vadd.f32 %v2425_v41, %v1849_v10  ;;  %v4897_v41 = vld [vmem:[%s6721_s20 + $0x98] sm:$0xff] }
 0x44e   : > { %v3872_v27 = vpack.c.bf16 %v3814_v57, %v3813_v18  ;;  %4764 = vmatmul.msk.bf16.gmra.mxu1 %vm3191_vm13, %v4895_v38  ;;  %v8412_v57 = vld [vmem:[#allocation151_spill] sm:$0xff] }
 0x44f   : > { %v3605_v23 = vpop.f32.mrf.mxu2  ;;  %v1210_v54 = vsel %vm826_vm0, %v8412_v57, 0.0 }
 0x450   : > { %4840 = vmatmul.msk.bf16.gmra.mxu3 %vm2521_vm3, %v3872_v27  ;;  %v3606_v37 = vadd.f32 %v3605_v23, %v7297_v0  ;;  %v7421_v55 = vpop.f32.mrf.mxu1  ;;  %v7427_v60 = vpop.permute.xlu0 %2019  ;;  %v4896_v23 = vld [vmem:[%s6721_s20 + $0x90] sm:$0xff] }
 0x451   : > { %v2821_v44 = vpop.f32.mrf.mxu0  ;;  %v7459_v18 = vpop.permute.xlu1 %2330  ;;  %vm2108_vm8 = vcmp.eq.s32.totalorder %v6507_v51, %v7427_v60 }
 0x452   : > { %v3751_v45 = vadd.f32 %v7148_v61, %v3606_v37  ;;  %v7448_v19 = vpop.permute.xlu2 %1690  ;;  %v8414_v37 = vld [vmem:[#allocation79_spill] sm:$0xff] }
 0x453   : > { %vm827_vm4 = vcmp.eq.s32.totalorder %v6507_v51, %v8414_v37 }
 0x454   : > { %4597 = vmatmul.msk.f32.gmra.mxu0 %vm2521_vm3, %v2487_v21  ;;  %v8413_v21 = vld [vmem:[#allocation72_spill] sm:$0xff]  ;;  %v1211_v12 = vsel %vm827_vm4, %v8415_v50, 0.0 }
 0x455   : > { %vm1467_vm2 = vcmp.eq.s32.totalorder %v6507_v51, %v8413_v21  ;;  %v7534_v21 = vld [vmem:[%s7930_s8] ss:$0 sm:$0xff] }
 0x457   : > { %v3607_v58 = vpop.f32.mrf.mxu2 }
 0x458   : > { %v3608_v0 = vadd.f32 %v3607_v58, %v7318_v49  ;;  %v3815_v49 = vmax.f32 %v3751_v45, 0.0  ;;  %v7444_v13 = vpop.f32.mrf.mxu1  ;;  %v7453_v7 = vpop.permute.xlu0 %2022 }
 0x459   : > { %v2824_v9 = vpop.f32.mrf.mxu0  ;;  %vm2109_vm12 = vcmp.eq.s32.totalorder %v6507_v51, %v7453_v7 }
 0x45a   : > { %v3752_v5 = vadd.f32 %v7148_v61, %v3608_v0  ;;  %v2938_v62 = vpack.c.bf16 %v2824_v9, %v2821_v44  ;;  %v1695_v59 = vpop.permute.xlu2 %1694  ;;  %v2335_v0 = vpop.permute.xlu1 %2334 }
 0x45c   : > { %v3816_v34 = vmax.f32 %v3752_v5, 0.0  ;;  %4598 = vmatmul.msk.f32.gmra.mxu0 %vm2521_vm3, %v2488_v48  ;;  %4802 = vmatmul.msk.bf16.gmra.mxu2 %vm3469_vm11, %v2938_v62  ;;  %v8416_v48 = vld [vmem:[#allocation89_spill] sm:$0xff]  ;;  %v8417_v5 = vld [vmem:[#allocation104_spill] sm:$0xff] }
 0x45d   : > { %vm1468_vm6 = vcmp.eq.s32.totalorder %v6507_v51, %v8416_v48  ;;  %vm828_vm7 = vcmp.eq.s32.totalorder %v6507_v51, %v8417_v5  ;;  %v8418_v62 = vld [vmem:[#allocation164_spill] sm:$0xff]  ;;  %v8426_v5 = vld [vmem:[#allocation107_spill] sm:$0xff] }
 0x45e   : > { %v3873_v39 = vpack.c.bf16 %v3816_v34, %v3815_v49  ;;  %4765 = vmatmul.msk.bf16.gmra.mxu1 %vm3191_vm13, %v4896_v23  ;;  %v1788_v46 = vsel %vm1468_vm6, %v7424_v63, 0.0  ;;  %v1212_v8 = vsel %vm828_vm7, %v8418_v62, 0.0  ;;  %v2428_v49 = vsel %vm2108_vm8, %v7432_v2, 0.0 }
 0x45f   : > { %v3610_v11 = vpop.f32.mrf.mxu2  ;;  %v1852_v56 = vadd.f32 %v1788_v46, %v1212_v8 }
 0x460   : > { %4841 = vmatmul.msk.bf16.gmra.mxu3 %vm2521_vm3, %v3873_v39  ;;  %v3611_v31 = vadd.f32 %v3610_v11, %v7339_v29  ;;  %v1850_v29 = vadd.f32 %v1786_v16, %v1210_v54  ;;  %v7465_v15 = vpop.f32.mrf.mxu1  ;;  %v2026_v58 = vpop.permute.xlu0 %2025  ;;  %v2429_v54 = vsel %vm2109_vm12, %v7459_v18, 0.0 }
 0x461   : > { %v2827_v40 = vpop.f32.mrf.mxu0  ;;  %v2492_v11 = vadd.f32 %v2428_v49, %v1852_v56  ;;  %vm2110_vm0 = vcmp.eq.s32.totalorder %v6507_v51, %v2026_v58 }
 0x462   : > { %v3753_v4 = vadd.f32 %v7148_v61, %v3611_v31  ;;  %v2490_v30 = vadd.f32 %v2426_v43, %v1850_v29  ;;  %v7495_v6 = vpop.permute.xlu2 %1698  ;;  %v7504_v60 = vpop.permute.xlu1 %2338  ;;  %v8420_v31 = vld [vmem:[#allocation103_spill] sm:$0xff] }
 0x463   : > { %vm829_vm10 = vcmp.eq.s32.totalorder %v6507_v51, %v8420_v31  ;;  %v8429_v31 = vld [vmem:[#allocation106_spill] sm:$0xff] }
 0x464   : > { %4599 = vmatmul.msk.f32.gmra.mxu0 %vm2521_vm3, %v2489_v32  ;;  %v3817_v14 = vmax.f32 %v3753_v4, 0.0  ;;  %v1213_v57 = vsel %vm829_vm10, %v8421_v53, 0.0  ;;  %vm832_vm6 = vcmp.eq.s32.totalorder %v6507_v51, %v8429_v31  ;;  %v8430_v53 = vld [vmem:[#allocation157_spill] sm:$0xff] }
 0x467   : > { %v3612_v27 = vpop.f32.mrf.mxu2 }
 0x468   : > { %v3613_v28 = vadd.f32 %v3612_v27, %v7362_v26  ;;  %v1787_v26 = vsel %vm1467_vm2, %v7399_v22, 0.0  ;;  %v7482_v9 = vpop.f32.mrf.mxu1  ;;  %v7501_v63 = vpop.permute.xlu0 %2028  ;;  %vm831_vm2 = vcmp.eq.s32.totalorder %v6507_v51, %v8426_v5 }
 0x469   : > { %v2830_v42 = vpop.f32.mrf.mxu0  ;;  %v1851_v45 = vadd.f32 %v1787_v26, %v1211_v12  ;;  %v2430_v26 = vsel %vm2110_vm0, %v2335_v0, 0.0  ;;  %v8425_v0 = vld [vmem:[#allocation95_spill] sm:$0xff]  ;;  %vm2111_vm4 = vcmp.eq.s32.totalorder %v6507_v51, %v7501_v63 }
 0x46a   : > { %v3754_v44 = vadd.f32 %v7148_v61, %v3613_v28  ;;  %v2939_v52 = vpack.c.bf16 %v2830_v42, %v2827_v40  ;;  %v8419_v40 = vld [vmem:[#allocation88_spill] sm:$0xff]  ;;  %v1703_v28 = vpop.permute.xlu2 %1702  ;;  %v2343_v7 = vpop.permute.xlu1 %2342  ;;  %vm1471_vm1 = vcmp.eq.s32.totalorder %v6507_v51, %v8425_v0 }
 0x46b   : > { %v2491_v38 = vadd.f32 %v2427_v1, %v1851_v45  ;;  %vm1469_vm9 = vcmp.eq.s32.totalorder %v6507_v51, %v8419_v40  ;;  %v4898_v1 = vld [vmem:[%s6721_s20 + $0xa0] sm:$0xff]  ;;  %v1791_v62 = vsel %vm1471_vm1, %v7495_v6, 0.0 }
 0x46c   : > { %v3818_v20 = vmax.f32 %v3754_v44, 0.0  ;;  %4600 = vmatmul.msk.f32.gmra.mxu0 %vm2521_vm3, %v2490_v30  ;;  %4803 = vmatmul.msk.bf16.gmra.mxu2 %vm3469_vm11, %v2939_v52  ;;  %v8422_v30 = vld [vmem:[#allocation78_spill] sm:$0xff]  ;;  %v8423_v52 = vld [vmem:[#allocation85_spill] sm:$0xff] }
 0x46d   : > { %vm1470_vm14 = vcmp.eq.s32.totalorder %v6507_v51, %v8422_v30  ;;  %vm830_vm15 = vcmp.eq.s32.totalorder %v6507_v51, %v8423_v52 }
 0x46e   : > { %v3874_v24 = vpack.c.bf16 %v3818_v20, %v3817_v14  ;;  %4766 = vmatmul.msk.bf16.gmra.mxu1 %vm3191_vm13, %v4897_v41  ;;  %v1790_v44 = vsel %vm1470_vm14, %v1695_v59, 0.0  ;;  %v8424_v14 = vld [vmem:[#allocation167_spill] sm:$0xff]  ;;  %v2431_v41 = vsel %vm2111_vm4, %v7504_v60, 0.0 }
 0x46f   : > { %v3615_v36 = vpop.f32.mrf.mxu2  ;;  %v1214_v20 = vsel %vm830_vm15, %v8424_v14, 0.0 }
 0x470   : > { %4842 = vmatmul.msk.bf16.gmra.mxu3 %vm2521_vm3, %v3874_v24  ;;  %v3616_v17 = vadd.f32 %v3615_v36, %v7383_v3  ;;  %v7499_v33 = vpop.f32.mrf.mxu1  ;;  %v7522_v42 = vpop.permute.xlu0 %2031  ;;  %v1854_v24 = vadd.f32 %v1790_v44, %v1214_v20 }
 0x471   : > { %v2833_v22 = vpop.f32.mrf.mxu0  ;;  %vm2112_vm7 = vcmp.eq.s32.totalorder %v6507_v51, %v7522_v42 }
 0x472   : > { %v3755_v3 = vadd.f32 %v7148_v61, %v3616_v17  ;;  %v2494_v58 = vadd.f32 %v2430_v26, %v1854_v24  ;;  %v1707_v48 = vpop.permute.xlu2 %1706  ;;  %v2347_v49 = vpop.permute.xlu1 %2346  ;;  %v8432_v24 = vld [vmem:[#allocation91_spill] sm:$0xff] }
 0x474   : > { %4601 = vmatmul.msk.f32.gmra.mxu0 %vm2521_vm3, %v2491_v38  ;;  %v3819_v32 = vmax.f32 %v3755_v3, 0.0 }
 0x477   : > { %v3617_v34 = vpop.f32.mrf.mxu2 }
 0x478   : > { %v3618_v39 = vadd.f32 %v3617_v34, %v7402_v25  ;;  %v1789_v25 = vsel %vm1469_vm9, %v7448_v19, 0.0  ;;  %v7520_v29 = vpop.f32.mrf.mxu1  ;;  %v2035_v8 = vpop.permute.xlu0 %2034  ;;  %vm833_vm9 = vcmp.eq.s32.totalorder %v6507_v51, %v8432_v24  ;;  %v8440_v24 = vld [vmem:[#allocation90_spill] sm:$0xff] }
 0x479   : > { %v2836_v35 = vpop.f32.mrf.mxu0  ;;  %v1853_v27 = vadd.f32 %v1789_v25, %v1213_v57  ;;  %v1216_v57 = vsel %vm832_vm6, %v8430_v53, 0.0  ;;  %vm2113_vm10 = vcmp.eq.s32.totalorder %v6507_v51, %v2035_v8  ;;  %vm1476_vm4 = vcmp.eq.s32.totalorder %v6507_v51, %v8440_v24 }
 0x47a   : > { %v3756_v10 = vadd.f32 %v7148_v61, %v3618_v39  ;;  %v2940_v2 = vpack.c.bf16 %v2836_v35, %v2833_v22  ;;  %v8427_v39 = vld [vmem:[#allocation166_spill] sm:$0xff] }
 0x47b   : > { %v2493_v19 = vadd.f32 %v2429_v54, %v1853_v27  ;;  %v1215_v35 = vsel %vm831_vm2, %v8427_v39, 0.0  ;;  %v2432_v54 = vsel %vm2112_vm7, %v2343_v7, 0.0  ;;  %v8431_v7 = vld [vmem:[#allocation84_spill] sm:$0xff] }
 0x47c   : > { %v3820_v47 = vmax.f32 %v3756_v10, 0.0  ;;  %4602 = vmatmul.msk.f32.gmra.mxu0 %vm2521_vm3, %v2492_v11  ;;  %4804 = vmatmul.msk.bf16.gmra.mxu2 %vm3469_vm11, %v2940_v2  ;;  %v1855_v10 = vadd.f32 %v1791_v62, %v1215_v35  ;;  %vm1473_vm8 = vcmp.eq.s32.totalorder %v6507_v51, %v8431_v7  ;;  %v8436_v39 = vld [vmem:[#allocation168_spill] sm:$0xff] }
 0x47e   : > { %v3875_v16 = vpack.c.bf16 %v3820_v47, %v3819_v32  ;;  %4767 = vmatmul.msk.bf16.gmra.mxu1 %vm3191_vm13, %v4898_v1  ;;  %v2495_v32 = vadd.f32 %v2431_v41, %v1855_v10  ;;  %v8428_v47 = vld [vmem:[#allocation94_spill] sm:$0xff] }
 0x47f   : > { %v3620_v43 = vpop.f32.mrf.mxu2  ;;  %vm1472_vm5 = vcmp.eq.s32.totalorder %v6507_v51, %v8428_v47 }
 0x480   : > { %4843 = vmatmul.msk.bf16.gmra.mxu3 %vm2521_vm3, %v3875_v16  ;;  %v3621_v18 = vadd.f32 %v3620_v43, %v7421_v55  ;;  %v7539_v50 = vpop.f32.mrf.mxu1  ;;  %v1792_v60 = vsel %vm1472_vm5, %v1703_v28, 0.0  ;;  %v1711_v16 = vpop.permute.xlu2 %1710 }
 0x481   : > { %v2839_v4 = vpop.f32.mrf.mxu0  ;;  %v2038_v43 = vpop.permute.xlu0 %2037 }
 0x482   : > { %v3757_v55 = vadd.f32 %v7148_v61, %v3621_v18  ;;  %v4899_v18 = vld [vmem:[%s6721_s20 + $0xa8] sm:$0xff]  ;;  %vm2114_vm15 = vcmp.eq.s32.totalorder %v6507_v51, %v2038_v43 }
 0x483   : > { %v4040_v23 = vpop.f32.mrf.mxu3 }
 0x484   : > { %4603 = vmatmul.msk.f32.gmra.mxu0 %vm2521_vm3, %v2493_v19  ;;  %v4041_v36 = vadd.f32 %v7534_v21, %v4040_v23  ;;  %v3821_v17 = vmax.f32 %v3757_v55, 0.0  ;;  %v2351_v19 = vpop.permute.xlu1 %2350  ;;  %v1793_v55 = vsel %vm1473_vm8, %v1707_v48, 0.0 }
 0x485   : > { %v2434_v41 = vsel %vm2114_vm15, %v2351_v19, 0.0  ;;  %v8438_v19 = vld [vmem:[#allocation109_spill] sm:$0xff] }
 0x486   : > { %v4200_v34 = vmax.f32 %v4041_v36, 0.0  ;;  %vm835_vm1 = vcmp.eq.s32.totalorder %v6507_v51, %v8438_v19 }
 0x487   : > { %v3622_v37 = vpop.f32.mrf.mxu2 }
 0x488   : > { %v3623_v59 = vadd.f32 %v3622_v37, %v7444_v13  ;;  %v7561_v40 = vpop.f32.mrf.mxu1  ;;  %v1715_v0 = vpop.permute.xlu2 %1714 }
 0x489   : > { %v2842_v12 = vpop.f32.mrf.mxu0 }
 0x48a   : > { %v3758_v45 = vadd.f32 %v7148_v61, %v3623_v59  ;;  %v2941_v22 = vpack.c.bf16 %v2842_v12, %v2839_v4  ;;  %v1856_v4 = vadd.f32 %v1792_v60, %v1216_v57 }
 0x48b   : > { %v4042_v38 = vpop.f32.mrf.mxu3 }
 0x48c   : > { %v3822_v13 = vmax.f32 %v3758_v45, 0.0  ;;  %v4043_v46 = vadd.f32 %v7534_v21, %v4042_v38  ;;  %4604 = vmatmul.msk.f32.gmra.mxu0 %vm2521_vm3, %v2494_v58  ;;  %4805 = vmatmul.msk.bf16.gmra.mxu2 %vm3469_vm11, %v2941_v22  ;;  %v2496_v44 = vadd.f32 %v2432_v54, %v1856_v4  ;;  %v8433_v58 = vld [vmem:[#allocation169_spill] sm:$0xff]  ;;  %v2433_v45 = vsel %vm2113_vm10, %v2347_v49, 0.0  ;;  %v2355_v62 = vpop.permute.xlu1 %2354  ;;  %v8437_v54 = vld [vmem:[#allocation100_spill] sm:$0xff] }
 0x48d   : > { %v1217_v36 = vsel %vm833_vm9, %v8433_v58, 0.0  ;;  %vm1475_vm0 = vcmp.eq.s32.totalorder %v6507_v51, %v8437_v54  ;;  %v8441_v58 = vld [vmem:[#allocation97_spill] sm:$0xff] }
 0x48e   : > { %v4201_v56 = vmax.f32 %v4043_v46, 0.0  ;;  %v3876_v3 = vpack.c.bf16 %v3822_v13, %v3821_v17  ;;  %4768 = vmatmul.msk.bf16.gmra.mxu1 %vm3191_vm13, %v4899_v18  ;;  %v1857_v38 = vadd.f32 %v1793_v55, %v1217_v36  ;;  %v2041_v46 = vpop.permute.xlu0 %2040  ;;  %v8439_v18 = vld [vmem:[#allocation160_spill] sm:$0xff]  ;;  %vm836_vm5 = vcmp.eq.s32.totalorder %v6507_v51, %v8441_v58 }
 0x48f   : > { %v3625_v11 = vpop.f32.mrf.mxu2  ;;  %vm2115_vm2 = vcmp.eq.s32.totalorder %v6507_v51, %v2041_v46 }
 0x490   : > { %v4935_v2 = vpack.c.bf16 %v4201_v56, %v4200_v34  ;;  %4844 = vmatmul.msk.bf16.gmra.mxu3 %vm2521_vm3, %v3876_v3  ;;  %v3626_v25 = vadd.f32 %v3625_v11, %v7465_v15  ;;  %v7577_v30 = vpop.f32.mrf.mxu1  ;;  %v2497_v48 = vadd.f32 %v2433_v45, %v1857_v38  ;;  %v8434_v34 = vld [vmem:[#allocation101_spill] sm:$0xff]  ;;  %v8435_v3 = vld [vmem:[#allocation110_spill] sm:$0xff]  ;;  %v1719_v47 = vpop.permute.xlu2 %1718  ;;  %v8442_v45 = vld [vmem:[#allocation171_spill] sm:$0xff] }
 0x491   : > { %v2845_v6 = vpop.f32.mrf.mxu0  ;;  %vm1474_vm12 = vcmp.eq.s32.totalorder %v6507_v51, %v8434_v34  ;;  %vm834_vm14 = vcmp.eq.s32.totalorder %v6507_v51, %v8435_v3 }
 0x492   : > { %4936 = vst [vmem:[%s7563_s16] sm:$0xff] %v4935_v2   ;;  %v3759_v15 = vadd.f32 %v7148_v61, %v3626_v25  ;;  %v1794_v56 = vsel %vm1474_vm12, %v1711_v16, 0.0  ;;  %v1218_v35 = vsel %vm834_vm14, %v8436_v39, 0.0 }
 0x493   : > { %v4045_v63 = vpop.f32.mrf.mxu3  ;;  %v1858_v10 = vadd.f32 %v1794_v56, %v1218_v35  ;;  %v8443_v35 = vld [vmem:[#allocation175_spill] sm:$0xff] }
 0x494   : > { %4605 = vmatmul.msk.f32.gmra.mxu0 %vm2521_vm3, %v2495_v32  ;;  %v4046_v52 = vadd.f32 %v7534_v21, %v4045_v63  ;;  %v3823_v26 = vmax.f32 %v3759_v15, 0.0  ;;  %v4900_v63 = vld [vmem:[%s6721_s20 + $0xb0] sm:$0xff]  ;;  %v2359_v43 = vpop.permute.xlu1 %2358  ;;  %vm1477_vm7 = vcmp.eq.s32.totalorder %v6507_v51, %v8443_v35 }
 0x495   : > { %v2498_v25 = vadd.f32 %v2434_v41, %v1858_v10  ;;  %v8444_v10 = vld [vmem:[#allocation113_spill] sm:$0xff] }
 0x496   : > { %v4202_v59 = vmax.f32 %v4046_v52, 0.0  ;;  %v2044_v53 = vpop.permute.xlu0 %2043  ;;  %v2435_v52 = vsel %vm2115_vm2, %v2355_v62, 0.0  ;;  %vm837_vm8 = vcmp.eq.s32.totalorder %v6507_v51, %v8444_v10 }
 0x497   : > { %v3627_v27 = vpop.f32.mrf.mxu2  ;;  %vm2116_vm6 = vcmp.eq.s32.totalorder %v6507_v51, %v2044_v53 }
 0x498   : > { %v3628_v23 = vadd.f32 %v3627_v27, %v7482_v9  ;;  %v7593_v13 = vpop.f32.mrf.mxu1  ;;  %v1723_v55 = vpop.permute.xlu2 %1722  ;;  %v2436_v38 = vsel %vm2116_vm6, %v2359_v43, 0.0 }
 0x499   : > { %v2848_v28 = vpop.f32.mrf.mxu0 }
 0x49a   : > { %v3760_v42 = vadd.f32 %v7148_v61, %v3628_v23  ;;  %v2942_v14 = vpack.c.bf16 %v2848_v28, %v2845_v6 }
 0x49b   : > { %v4047_v20 = vpop.f32.mrf.mxu3 }
 0x49c   : > { %v3824_v37 = vmax.f32 %v3760_v42, 0.0  ;;  %v4048_v9 = vadd.f32 %v7534_v21, %v4047_v20  ;;  %4606 = vmatmul.msk.f32.gmra.mxu0 %vm2521_vm3, %v2496_v44  ;;  %4806 = vmatmul.msk.bf16.gmra.mxu2 %vm3469_vm11, %v2942_v14  ;;  %v1219_v44 = vsel %vm835_vm1, %v8439_v18, 0.0  ;;  %v2363_v36 = vpop.permute.xlu1 %2362  ;;  %v8448_v18 = vld [vmem:[#allocation163_spill] sm:$0xff] }
 0x49e   : > { %v4203_v12 = vmax.f32 %v4048_v9, 0.0  ;;  %v3877_v1 = vpack.c.bf16 %v3824_v37, %v3823_v26  ;;  %4769 = vmatmul.msk.bf16.gmra.mxu1 %vm3191_vm13, %v4900_v63 }
 0x49f   : > { %v3630_v22 = vpop.f32.mrf.mxu2 }
 0x4a0   : > { %v4940_v17 = vpack.c.bf16 %v4203_v12, %v4202_v59  ;;  %4845 = vmatmul.msk.bf16.gmra.mxu3 %vm2521_vm3, %v3877_v1  ;;  %v3631_v49 = vadd.f32 %v3630_v22, %v7499_v33  ;;  %v7606_v32 = vpop.f32.mrf.mxu1  ;;  %v1796_v12 = vsel %vm1476_vm4, %v1719_v47, 0.0  ;;  %v2047_v1 = vpop.permute.xlu0 %2046  ;;  %v1220_v22 = vsel %vm836_vm5, %v8442_v45, 0.0 }
 0x4a1   : > { %v2851_v5 = vpop.f32.mrf.mxu0  ;;  %vm2117_vm9 = vcmp.eq.s32.totalorder %v6507_v51, %v2047_v1 }
 0x4a2   : > { %5095 = vst [vmem:[%s7563_s16 + $0x8] sm:$0xff] %v4940_v17   ;;  %v3761_v2 = vadd.f32 %v7148_v61, %v3631_v49  ;;  %v1860_v17 = vadd.f32 %v1796_v12, %v1220_v22  ;;  %v8449_v22 = vld [vmem:[#allocation96_spill] sm:$0xff] }
 0x4a3   : > { %v4050_v8 = vpop.f32.mrf.mxu3  ;;  %vm1479_vm15 = vcmp.eq.s32.totalorder %v6507_v51, %v8449_v22 }
 0x4a4   : > { %4607 = vmatmul.msk.f32.gmra.mxu0 %vm2521_vm3, %v2497_v48  ;;  %v4051_v60 = vadd.f32 %v7534_v21, %v4050_v8  ;;  %v4901_v8 = vld [vmem:[%s6721_s20 + $0xb8] sm:$0xff]  ;;  %v2500_v34 = vadd.f32 %v2436_v38, %v1860_v17  ;;  %v2367_v54 = vpop.permute.xlu1 %2366  ;;  %v8450_v17 = vld [vmem:[#allocation102_spill] sm:$0xff] }
 0x4a6   : > { %v4204_v15 = vmax.f32 %v4051_v60, 0.0 }
 0x4a7   : > { %v3632_v11 = vpop.f32.mrf.mxu2 }
 0x4a8   : > { %v3633_v6 = vadd.f32 %v3632_v11, %v7520_v29  ;;  %v3825_v29 = vmax.f32 %v3761_v2, 0.0  ;;  %v7622_v7 = vpop.f32.mrf.mxu1  ;;  %v1797_v2 = vsel %vm1477_vm7, %v1723_v55, 0.0  ;;  %v4902_v55 = vld [vmem:[%s6721_s20 + $0xc0] sm:$0xff] }
 0x4a9   : > { %v2854_v33 = vpop.f32.mrf.mxu0 }
 0x4aa   : > { %v3762_v31 = vadd.f32 %v7148_v61, %v3633_v6  ;;  %v2943_v16 = vpack.c.bf16 %v2854_v33, %v2851_v5  ;;  %v1795_v61 = vsel %vm1475_vm0, %v1715_v0, 0.0  ;;  %v1727_v6 = vpop.permute.xlu2 %1726  ;;  %vm839_vm0 = vcmp.eq.s32.totalorder %v6507_v51, %v8450_v17 }
 0x4ab   : > { %v4052_v57 = vpop.f32.mrf.mxu3  ;;  %v1859_v14 = vadd.f32 %v1795_v61, %v1219_v44  ;;  %v8446_v61 = vld [vmem:[#allocation176_spill] sm:$0xff] }
 0x4ac   : > { %v3826_v27 = vmax.f32 %v3762_v31, 0.0  ;;  %v4053_v4 = vadd.f32 %v7534_v21, %v4052_v57  ;;  %4608 = vmatmul.msk.f32.gmra.mxu0 %vm2521_vm3, %v2498_v25  ;;  %4807 = vmatmul.msk.bf16.gmra.mxu2 %vm3469_vm11, %v2943_v16  ;;  %v8445_v25 = vld [vmem:[#allocation170_spill] sm:$0xff]  ;;  %v2050_v31 = vpop.permute.xlu0 %2049  ;;  %v2437_v16 = vsel %vm2117_vm9, %v2363_v36, 0.0  ;;  %vm1478_vm10 = vcmp.eq.s32.totalorder %v6507_v51, %v8446_v61  ;;  %v2371_v12 = vpop.permute.xlu1 %2370 }
 0x4ad   : > { %v2499_v37 = vadd.f32 %v2435_v52, %v1859_v14  ;;  %v1221_v60 = vsel %vm837_vm8, %v8445_v25, 0.0  ;;  %vm2118_vm14 = vcmp.eq.s32.totalorder %v6507_v51, %v2050_v31  ;;  %v8454_v31 = vld [vmem:[#allocation172_spill] sm:$0xff] }
 0x4ae   : > { %v4205_v23 = vmax.f32 %v4053_v4, 0.0  ;;  %v3878_v28 = vpack.c.bf16 %v3826_v27, %v3825_v29  ;;  %4770 = vmatmul.msk.bf16.gmra.mxu1 %vm3191_vm13, %v4901_v8  ;;  %v1861_v57 = vadd.f32 %v1797_v2, %v1221_v60  ;;  %v2438_v52 = vsel %vm2118_vm14, %v2367_v54, 0.0  ;;  %v8453_v60 = vld [vmem:[#allocation116_spill] sm:$0xff] }
 0x4af   : > { %v3635_v42 = vpop.f32.mrf.mxu2  ;;  %vm840_vm4 = vcmp.eq.s32.totalorder %v6507_v51, %v8453_v60 }
 0x4b0   : > { %v4945_v20 = vpack.c.bf16 %v4205_v23, %v4204_v15  ;;  %4846 = vmatmul.msk.bf16.gmra.mxu3 %vm2521_vm3, %v3878_v28  ;;  %v3636_v59 = vadd.f32 %v3635_v42, %v7539_v50  ;;  %v7636_v50 = vld [vmem:[%s7928_s6] ss:$0 sm:$0xff]  ;;  %v7640_v48 = vpop.f32.mrf.mxu1  ;;  %v2501_v4 = vadd.f32 %v2437_v16, %v1861_v57  ;;  %v1798_v23 = vsel %vm1478_vm10, %v1727_v6, 0.0  ;;  %v8447_v28 = vld [vmem:[#allocation112_spill] sm:$0xff] }
 0x4b1   : > { %v2857_v26 = vpop.f32.mrf.mxu0  ;;  %vm838_vm12 = vcmp.eq.s32.totalorder %v6507_v51, %v8447_v28  ;;  %v1224_v16 = vsel %vm840_vm4, %v8454_v31, 0.0 }
 0x4b2   : > { %5096 = vst [vmem:[%s7563_s16 + $0x10] sm:$0xff] %v4945_v20   ;;  %v3763_v46 = vadd.f32 %v7636_v50, %v3636_v59  ;;  %v1222_v44 = vsel %vm838_vm12, %v8448_v18, 0.0  ;;  %v1731_v20 = vpop.permute.xlu2 %1730 }
 0x4b3   : > { %v4055_v9 = vpop.f32.mrf.mxu3  ;;  %v1862_v14 = vadd.f32 %v1798_v23, %v1222_v44 }
 0x4b4   : > { %4609 = vmatmul.msk.f32.gmra.mxu0 %vm2521_vm3, %v2499_v37  ;;  %v4056_v49 = vadd.f32 %v7534_v21, %v4055_v9  ;;  %v3827_v41 = vmax.f32 %v3763_v46, 0.0  ;;  %v1799_v46 = vsel %vm1479_vm15, %v1731_v20, 0.0 }
 0x4b5   : > { %v2502_v59 = vadd.f32 %v2438_v52, %v1862_v14 }
 0x4b6   : > { %v4206_v33 = vmax.f32 %v4056_v49, 0.0 }
 0x4b7   : > { %v3637_v0 = vpop.f32.mrf.mxu2 }
 0x4b8   : > { %v3638_v5 = vadd.f32 %v3637_v0, %v7561_v40  ;;  %v7656_v29 = vpop.f32.mrf.mxu1 }
 0x4b9   : > { %v2860_v62 = vpop.f32.mrf.mxu0 }
 0x4ba   : > { %v3764_v56 = vadd.f32 %v7636_v50, %v3638_v5  ;;  %v2944_v3 = vpack.c.bf16 %v2860_v62, %v2857_v26 }
 0x4bb   : > { %v4057_v39 = vpop.f32.mrf.mxu3 }
 0x4bc   : > { %v3828_v11 = vmax.f32 %v3764_v56, 0.0  ;;  %v4058_v40 = vadd.f32 %v7534_v21, %v4057_v39  ;;  %4610 = vmatmul.msk.f32.gmra.mxu0 %vm2521_vm3, %v2500_v34  ;;  %4808 = vmatmul.msk.bf16.gmra.mxu2 %vm3469_vm11, %v2944_v3  ;;  %v8451_v34 = vld [vmem:[#allocation173_spill] sm:$0xff] }
 0x4bd   : > { %v1223_v49 = vsel %vm839_vm0, %v8451_v34, 0.0 }
 0x4be   : > { %v3879_v63 = vpack.c.bf16 %v3828_v11, %v3827_v41  ;;  %v4207_v47 = vmax.f32 %v4058_v40, 0.0  ;;  %4771 = vmatmul.msk.bf16.gmra.mxu1 %vm3191_vm13, %v4902_v55  ;;  %v1863_v39 = vadd.f32 %v1799_v46, %v1223_v49  ;;  %v1735_v40 = vpop.permute.xlu2 %1734 }
 0x4bf   : > { %v3640_v53 = vpop.f32.mrf.mxu2 }
 0x4c0   : > { %v4950_v43 = vpack.c.bf16 %v4207_v47, %v4206_v33  ;;  %4847 = vmatmul.msk.bf16.gmra.mxu3 %vm2521_vm3, %v3879_v63  ;;  %v3641_v15 = vadd.f32 %v3640_v53, %v7577_v30  ;;  %v7669_v9 = vpop.f32.mrf.mxu1  ;;  %v2053_v30 = vpop.permute.xlu0 %2052  ;;  %v8452_v33 = vld [vmem:[#allocation177_spill] sm:$0xff] }
 0x4c1   : > { %v2863_v27 = vpop.f32.mrf.mxu0  ;;  %vm2119_vm1 = vcmp.eq.s32.totalorder %v6507_v51, %v2053_v30  ;;  %vm1480_vm2 = vcmp.eq.s32.totalorder %v6507_v51, %v8452_v33  ;;  %v2375_v63 = vpop.permute.xlu1 %2374 }
 0x4c2   : > { %5097 = vst [vmem:[%s7563_s16 + $0x18] sm:$0xff] %v4950_v43   ;;  %v3765_v26 = vadd.f32 %v7636_v50, %v3641_v15  ;;  %v2439_v56 = vsel %vm2119_vm1, %v2371_v12, 0.0  ;;  %v1800_v25 = vsel %vm1480_vm2, %v1735_v40, 0.0 }
 0x4c3   : > { %v4060_v19 = vpop.f32.mrf.mxu3  ;;  %v2503_v10 = vadd.f32 %v2439_v56, %v1863_v39  ;;  %v1864_v54 = vadd.f32 %v1800_v25, %v1224_v16 }
 0x4c4   : > { %4611 = vmatmul.msk.f32.gmra.mxu0 %vm2521_vm3, %v2501_v4  ;;  %v4061_v1 = vadd.f32 %v7534_v21, %v4060_v19  ;;  %v3829_v38 = vmax.f32 %v3765_v26, 0.0  ;;  %v4903_v19 = vld [vmem:[%s6721_s20 + $0xc8] sm:$0xff] }
 0x4c6   : > { %v4208_v5 = vmax.f32 %v4061_v1, 0.0 }
 0x4c7   : > { %v3642_v42 = vpop.f32.mrf.mxu2 }
 0x4c8   : > { %v3643_v37 = vadd.f32 %v3642_v42, %v7593_v13  ;;  %v7685_v41 = vpop.f32.mrf.mxu1  ;;  %v2056_v2 = vpop.permute.xlu0 %2055 }
 0x4c9   : > { %v2866_v24 = vpop.f32.mrf.mxu0  ;;  %vm2120_vm5 = vcmp.eq.s32.totalorder %v6507_v51, %v2056_v2 }
 0x4ca   : > { %v3766_v58 = vadd.f32 %v7636_v50, %v3643_v37  ;;  %v2945_v36 = vpack.c.bf16 %v2866_v24, %v2863_v27  ;;  %v2440_v53 = vsel %vm2120_vm5, %v2375_v63, 0.0 }
 0x4cb   : > { %v4062_v45 = vpop.f32.mrf.mxu3  ;;  %v2504_v61 = vadd.f32 %v2440_v53, %v1864_v54 }
 0x4cc   : > { %v3830_v13 = vmax.f32 %v3766_v58, 0.0  ;;  %v4063_v0 = vadd.f32 %v7534_v21, %v4062_v45  ;;  %4612 = vmatmul.msk.f32.gmra.mxu0 %vm2521_vm3, %v2502_v59  ;;  %4809 = vmatmul.msk.bf16.gmra.mxu2 %vm3469_vm11, %v2945_v36  ;;  %v4904_v45 = vld [vmem:[%s6721_s20 + $0xd0] sm:$0xff] }
 0x4ce   : > { %v3880_v62 = vpack.c.bf16 %v3830_v13, %v3829_v38  ;;  %v4209_v8 = vmax.f32 %v4063_v0, 0.0  ;;  %4772 = vmatmul.msk.bf16.gmra.mxu1 %vm3191_vm13, %v4903_v19 }
 0x4cf   : > { %v3645_v3 = vpop.f32.mrf.mxu2 }
 0x4d0   : > { %v4955_v35 = vpack.c.bf16 %v4209_v8, %v4208_v5  ;;  %4848 = vmatmul.msk.bf16.gmra.mxu3 %vm2521_vm3, %v3880_v62  ;;  %v3646_v47 = vadd.f32 %v3645_v3, %v7606_v32  ;;  %v7698_v4 = vpop.f32.mrf.mxu1 }
 0x4d1   : > { %v2869_v11 = vpop.f32.mrf.mxu0 }
 0x4d2   : > { %5098 = vst [vmem:[%s7563_s16 + $0x20] sm:$0xff] %v4955_v35   ;;  %v3767_v43 = vadd.f32 %v7636_v50, %v3646_v47 }
 0x4d3   : > { %v4065_v6 = vpop.f32.mrf.mxu3 }
 0x4d4   : > { %4613 = vmatmul.msk.f32.gmra.mxu0 %vm2521_vm3, %v2503_v10  ;;  %v4066_v15 = vadd.f32 %v7534_v21, %v4065_v6  ;;  %v3831_v18 = vmax.f32 %v3767_v43, 0.0  ;;  %v4905_v6 = vld [vmem:[%s6721_s20 + $0xd8] sm:$0xff] }
 0x4d7   : > { %v3647_v57 = vpop.f32.mrf.mxu2 }
 0x4d8   : > { %v3648_v27 = vadd.f32 %v3647_v57, %v7622_v7  ;;  %v4210_v7 = vmax.f32 %v4066_v15, 0.0  ;;  %v3384_v37 = vpop.f32.mrf.mxu1 }
 0x4d9   : > { %v2872_v32 = vpop.f32.mrf.mxu0 }
 0x4da   : > { %v3768_v23 = vadd.f32 %v7636_v50, %v3648_v27  ;;  %v2946_v28 = vpack.c.bf16 %v2872_v32, %v2869_v11 }
 0x4db   : > { %v4067_v51 = vpop.f32.mrf.mxu3 }
 0x4dc   : > { %v3832_v44 = vmax.f32 %v3768_v23, 0.0  ;;  %v4068_v52 = vadd.f32 %v7534_v21, %v4067_v51  ;;  %4614 = vmatmul.msk.f32.gmra.mxu0 %vm2521_vm3, %v2504_v61  ;;  %4810 = vmatmul.msk.bf16.gmra.mxu2 %vm3469_vm11, %v2946_v28 }
 0x4de   : > { %v3881_v42 = vpack.c.bf16 %v3832_v44, %v3831_v18  ;;  %v4211_v14 = vmax.f32 %v4068_v52, 0.0  ;;  %4773 = vmatmul.msk.bf16.gmra.mxu1 %vm3191_vm13, %v4904_v45  ;;  %v4906_v18 = vld [vmem:[%s6721_s20 + $0xe0] sm:$0xff] }
 0x4df   : > { %v3650_v20 = vpop.f32.mrf.mxu2 }
 0x4e0   : > { %v4960_v26 = vpack.c.bf16 %v4211_v14, %v4210_v7  ;;  %4849 = vmatmul.msk.bf16.gmra.mxu3 %vm2521_vm3, %v3881_v42  ;;  %v3651_v55 = vadd.f32 %v3650_v20, %v7640_v48  ;;  %v7712_v58 = vpop.f32.mrf.mxu1 }
 0x4e1   : > { %v2875_v30 = vpop.f32.mrf.mxu0 }
 0x4e2   : > { %5099 = vst [vmem:[%s7563_s16 + $0x28] sm:$0xff] %v4960_v26   ;;  %v3769_v12 = vadd.f32 %v7636_v50, %v3651_v55 }
 0x4e3   : > { %v4070_v24 = vpop.f32.mrf.mxu3 }
 0x4e4   : > { %v4071_v22 = vadd.f32 %v7534_v21, %v4070_v24  ;;  %v3833_v17 = vmax.f32 %v3769_v12, 0.0 }
 0x4e7   : > { %v3652_v59 = vpop.f32.mrf.mxu2 }
 0x4e8   : > { %v3653_v1 = vadd.f32 %v3652_v59, %v7656_v29  ;;  %v4212_v29 = vmax.f32 %v4071_v22, 0.0  ;;  %v3389_v49 = vpop.f32.mrf.mxu1 }
 0x4e9   : > { %v2878_v36 = vpop.f32.mrf.mxu0 }
 0x4ea   : > { %v3770_v38 = vadd.f32 %v7636_v50, %v3653_v1  ;;  %v2947_v13 = vpack.c.bf16 %v2878_v36, %v2875_v30 }
 0x4eb   : > { %v4072_v0 = vpop.f32.mrf.mxu3 }
 0x4ec   : > { %v3834_v48 = vmax.f32 %v3770_v38, 0.0  ;;  %v4073_v46 = vadd.f32 %v7534_v21, %v4072_v0  ;;  %4811 = vmatmul.msk.bf16.gmra.mxu2 %vm3469_vm11, %v2947_v13 }
 0x4ee   : > { %v3882_v5 = vpack.c.bf16 %v3834_v48, %v3833_v17  ;;  %v4213_v62 = vmax.f32 %v4073_v46, 0.0  ;;  %4774 = vmatmul.msk.bf16.gmra.mxu1 %vm3191_vm13, %v4905_v6  ;;  %v4907_v17 = vld [vmem:[%s6721_s20 + $0xe8] sm:$0xff] }
 0x4ef   : > { %v3655_v8 = vpop.f32.mrf.mxu2 }
 0x4f0   : > { %v4965_v34 = vpack.c.bf16 %v4213_v62, %v4212_v29  ;;  %4850 = vmatmul.msk.bf16.gmra.mxu3 %vm2521_vm3, %v3882_v5  ;;  %v3656_v39 = vadd.f32 %v3655_v8, %v7669_v9  ;;  %v7725_v10 = vpop.f32.mrf.mxu1 }
 0x4f1   : > { %v2881_v56 = vpop.f32.mrf.mxu0 }
 0x4f2   : > { %5100 = vst [vmem:[%s7563_s16 + $0x30] sm:$0xff] %v4965_v34   ;;  %v3771_v11 = vadd.f32 %v7636_v50, %v3656_v39 }
 0x4f3   : > { %v4075_v3 = vpop.f32.mrf.mxu3 }
 0x4f4   : > { %v4076_v33 = vadd.f32 %v7534_v21, %v4075_v3  ;;  %v3835_v60 = vmax.f32 %v3771_v11, 0.0 }
 0x4f7   : > { %v3657_v35 = vpop.f32.mrf.mxu2 }
 0x4f8   : > { %v3658_v40 = vadd.f32 %v3657_v35, %v7685_v41  ;;  %v4214_v41 = vmax.f32 %v4076_v33, 0.0  ;;  %v3394_v43 = vpop.f32.mrf.mxu1 }
 0x4f9   : > { %v2884_v2 = vpop.f32.mrf.mxu0 }
 0x4fa   : > { %v3772_v63 = vadd.f32 %v7636_v50, %v3658_v40  ;;  %v2948_v47 = vpack.c.bf16 %v2884_v2, %v2881_v56 }
 0x4fb   : > { %v4077_v25 = vpop.f32.mrf.mxu3 }
 0x4fc   : > { %v3836_v9 = vmax.f32 %v3772_v63, 0.0  ;;  %v4078_v31 = vadd.f32 %v7534_v21, %v4077_v25  ;;  %4812 = vmatmul.msk.bf16.gmra.mxu2 %vm3469_vm11, %v2948_v47 }
 0x4fe   : > { %v3883_v16 = vpack.c.bf16 %v3836_v9, %v3835_v60  ;;  %v4215_v53 = vmax.f32 %v4078_v31, 0.0  ;;  %4775 = vmatmul.msk.bf16.gmra.mxu1 %vm3191_vm13, %v4906_v18  ;;  %v4908_v60 = vld [vmem:[%s6721_s20 + $0xf0] sm:$0xff] }
 0x4ff   : > { %v3660_v57 = vpop.f32.mrf.mxu2 }
 0x500   : > { %v4970_v54 = vpack.c.bf16 %v4215_v53, %v4214_v41  ;;  %4851 = vmatmul.msk.bf16.gmra.mxu3 %vm2521_vm3, %v3883_v16  ;;  %v3661_v19 = vadd.f32 %v3660_v57, %v7698_v4  ;;  %v7737_v28 = vpop.f32.mrf.mxu1 }
 0x501   : > { %v2887_v27 = vpop.f32.mrf.mxu0 }
 0x502   : > { %5101 = vst [vmem:[%s7563_s16 + $0x38] sm:$0xff] %v4970_v54   ;;  %v3773_v15 = vadd.f32 %v7636_v50, %v3661_v19 }
 0x503   : > { %v4080_v32 = vpop.f32.mrf.mxu3 }
 0x504   : > { %v4081_v44 = vadd.f32 %v7534_v21, %v4080_v32  ;;  %v3837_v14 = vmax.f32 %v3773_v15, 0.0 }
 0x506   : > { %v4216_v26 = vmax.f32 %v4081_v44, 0.0 }
 0x507   : > { %v3662_v61 = vpop.f32.mrf.mxu2 }
 0x508   : > { %v3663_v23 = vadd.f32 %v3662_v61, %v3384_v37  ;;  %v3399_v59 = vpop.f32.mrf.mxu1 }
 0x509   : > { %v2890_v51 = vpop.f32.mrf.mxu0 }
 0x50a   : > { %v3774_v52 = vadd.f32 %v7636_v50, %v3663_v23  ;;  %v2949_v7 = vpack.c.bf16 %v2890_v51, %v2887_v27 }
 0x50b   : > { %v4082_v42 = vpop.f32.mrf.mxu3 }
 0x50c   : > { %v3838_v20 = vmax.f32 %v3774_v52, 0.0  ;;  %v4083_v4 = vadd.f32 %v7534_v21, %v4082_v42  ;;  %4813 = vmatmul.msk.bf16.gmra.mxu2 %vm3469_vm11, %v2949_v7  ;;  %v4909_v42 = vld [vmem:[%s6721_s20 + $0xf8] sm:$0xff]  ;;  %s5314_s20 = scalar_lea.hbm %s5313_s24, 256 }
 0x50d   : > { %p5315_p12 = scmp.ne.s32.totalorder %s5313_s24, %s5314_s20  ;;  %p5320_p2 = scmp.lt.s32.totalorder %s5318_s28, %s5314_s20 }
 0x50e   : > { %v3884_v37 = vpack.c.bf16 %v3838_v20, %v3837_v14  ;;  %v4217_v30 = vmax.f32 %v4083_v4, 0.0  ;;  %4776 = vmatmul.msk.bf16.gmra.mxu1 %vm3191_vm13, %v4907_v17 }
 0x50f   : > { %v3665_v24 = vpop.f32.mrf.mxu2  ;;  %p5316_p13 = pnand %p5315_p12, %p5473_p4  ;;  %p5321_p3 = por %p5320_p2, %p5319_p1 }
 0x510   : > { %v4975_v55 = vpack.c.bf16 %v4217_v30, %v4216_v26  ;;  %4852 = vmatmul.msk.bf16.gmra.mxu3 %vm2521_vm3, %v3884_v37  ;;  %v3666_v36 = vadd.f32 %v3665_v24, %v7712_v58  ;;  %v7749_v13 = vpop.f32.mrf.mxu1 }
 0x511   : > { %v2893_v12 = vpop.f32.mrf.mxu0  ;;  %p5317_p0 = pneg %p5316_p13 }
 0x512   : > { %5102 = vst [vmem:[%s7563_s16 + $0x40] sm:$0xff] %v4975_v55   ;;  %v3775_v22 = vadd.f32 %v7636_v50, %v3666_v36 }
 0x513   : > { %v4085_v1 = vpop.f32.mrf.mxu3  ;;  %p5322_p5 = pnand %p5321_p3, %p5317_p0 }
 0x514   : > { %v4086_v48 = vadd.f32 %v7534_v21, %v4085_v1  ;;  %v3839_v62 = vmax.f32 %v3775_v22, 0.0 }
 0x516   : > { %v4218_v34 = vmax.f32 %v4086_v48, 0.0 }
 0x517   : > { %v3667_v45 = vpop.f32.mrf.mxu2 }
 0x518   : > { %v3668_v38 = vadd.f32 %v3667_v45, %v3389_v49  ;;  %v3404_v35 = vpop.f32.mrf.mxu1 }
 0x519   : > { %v2896_v0 = vpop.f32.mrf.mxu0 }
 0x51a   : > { %v3776_v46 = vadd.f32 %v7636_v50, %v3668_v38  ;;  %v2950_v29 = vpack.c.bf16 %v2896_v0, %v2893_v12 }
 0x51b   : > { %v4087_v5 = vpop.f32.mrf.mxu3 }
 0x51c   : > { %v3840_v8 = vmax.f32 %v3776_v46, 0.0  ;;  %v4088_v58 = vadd.f32 %v7534_v21, %v4087_v5  ;;  %4814 = vmatmul.msk.bf16.gmra.mxu2 %vm3469_vm11, %v2950_v29 }
 0x51e   : > { %v3885_v49 = vpack.c.bf16 %v3840_v8, %v3839_v62  ;;  %v4219_v56 = vmax.f32 %v4088_v58, 0.0  ;;  %4777 = vmatmul.msk.bf16.gmra.mxu1 %vm3191_vm13, %v4908_v60 }
 0x51f   : > { %v3670_v3 = vpop.f32.mrf.mxu2 }
 0x520   : > { %v4980_v39 = vpack.c.bf16 %v4219_v56, %v4218_v34  ;;  %4853 = vmatmul.msk.bf16.gmra.mxu3 %vm2521_vm3, %v3885_v49  ;;  %v3671_v2 = vadd.f32 %v3670_v3, %v7725_v10  ;;  %v7761_v25 = vpop.f32.mrf.mxu1 }
 0x521   : > { %v2899_v11 = vpop.f32.mrf.mxu0 }
 0x522   : > { %5103 = vst [vmem:[%s7563_s16 + $0x48] sm:$0xff] %v4980_v39   ;;  %v3777_v33 = vadd.f32 %v7636_v50, %v3671_v2 }
 0x523   : > { %v4090_v40 = vpop.f32.mrf.mxu3 }
 0x524   : > { %v4091_v9 = vadd.f32 %v7534_v21, %v4090_v40  ;;  %v3841_v53 = vmax.f32 %v3777_v33, 0.0 }
 0x526   : > { %v4220_v54 = vmax.f32 %v4091_v9, 0.0 }
 0x527   : > { %v3672_v6 = vpop.f32.mrf.mxu2 }
 0x528   : > { %v3673_v63 = vadd.f32 %v3672_v6, %v3394_v43  ;;  %v3409_v23 = vpop.f32.mrf.mxu1 }
 0x529   : > { %v2902_v47 = vpop.f32.mrf.mxu0 }
 0x52a   : > { %v3778_v31 = vadd.f32 %v7636_v50, %v3673_v63  ;;  %v2951_v41 = vpack.c.bf16 %v2902_v47, %v2899_v11 }
 0x52b   : > { %v4092_v16 = vpop.f32.mrf.mxu3 }
 0x52c   : > { %v3842_v57 = vmax.f32 %v3778_v31, 0.0  ;;  %v4093_v10 = vadd.f32 %v7534_v21, %v4092_v16  ;;  %4815 = vmatmul.msk.bf16.gmra.mxu2 %vm3469_vm11, %v2951_v41 }
 0x52e   : > { %v3886_v43 = vpack.c.bf16 %v3842_v57, %v3841_v53  ;;  %v4221_v27 = vmax.f32 %v4093_v10, 0.0  ;;  %4778 = vmatmul.msk.bf16.gmra.mxu1 %vm3191_vm13, %v4909_v42 }
 0x52f   : > { %v3675_v32 = vpop.f32.mrf.mxu2 }
 0x530   : > { %v4985_v19 = vpack.c.bf16 %v4221_v27, %v4220_v54  ;;  %4854 = vmatmul.msk.bf16.gmra.mxu3 %vm2521_vm3, %v3886_v43  ;;  %v3676_v51 = vadd.f32 %v3675_v32, %v7737_v28  ;;  %v3412_v28 = vpop.f32.mrf.mxu1 }
 0x531   : > { %v2905_v61 = vpop.f32.mrf.mxu0 }
 0x532   : > { %5104 = vst [vmem:[%s7563_s16 + $0x50] sm:$0xff] %v4985_v19   ;;  %v3779_v44 = vadd.f32 %v7636_v50, %v3676_v51 }
 0x533   : > { %v4095_v15 = vpop.f32.mrf.mxu3 }
 0x534   : > { %v4096_v14 = vadd.f32 %v7534_v21, %v4095_v15  ;;  %v3843_v37 = vmax.f32 %v3779_v44, 0.0 }
 0x536   : > { %v4222_v55 = vmax.f32 %v4096_v14, 0.0 }
 0x537   : > { %v3677_v18 = vpop.f32.mrf.mxu2 }
 0x538   : > { %v3678_v52 = vadd.f32 %v3677_v18, %v3399_v59  ;;  %v3414_v17 = vpop.f32.mrf.mxu1 }
 0x539   : > { %v2908_v7 = vpop.f32.mrf.mxu0 }
 0x53a   : > { %v3780_v20 = vadd.f32 %v7636_v50, %v3678_v52  ;;  %v2952_v4 = vpack.c.bf16 %v2908_v7, %v2905_v61 }
 0x53b   : > { %v4097_v26 = vpop.f32.mrf.mxu3 }
 0x53c   : > { %v3844_v30 = vmax.f32 %v3780_v20, 0.0  ;;  %v4098_v24 = vadd.f32 %v7534_v21, %v4097_v26  ;;  %4816 = vmatmul.msk.bf16.gmra.mxu2 %vm3469_vm11, %v2952_v4 }
 0x53e   : > { %v3887_v59 = vpack.c.bf16 %v3844_v30, %v3843_v37  ;;  %v4223_v12 = vmax.f32 %v4098_v24, 0.0 }
 0x53f   : > { %v3680_v1 = vpop.f32.mrf.mxu2 }
 0x540   : > { %v4990_v36 = vpack.c.bf16 %v4223_v12, %v4222_v55  ;;  %4855 = vmatmul.msk.bf16.gmra.mxu3 %vm2521_vm3, %v3887_v59  ;;  %v3681_v38 = vadd.f32 %v3680_v1, %v7749_v13  ;;  %v3417_v2 = vpop.f32.mrf.mxu1 }
 0x541   : > { %v2911_v45 = vpop.f32.mrf.mxu0 }
 0x542   : > { %5105 = vst [vmem:[%s7563_s16 + $0x58] sm:$0xff] %v4990_v36   ;;  %v3781_v48 = vadd.f32 %v7636_v50, %v3681_v38 }
 0x543   : > { %v4100_v22 = vpop.f32.mrf.mxu3 }
 0x544   : > { %v4101_v5 = vadd.f32 %v7534_v21, %v4100_v22  ;;  %v3845_v34 = vmax.f32 %v3781_v48, 0.0 }
 0x546   : > { %v4224_v13 = vmax.f32 %v4101_v5, 0.0 }
 0x547   : > { %v3682_v0 = vpop.f32.mrf.mxu2 }
 0x548   : > { %v3683_v46 = vadd.f32 %v3682_v0, %v3404_v35  ;;  %v3419_v57 = vpop.f32.mrf.mxu1 }
 0x549   : > { %v2914_v29 = vpop.f32.mrf.mxu0 }
 0x54a   : > { %v3782_v62 = vadd.f32 %v7636_v50, %v3683_v46  ;;  %v2953_v8 = vpack.c.bf16 %v2914_v29, %v2911_v45 }
 0x54b   : > { %v4102_v58 = vpop.f32.mrf.mxu3 }
 0x54c   : > { %v3846_v49 = vmax.f32 %v3782_v62, 0.0  ;;  %v4103_v56 = vadd.f32 %v7534_v21, %v4102_v58  ;;  %4817 = vmatmul.msk.bf16.gmra.mxu2 %vm3469_vm11, %v2953_v8 }
 0x54e   : > { %v3888_v3 = vpack.c.bf16 %v3846_v49, %v3845_v34  ;;  %v4225_v39 = vmax.f32 %v4103_v56, 0.0 }
 0x54f   : > { %v3685_v11 = vpop.f32.mrf.mxu2 }
 0x550   : > { %v4995_v40 = vpack.c.bf16 %v4225_v39, %v4224_v13  ;;  %4856 = vmatmul.msk.bf16.gmra.mxu3 %vm2521_vm3, %v3888_v3  ;;  %v3686_v33 = vadd.f32 %v3685_v11, %v7761_v25  ;;  %v3422_v51 = vpop.f32.mrf.mxu1 }
 0x551   : > { %v2917_v35 = vpop.f32.mrf.mxu0 }
 0x552   : > { %5106 = vst [vmem:[%s7563_s16 + $0x60] sm:$0xff] %v4995_v40   ;;  %v3783_v47 = vadd.f32 %v7636_v50, %v3686_v33 }
 0x553   : > { %v4105_v6 = vpop.f32.mrf.mxu3 }
 0x554   : > { %v4106_v31 = vadd.f32 %v7534_v21, %v4105_v6  ;;  %v3847_v10 = vmax.f32 %v3783_v47, 0.0 }
 0x556   : > { %v4226_v25 = vmax.f32 %v4106_v31, 0.0 }
 0x557   : > { %v3687_v63 = vpop.f32.mrf.mxu2 }
 0x558   : > { %v3688_v60 = vadd.f32 %v3687_v63, %v3409_v23 }
 0x559   : > { %v2920_v9 = vpop.f32.mrf.mxu0 }
 0x55a   : > { %v3784_v41 = vadd.f32 %v7636_v50, %v3688_v60  ;;  %v2954_v16 = vpack.c.bf16 %v2920_v9, %v2917_v35 }
 0x55b   : > { %v4107_v53 = vpop.f32.mrf.mxu3 }
 0x55c   : > { %v3848_v54 = vmax.f32 %v3784_v41, 0.0  ;;  %v4108_v43 = vadd.f32 %v7534_v21, %v4107_v53  ;;  %4818 = vmatmul.msk.bf16.gmra.mxu2 %vm3469_vm11, %v2954_v16 }
 0x55e   : > { %v3889_v27 = vpack.c.bf16 %v3848_v54, %v3847_v10  ;;  %v4227_v32 = vmax.f32 %v4108_v43, 0.0 }
 0x55f   : > { %v3690_v19 = vpop.f32.mrf.mxu2 }
 0x560   : > { %v5000_v61 = vpack.c.bf16 %v4227_v32, %v4226_v25  ;;  %4857 = vmatmul.msk.bf16.gmra.mxu3 %vm2521_vm3, %v3889_v27  ;;  %v3691_v23 = vadd.f32 %v3690_v19, %v3412_v28  ;;  %v3424_v28 = vpop.f32.mrf.mxu1 }
 0x562   : > { %5107 = vst [vmem:[%s7563_s16 + $0x68] sm:$0xff] %v5000_v61   ;;  %v3785_v44 = vadd.f32 %v7636_v50, %v3691_v23 }
 0x563   : > { %v4110_v15 = vpop.f32.mrf.mxu3 }
 0x564   : > { %v4111_v7 = vadd.f32 %v7534_v21, %v4110_v15  ;;  %v3849_v20 = vmax.f32 %v3785_v44, 0.0 }
 0x566   : > { %v4228_v37 = vmax.f32 %v4111_v7, 0.0 }
 0x567   : > { %v3692_v18 = vpop.f32.mrf.mxu2 }
 0x568   : > { %v3693_v52 = vadd.f32 %v3692_v18, %v3414_v17  ;;  %v3427_v38 = vpop.f32.mrf.mxu1 }
 0x56a   : > { %v3786_v42 = vadd.f32 %v7636_v50, %v3693_v52 }
 0x56b   : > { %v4112_v14 = vpop.f32.mrf.mxu3 }
 0x56c   : > { %v3850_v4 = vmax.f32 %v3786_v42, 0.0  ;;  %v4113_v26 = vadd.f32 %v7534_v21, %v4112_v14 }
 0x56e   : > { %v3890_v30 = vpack.c.bf16 %v3850_v4, %v3849_v20  ;;  %v4229_v24 = vmax.f32 %v4113_v26, 0.0 }
 0x56f   : > { %v3695_v55 = vpop.f32.mrf.mxu2 }
 0x570   : > { %v5005_v59 = vpack.c.bf16 %v4229_v24, %v4228_v37  ;;  %4858 = vmatmul.msk.bf16.gmra.mxu3 %vm2521_vm3, %v3890_v30  ;;  %v3696_v1 = vadd.f32 %v3695_v55, %v3417_v2  ;;  %v3429_v13 = vpop.f32.mrf.mxu1 }
 0x572   : > { %5108 = vst [vmem:[%s7563_s16 + $0x70] sm:$0xff] %v5005_v59   ;;  %v3787_v45 = vadd.f32 %v7636_v50, %v3696_v1 }
 0x573   : > { %v4115_v12 = vpop.f32.mrf.mxu3 }
 0x574   : > { %v4116_v0 = vadd.f32 %v7534_v21, %v4115_v12  ;;  %v3851_v46 = vmax.f32 %v3787_v45, 0.0 }
 0x576   : > { %v4230_v62 = vmax.f32 %v4116_v0, 0.0 }
 0x577   : > { %v3697_v36 = vpop.f32.mrf.mxu2 }
 0x578   : > { %v3698_v22 = vadd.f32 %v3697_v36, %v3419_v57  ;;  %v3432_v60 = vpop.f32.mrf.mxu1 }
 0x57a   : > { %v3788_v17 = vadd.f32 %v7636_v50, %v3698_v22 }
 0x57b   : > { %v4117_v48 = vpop.f32.mrf.mxu3 }
 0x57c   : > { %v3852_v29 = vmax.f32 %v3788_v17, 0.0  ;;  %v4118_v5 = vadd.f32 %v7534_v21, %v4117_v48  ;;  %v7813_v21 = vld [vmem:[%s7930_s8] ss:$0 sm:$0xff] }
 0x57e   : > { %v3891_v8 = vpack.c.bf16 %v3852_v29, %v3851_v46  ;;  %v4231_v58 = vmax.f32 %v4118_v5, 0.0 }
 0x57f   : > { %v3700_v34 = vpop.f32.mrf.mxu2 }
 0x580   : > { %v5010_v49 = vpack.c.bf16 %v4231_v58, %v4230_v62  ;;  %4859 = vmatmul.msk.bf16.gmra.mxu3 %vm2521_vm3, %v3891_v8  ;;  %v3701_v3 = vadd.f32 %v3700_v34, %v3422_v51  ;;  %v3434_v43 = vpop.f32.mrf.mxu1 }
 0x582   : > { %5109 = vst [vmem:[%s7563_s16 + $0x78] sm:$0xff] %v5010_v49   ;;  %v3789_v11 = vadd.f32 %v7636_v50, %v3701_v3 }
 0x583   : > { %v4120_v56 = vpop.f32.mrf.mxu3 }
 0x584   : > { %v4121_v35 = vadd.f32 %v7813_v21, %v4120_v56  ;;  %v3853_v33 = vmax.f32 %v3789_v11, 0.0 }
 0x586   : > { %v4232_v9 = vmax.f32 %v4121_v35, 0.0 }
 0x587   : > { %v3702_v39 = vpop.f32.mrf.mxu2 }
 0x588   : > { %v3703_v40 = vadd.f32 %v3702_v39, %v3424_v28  ;;  %v3437_v14 = vpop.f32.mrf.mxu1 }
 0x58a   : > { %v3790_v2 = vadd.f32 %v7636_v50, %v3703_v40 }
 0x58b   : > { %v4122_v6 = vpop.f32.mrf.mxu3 }
 0x58c   : > { %v3854_v63 = vmax.f32 %v3790_v2, 0.0  ;;  %v4123_v47 = vadd.f32 %v7813_v21, %v4122_v6 }
 0x58e   : > { %v3892_v31 = vpack.c.bf16 %v3854_v63, %v3853_v33  ;;  %v4233_v41 = vmax.f32 %v4123_v47, 0.0 }
 0x58f   : > { %v3705_v16 = vpop.f32.mrf.mxu2 }
 0x590   : > { %v5015_v53 = vpack.c.bf16 %v4233_v41, %v4232_v9  ;;  %4860 = vmatmul.msk.bf16.gmra.mxu3 %vm2521_vm3, %v3892_v31  ;;  %v3706_v10 = vadd.f32 %v3705_v16, %v3427_v38  ;;  %v3439_v59 = vpop.f32.mrf.mxu1 }
 0x592   : > { %5110 = vst [vmem:[%s7563_s16 + $0x80] sm:$0xff] %v5015_v53   ;;  %v3791_v25 = vadd.f32 %v7636_v50, %v3706_v10 }
 0x593   : > { %v4125_v57 = vpop.f32.mrf.mxu3 }
 0x594   : > { %v4126_v32 = vadd.f32 %v7813_v21, %v4125_v57  ;;  %v3855_v15 = vmax.f32 %v3791_v25, 0.0 }
 0x596   : > { %v4234_v18 = vmax.f32 %v4126_v32, 0.0 }
 0x597   : > { %v3707_v54 = vpop.f32.mrf.mxu2 }
 0x598   : > { %v3708_v27 = vadd.f32 %v3707_v54, %v3429_v13  ;;  %v3442_v29 = vpop.f32.mrf.mxu1 }
 0x59a   : > { %v3792_v19 = vadd.f32 %v7636_v50, %v3708_v27 }
 0x59b   : > { %v4127_v61 = vpop.f32.mrf.mxu3 }
 0x59c   : > { %v3856_v23 = vmax.f32 %v3792_v19, 0.0  ;;  %v4128_v51 = vadd.f32 %v7813_v21, %v4127_v61 }
 0x59e   : > { %v3893_v44 = vpack.c.bf16 %v3856_v23, %v3855_v15  ;;  %v4235_v52 = vmax.f32 %v4128_v51, 0.0 }
 0x59f   : > { %v3710_v7 = vpop.f32.mrf.mxu2 }
 0x5a0   : > { %v5020_v42 = vpack.c.bf16 %v4235_v52, %v4234_v18  ;;  %4861 = vmatmul.msk.bf16.gmra.mxu3 %vm2521_vm3, %v3893_v44  ;;  %v3711_v4 = vadd.f32 %v3710_v7, %v3432_v60  ;;  %v3444_v35 = vpop.f32.mrf.mxu1 }
 0x5a2   : > { %5111 = vst [vmem:[%s7563_s16 + $0x88] sm:$0xff] %v5020_v42   ;;  %v3793_v37 = vadd.f32 %v7636_v50, %v3711_v4 }
 0x5a3   : > { %v4130_v20 = vpop.f32.mrf.mxu3 }
 0x5a4   : > { %v4131_v24 = vadd.f32 %v7813_v21, %v4130_v20  ;;  %v3857_v12 = vmax.f32 %v3793_v37, 0.0 }
 0x5a6   : > { %v4236_v45 = vmax.f32 %v4131_v24, 0.0 }
 0x5a7   : > { %v3712_v26 = vpop.f32.mrf.mxu2 }
 0x5a8   : > { %v3713_v30 = vadd.f32 %v3712_v26, %v3434_v43  ;;  %v3447_v31 = vpop.f32.mrf.mxu1 }
 0x5aa   : > { %v3794_v55 = vadd.f32 %v7636_v50, %v3713_v30 }
 0x5ab   : > { %v4132_v28 = vpop.f32.mrf.mxu3 }
 0x5ac   : > { %v3858_v1 = vmax.f32 %v3794_v55, 0.0  ;;  %v4133_v36 = vadd.f32 %v7813_v21, %v4132_v28 }
 0x5ae   : > { %v3894_v22 = vpack.c.bf16 %v3858_v1, %v3857_v12  ;;  %v4237_v38 = vmax.f32 %v4133_v36, 0.0 }
 0x5af   : > { %v3715_v0 = vpop.f32.mrf.mxu2 }
 0x5b0   : > { %v5025_v17 = vpack.c.bf16 %v4237_v38, %v4236_v45  ;;  %4862 = vmatmul.msk.bf16.gmra.mxu3 %vm2521_vm3, %v3894_v22  ;;  %v3716_v46 = vadd.f32 %v3715_v0, %v3437_v14  ;;  %v3449_v61 = vpop.f32.mrf.mxu1 }
 0x5b2   : > { %5112 = vst [vmem:[%s7563_s16 + $0x90] sm:$0xff] %v5025_v17   ;;  %v3795_v62 = vadd.f32 %v7636_v50, %v3716_v46 }
 0x5b3   : > { %v4135_v48 = vpop.f32.mrf.mxu3 }
 0x5b4   : > { %v4136_v58 = vadd.f32 %v7813_v21, %v4135_v48  ;;  %v3859_v56 = vmax.f32 %v3795_v62, 0.0 }
 0x5b6   : > { %v4238_v39 = vmax.f32 %v4136_v58, 0.0 }
 0x5b7   : > { %v3717_v5 = vpop.f32.mrf.mxu2 }
 0x5b8   : > { %v3718_v8 = vadd.f32 %v3717_v5, %v3439_v59  ;;  %v3452_v26 = vpop.f32.mrf.mxu1 }
 0x5ba   : > { %v3796_v34 = vadd.f32 %v7636_v50, %v3718_v8 }
 0x5bb   : > { %v4137_v49 = vpop.f32.mrf.mxu3 }
 0x5bc   : > { %v3860_v13 = vmax.f32 %v3796_v34, 0.0  ;;  %v4138_v3 = vadd.f32 %v7813_v21, %v4137_v49 }
 0x5be   : > { %v3895_v11 = vpack.c.bf16 %v3860_v13, %v3859_v56  ;;  %v4239_v40 = vmax.f32 %v4138_v3, 0.0 }
 0x5bf   : > { %v3720_v2 = vpop.f32.mrf.mxu2 }
 0x5c0   : > { %v5030_v6 = vpack.c.bf16 %v4239_v40, %v4238_v39  ;;  %4863 = vmatmul.msk.bf16.gmra.mxu3 %vm2521_vm3, %v3895_v11  ;;  %v3721_v63 = vadd.f32 %v3720_v2, %v3442_v29  ;;  %v3454_v1 = vpop.f32.mrf.mxu1 }
 0x5c2   : > { %5113 = vst [vmem:[%s7563_s16 + $0x98] sm:$0xff] %v5030_v6   ;;  %v3797_v60 = vadd.f32 %v7636_v50, %v3721_v63 }
 0x5c3   : > { %v4140_v33 = vpop.f32.mrf.mxu3 }
 0x5c4   : > { %v4141_v41 = vadd.f32 %v7813_v21, %v4140_v33  ;;  %v3861_v57 = vmax.f32 %v3797_v60, 0.0 }
 0x5c6   : > { %v4240_v43 = vmax.f32 %v4141_v41, 0.0 }
 0x5c7   : > { %v3722_v47 = vpop.f32.mrf.mxu2 }
 0x5c8   : > { %v3723_v9 = vadd.f32 %v3722_v47, %v3444_v35 }
 0x5ca   : > { %v3798_v16 = vadd.f32 %v7636_v50, %v3723_v9 }
 0x5cb   : > { %v4142_v53 = vpop.f32.mrf.mxu3 }
 0x5cc   : > { %v3862_v10 = vmax.f32 %v3798_v16, 0.0  ;;  %v4143_v54 = vadd.f32 %v7813_v21, %v4142_v53 }
 0x5ce   : > { %v3896_v25 = vpack.c.bf16 %v3862_v10, %v3861_v57  ;;  %v4241_v27 = vmax.f32 %v4143_v54, 0.0 }
 0x5cf   : > { %v3725_v32 = vpop.f32.mrf.mxu2 }
 0x5d0   : > { %v5035_v19 = vpack.c.bf16 %v4241_v27, %v4240_v43  ;;  %4864 = vmatmul.msk.bf16.gmra.mxu3 %vm2521_vm3, %v3896_v25  ;;  %v3726_v23 = vadd.f32 %v3725_v32, %v3447_v31 }
 0x5d2   : > { %5114 = vst [vmem:[%s7563_s16 + $0xa0] sm:$0xff] %v5035_v19   ;;  %v3799_v18 = vadd.f32 %v7636_v50, %v3726_v23 }
 0x5d3   : > { %v4145_v15 = vpop.f32.mrf.mxu3 }
 0x5d4   : > { %v4146_v52 = vadd.f32 %v7813_v21, %v4145_v15  ;;  %v3863_v14 = vmax.f32 %v3799_v18, 0.0 }
 0x5d6   : > { %v4242_v37 = vmax.f32 %v4146_v52, 0.0 }
 0x5d7   : > { %v3727_v51 = vpop.f32.mrf.mxu2 }
 0x5d8   : > { %v3728_v44 = vadd.f32 %v3727_v51, %v3449_v61 }
 0x5da   : > { %v3800_v7 = vadd.f32 %v7636_v50, %v3728_v44 }
 0x5db   : > { %v4147_v42 = vpop.f32.mrf.mxu3 }
 0x5dc   : > { %v3864_v20 = vmax.f32 %v3800_v7, 0.0  ;;  %v4148_v4 = vadd.f32 %v7813_v21, %v4147_v42 }
 0x5de   : > { %v3897_v30 = vpack.c.bf16 %v3864_v20, %v3863_v14  ;;  %v4243_v24 = vmax.f32 %v4148_v4, 0.0 }
 0x5df   : > { %v3730_v55 = vpop.f32.mrf.mxu2 }
 0x5e0   : > { %v5040_v28 = vpack.c.bf16 %v4243_v24, %v4242_v37  ;;  %4865 = vmatmul.msk.bf16.gmra.mxu3 %vm2521_vm3, %v3897_v30  ;;  %v3731_v12 = vadd.f32 %v3730_v55, %v3452_v26 }
 0x5e2   : > { %5115 = vst [vmem:[%s7563_s16 + $0xa8] sm:$0xff] %v5040_v28   ;;  %v3801_v45 = vadd.f32 %v7636_v50, %v3731_v12 }
 0x5e3   : > { %v4150_v59 = vpop.f32.mrf.mxu3 }
 0x5e4   : > { %v4151_v38 = vadd.f32 %v7813_v21, %v4150_v59  ;;  %v3865_v48 = vmax.f32 %v3801_v45, 0.0 }
 0x5e6   : > { %v4244_v5 = vmax.f32 %v4151_v38, 0.0 }
 0x5e7   : > { %v3732_v36 = vpop.f32.mrf.mxu2 }
 0x5e8   : > { %v3733_v22 = vadd.f32 %v3732_v36, %v3454_v1 }
 0x5ea   : > { %v3802_v0 = vadd.f32 %v7636_v50, %v3733_v22 }
 0x5eb   : > { %v4152_v17 = vpop.f32.mrf.mxu3 }
 0x5ec   : > { %v3866_v46 = vmax.f32 %v3802_v0, 0.0  ;;  %v4153_v29 = vadd.f32 %v7813_v21, %v4152_v17 }
 0x5ee   : > { %v3898_v62 = vpack.c.bf16 %v3866_v46, %v3865_v48  ;;  %v4245_v8 = vmax.f32 %v4153_v29, 0.0 }
 0x5f0   : > { %v5045_v58 = vpack.c.bf16 %v4245_v8, %v4244_v5  ;;  %4866 = vmatmul.msk.bf16.gmra.mxu3 %vm2521_vm3, %v3898_v62 }
 0x5f2   : > { %5116 = vst [vmem:[%s7563_s16 + $0xb0] sm:$0xff] %v5045_v58  }
 0x5f3   : > { %v4155_v34 = vpop.f32.mrf.mxu3 }
 0x5f4   : > { %v4156_v49 = vadd.f32 %v7813_v21, %v4155_v34 }
 0x5f6   : > { %v4246_v13 = vmax.f32 %v4156_v49, 0.0 }
 0x5fb   : > { %v4157_v56 = vpop.f32.mrf.mxu3 }
 0x5fc   : > { %v4158_v50 = vadd.f32 %v7813_v21, %v4157_v56 }
 0x5fe   : > { %v4247_v3 = vmax.f32 %v4158_v50, 0.0 }
 0x600   : > { %v5050_v39 = vpack.c.bf16 %v4247_v3, %v4246_v13 }
 0x602   : > { %5117 = vst [vmem:[%s7563_s16 + $0xb8] sm:$0xff] %v5050_v39  }
 0x603   : > { %v4160_v11 = vpop.f32.mrf.mxu3 }
 0x604   : > { %v4161_v40 = vadd.f32 %v7813_v21, %v4160_v11 }
 0x606   : > { %v4248_v6 = vmax.f32 %v4161_v40, 0.0 }
 0x60b   : > { %v4162_v35 = vpop.f32.mrf.mxu3 }
 0x60c   : > { %v4163_v2 = vadd.f32 %v7813_v21, %v4162_v35 }
 0x60e   : > { %v4249_v33 = vmax.f32 %v4163_v2, 0.0 }
 0x610   : > { %v5055_v63 = vpack.c.bf16 %v4249_v33, %v4248_v6 }
 0x612   : > { %5118 = vst [vmem:[%s7563_s16 + $0xc0] sm:$0xff] %v5055_v63  }
 0x613   : > { %v4165_v47 = vpop.f32.mrf.mxu3 }
 0x614   : > { %v4166_v60 = vadd.f32 %v7813_v21, %v4165_v47 }
 0x616   : > { %v4250_v41 = vmax.f32 %v4166_v60, 0.0 }
 0x61b   : > { %v4167_v9 = vpop.f32.mrf.mxu3 }
 0x61c   : > { %v4168_v31 = vadd.f32 %v7813_v21, %v4167_v9 }
 0x61e   : > { %v4251_v16 = vmax.f32 %v4168_v31, 0.0 }
 0x620   : > { %v5060_v53 = vpack.c.bf16 %v4251_v16, %v4250_v41 }
 0x622   : > { %5119 = vst [vmem:[%s7563_s16 + $0xc8] sm:$0xff] %v5060_v53  }
 0x623   : > { %v4170_v57 = vpop.f32.mrf.mxu3 }
 0x624   : > { %v4171_v10 = vadd.f32 %v7813_v21, %v4170_v57 }
 0x626   : > { %v4252_v25 = vmax.f32 %v4171_v10, 0.0 }
 0x62b   : > { %v4172_v54 = vpop.f32.mrf.mxu3 }
 0x62c   : > { %v4173_v43 = vadd.f32 %v7813_v21, %v4172_v54 }
 0x62e   : > { %v4253_v27 = vmax.f32 %v4173_v43, 0.0 }
 0x630   : > { %v5065_v32 = vpack.c.bf16 %v4253_v27, %v4252_v25 }
 0x632   : > { %5120 = vst [vmem:[%s7563_s16 + $0xd0] sm:$0xff] %v5065_v32  }
 0x633   : > { %v4175_v19 = vpop.f32.mrf.mxu3 }
 0x634   : > { %v4176_v61 = vadd.f32 %v7813_v21, %v4175_v19 }
 0x636   : > { %v4254_v51 = vmax.f32 %v4176_v61, 0.0 }
 0x63b   : > { %v4177_v15 = vpop.f32.mrf.mxu3 }
 0x63c   : > { %v4178_v23 = vadd.f32 %v7813_v21, %v4177_v15 }
 0x63e   : > { %v4255_v18 = vmax.f32 %v4178_v23, 0.0 }
 0x640   : > { %v5070_v44 = vpack.c.bf16 %v4255_v18, %v4254_v51 }
 0x642   : > { %5121 = vst [vmem:[%s7563_s16 + $0xd8] sm:$0xff] %v5070_v44  }
 0x643   : > { %v4180_v52 = vpop.f32.mrf.mxu3 }
 0x644   : > { %v4181_v7 = vadd.f32 %v7813_v21, %v4180_v52 }
 0x646   : > { %v4256_v20 = vmax.f32 %v4181_v7, 0.0 }
 0x64b   : > { %v4182_v42 = vpop.f32.mrf.mxu3 }
 0x64c   : > { %v4183_v14 = vadd.f32 %v7813_v21, %v4182_v42 }
 0x64e   : > { %v4257_v4 = vmax.f32 %v4183_v14, 0.0 }
 0x650   : > { %v5075_v26 = vpack.c.bf16 %v4257_v4, %v4256_v20 }
 0x652   : > { %5122 = vst [vmem:[%s7563_s16 + $0xe0] sm:$0xff] %v5075_v26  }
 0x653   : > { %v4185_v37 = vpop.f32.mrf.mxu3 }
 0x654   : > { %v4186_v30 = vadd.f32 %v7813_v21, %v4185_v37 }
 0x656   : > { %v4258_v28 = vmax.f32 %v4186_v30, 0.0 }
 0x65b   : > { %v4187_v24 = vpop.f32.mrf.mxu3 }
 0x65c   : > { %v4188_v55 = vadd.f32 %v7813_v21, %v4187_v24 }
 0x65e   : > { %v4259_v59 = vmax.f32 %v4188_v55, 0.0 }
 0x660   : > { %v5080_v12 = vpack.c.bf16 %v4259_v59, %v4258_v28 }
 0x662   : > { %5123 = vst [vmem:[%s7563_s16 + $0xe8] sm:$0xff] %v5080_v12  }
 0x663   : > { %v4190_v1 = vpop.f32.mrf.mxu3 }
 0x664   : > { %v4191_v36 = vadd.f32 %v7813_v21, %v4190_v1 }
 0x666   : > { %v4260_v38 = vmax.f32 %v4191_v36, 0.0 }
 0x66b   : > { %v4192_v45 = vpop.f32.mrf.mxu3 }
 0x66c   : > { %v4193_v22 = vadd.f32 %v7813_v21, %v4192_v45 }
 0x66e   : > { %v4261_v0 = vmax.f32 %v4193_v22, 0.0 }
 0x670   : > { %v5085_v17 = vpack.c.bf16 %v4261_v0, %v4260_v38 }
 0x672   : > { %5124 = vst [vmem:[%s7563_s16 + $0xf0] sm:$0xff] %v5085_v17  }
 0x673   : > { %v4195_v48 = vpop.f32.mrf.mxu3 }
 0x674   : > { %v4196_v46 = vadd.f32 %v7813_v21, %v4195_v48 }
 0x676   : > { %v4262_v62 = vmax.f32 %v4196_v46, 0.0 }
 0x67b   : > { %v4197_v29 = vpop.f32.mrf.mxu3 }
 0x67c   : > { %v4198_v5 = vadd.f32 %v7813_v21, %v4197_v29 }
 0x67e   : > { %v4263_v8 = vmax.f32 %v4198_v5, 0.0 }
 0x680   : > { %v5090_v58 = vpack.c.bf16 %v4263_v8, %v4262_v62 }
 0x682   : > { %5125 = vst [vmem:[%s7563_s16 + $0xf8] sm:$0xff] %v5090_v58  }
 0x683   : > { %5325 = shalt.err (!%p5322_p5)
}
 0x684   : > { %s5381_s23 = smov 64   ;;  %s5382_s16 = smov 4  }
 0x685   : > { %5126 = dma.vmem_to_hbm [thread:$0]  (%p5473_p4), %s4408_s29, 4096, %s4410_s18, %s4393_s12, %s5381_s23, %s5381_s23, %s5382_s16  }
 0x686 PF: > { %p5132_p6 = scmp.ge.s32.totalorder %s5376_s14, 2  ;;  %s4424_s26 = sand.u32 1, %s5356_s30  }
 0x687   : > { %s4425_s25 = scalar_lea.sflag [#allocation3], %s4424_s26 }
 0x688   : > { %p5129_p7 = pnand %p5132_p6, %p5480_p8 }
 0x68a   : > { %p5130_p9 = pneg %p5129_p7 }
 0x68c   : > { %5351 = dma.done.wait (%p5130_p9), %s4425_s25, 4096  }
 0x68d   : > { %5353 = vsyncadd (%p5130_p9), %s4425_s25, 4294963200  ;;  %s22_s14 = sadd.s32 1, %s5376_s14   ;;  %s8455_s30 = smov %s5360_s10 }
 0x68e   : > { %p19_p10 = scmp.ge.s32.totalorder %s22_s14, 4   ;;  %s8456_s10 = smov %s5364_s11 }
 0x68f   : > { %s8457_s11 = smov %s5486_s22  ;;  %s8458_s12 = smov %s5372_s13 }
 0x690   : > { %s8459_s13 = smov %s8461_s17  ;;  %21 = sbr.rel (!%p19_p10) target bundleno = 4 (0x4), region = 100 }
 0x695   :  { %4431 = vsyncpa [#allocation3], 1 }
 0x696   :  { %4433 = vsyncpa [#allocation3 + $0x1], 1 }

</bundles_post_ra>
